<compile_context>
chip_gen: v5e
topology: v5e:2x2
jax: 0.10.0
libtpu: 0.0.40
codegen_flags: <defaults>
</compile_context>

<pallas_src>
import functools

import jax
import jax.numpy as jnp
from jax.experimental import pallas as pl
from jax.experimental.pallas import tpu as pltpu

EPS = 1e-7


# --------------------------------------------------------------------------
# Fused kernel: one grid step == one group of BB graphs.
# --------------------------------------------------------------------------
def _capsgnn_kernel(xaug_ref, adj_ref,
                    wg_ref, wh_ref, wc_ref, wd_ref,
                    cexp_ref, e1_ref, e1t_ref, e1til_ref,
                    e2_ref, e2t_ref, fold_ref,
                    r1_ref, x1_ref, r2_ref, x2_ref, xn_ref, rn_ref,
                    out_ref,
                    *, L, N, D, C, T, BB, num_iterations):
    f32 = jnp.float32
    bf16 = jnp.bfloat16
    BBN = BB * N
    BBNL = L * BBN
    K1 = C * D
    K2 = T * D

    xa = xaug_ref[0]                        # [BBN + 8, 128] packed slab
    a = adj_ref[0]                          # [BBN, BBN] block-diag adjacency
    h = xa[0:BBN, 0:D]                      # node features (F zero-padded to D)
    m_col = xa[0:BBN, D:D + 1]              # [BBN, 1] node mask
    m_row = xa[BBN:BBN + 1, 0:BBN]          # [1, BBN]  node mask (row form)
    sel = xa[0:BB, 64:64 + K2]              # [BB, K2]  label one-hot (expanded)

    def squash(s, sq):
        # exact divide keeps routing iterations close to the reference
        return s * sq * jax.lax.rsqrt(sq + EPS) / (1.0 + sq)

    # ---- first capsule layer: L GCN propagation + squash steps, BB graphs
    #      stacked along sublanes (block-diag adjacency -> one MXU matmul) ----
    layer_caps = []
    for l in range(L):
        hw = jnp.dot(h, wg_ref[l], preferred_element_type=f32)        # [BBN, D]
        ah = jnp.dot(a, hw, preferred_element_type=f32)               # [BBN, D]
        xg = ah * m_col
        sq = jnp.sum(xg * xg, axis=-1, keepdims=True)
        h = squash(xg, sq)
        layer_caps.append(h)
    residual = h                                                      # [BBN, D]
    u1 = jnp.concatenate(layer_caps, axis=0)                          # [BBNL, D]

    # ---- dynamic routing over stacked graphs (group sums on the MXU) ----
    def softmax_lanes(b):
        e = jnp.exp(b - jnp.max(b, axis=-1, keepdims=True))
        return e * pl.reciprocal(jnp.sum(e, axis=-1, keepdims=True),
                                 approx=True)

    def routing(u_hat, e, et, red, exp, nout):
        rows = u_hat.shape[0]
        b_log = jnp.zeros((rows, nout), f32)
        v = jnp.zeros((BB, u_hat.shape[1]), f32)
        for it in range(num_iterations):
            c = softmax_lanes(b_log)                                  # [rows, nout]
            c_exp = jnp.dot(c, e, preferred_element_type=f32)         # [rows, K]
            s = jnp.dot(red, c_exp * u_hat,
                        preferred_element_type=f32)                   # [BB, K]
            sq_g = jnp.dot(s * s, et, preferred_element_type=f32)     # [BB, nout]
            sq = jnp.dot(sq_g, e, preferred_element_type=f32)         # [BB, K]
            v = squash(s, sq)
            if it + 1 < num_iterations:
                v_rows = jnp.dot(exp, v, preferred_element_type=f32)  # [rows, K]
                b_log = b_log + jnp.dot(u_hat * v_rows, et,
                                        preferred_element_type=f32)
        return v

    # hidden capsule votes: block-diagonal expansion of u1 (two constant
    # matmuls + mask), then one big bf16 MXU matmul against the flat weights.
    cexp = cexp_ref[...]
    tile_m = cexp[0:D, :]                     # [D, NL*D]
    expm = cexp[D:D + BBNL, :]                # [BBNL, NL*D]
    u1e = jnp.dot(u1, tile_m, preferred_element_type=f32) * expm
    u_hat1 = jnp.dot(u1e.astype(bf16), wh_ref[...],
                     preferred_element_type=f32)                      # [BBNL, K1]
    v1 = routing(u_hat1, e1_ref[...], e1t_ref[...],
                 r1_ref[...], x1_ref[...], C)                         # [BB, K1]

    # class capsule votes via one block-diagonal bf16 MXU matmul
    # TODO(synk): reference's SecondaryCapsuleLayer also consumes second_adj;
    # its source is unavailable, so class routing ignores adjacency.
    v_blk = (jnp.dot(x2_ref[...], v1, preferred_element_type=f32)
             * e1til_ref[...])                                        # [BB*C, K1]
    u_hat2 = jnp.dot(v_blk.astype(bf16), wc_ref[...],
                     preferred_element_type=f32)                      # [BB*C, K2]
    v2 = routing(u_hat2, e2_ref[...], e2t_ref[...],
                 r2_ref[...], x2_ref[...], T)                         # [BB, K2]

    # ---- capsule lengths (class scores) ----
    norms = jnp.sqrt(jnp.dot(v2 * v2, e2t_ref[...],
                             preferred_element_type=f32) + EPS)       # [BB, T]

    # ---- reconstruction decoder + masked-MSE adjacency loss (fused) ----
    wd = wd_ref[...]
    w1a = wd[0:D, :]
    w1b = wd[D:2 * D, :]
    w2 = wd[2 * D:3 * D, :]
    b1 = wd[3 * D:3 * D + 1, :]
    b2 = wd[3 * D + 8:3 * D + 9, :]

    cap = jnp.dot(v2 * sel, fold_ref[...], preferred_element_type=f32)   # [BB, D]
    cap_term = jnp.dot(cap, w1b, preferred_element_type=f32)             # [BB, D]
    h1 = jnp.maximum(
        jnp.dot(residual, w1a, preferred_element_type=f32)
        + jnp.dot(xn_ref[...], cap_term, preferred_element_type=f32)
        + b1, 0.0)                                                       # [BBN, D]
    z = jnp.dot(h1, w2, preferred_element_type=f32) + b2                 # [BBN, D]
    logits = jnp.dot(z, z.T, preferred_element_type=f32)                 # [BBN, BBN]
    recons = jax.nn.sigmoid(logits)

    blkd = jnp.dot(xn_ref[...], rn_ref[...],
                   preferred_element_type=f32)                           # block mask
    m_outer = m_col * m_row * blkd
    diff = recons - a
    num_g = jnp.dot(rn_ref[...],
                    jnp.sum(m_outer * diff * diff, axis=-1, keepdims=True),
                    preferred_element_type=f32)                          # [BB, 1]
    den_g = jnp.dot(rn_ref[...],
                    jnp.sum(m_outer, axis=-1, keepdims=True),
                    preferred_element_type=f32)                          # [BB, 1]

    # ---- single lane-dense output slab per grid step ----
    packed = jnp.concatenate(
        [norms, num_g, den_g, jnp.zeros((BB, 128 - T - 2), f32)], axis=-1)
    if BB < 8:
        packed = jnp.concatenate(
            [packed, jnp.zeros((8 - BB, 128), f32)], axis=0)
    out_ref[0] = packed


# --------------------------------------------------------------------------
# Host wrapper: layout prep (one-off glue) + single pallas_call.
# --------------------------------------------------------------------------
def capsgnn_forward(params, x, adj, y, mask, num_iterations=3):
    B, N, F = x.shape
    D = params["w_gcn"][0].shape[-1]
    L = len(params["w_gcn"])
    C = params["w_hidden"].shape[1]
    T = params["w_class"].shape[1]
    NL, K1, K2 = N * L, C * D, T * D
    f32 = jnp.float32

    # graphs per grid step: stack as many graphs as keep the node rows within
    # one 128-sublane tile (and keep the aux-slab packing valid).
    BB = max(1, min(B, 128 // N, 8))
    G = -(-B // BB)
    Bp = G * BB
    BBN, BBNL, BBC = BB * N, L * BB * N, BB * C

    assert F <= D, "first GCN layer expects F <= D for zero-padding"
    assert D < 64 and K2 <= 64 and BBN <= 128, "aux-slab packing assumptions"

    if Bp != B:
        pb = Bp - B
        x = jnp.pad(x, ((0, pb), (0, 0), (0, 0)))
        adj = jnp.pad(adj, ((0, pb), (0, 0), (0, 0)))
        mask = jnp.pad(mask, ((0, pb), (0, 0)))
        y = jnp.pad(y, ((0, pb),))
    maskf = mask.astype(f32)

    # ---- per-step inputs: packed feature/mask/label slab + block-diag adj ----
    sel = jnp.repeat(jax.nn.one_hot(y, T, dtype=f32), D, axis=-1)      # [Bp, K2]
    x_aug = jnp.zeros((G, BBN + 8, 128), f32)
    x_aug = x_aug.at[:, :BBN, :F].set(x.reshape(G, BBN, F))
    x_aug = x_aug.at[:, :BBN, D].set(maskf.reshape(G, BBN))
    x_aug = x_aug.at[:, :BB, 64:64 + K2].set(sel.reshape(G, BB, K2))
    x_aug = x_aug.at[:, BBN, :BBN].set(maskf.reshape(G, BBN))

    a_blk = jnp.einsum('gbij,bc->gbicj', adj.reshape(G, BB, N, N),
                       jnp.eye(BB, dtype=adj.dtype)).reshape(G, BBN, BBN)

    # ---- weights: stacked GCN weights, lane-dense flattened capsule weights
    #      (bf16), decoder weights packed into one slab ----
    w0 = jnp.pad(params["w_gcn"][0], ((0, D - F), (0, 0)))
    w_gcn = jnp.stack([w0] + [params["w_gcn"][l] for l in range(1, L)], axis=0)
    wh_flat = jnp.transpose(params["w_hidden"], (0, 3, 1, 2)) \
        .reshape(NL * D, K1).astype(jnp.bfloat16)                      # [NL*D, C*D]
    wc_flat = jnp.transpose(params["w_class"], (0, 3, 1, 2)) \
        .reshape(K1, K2).astype(jnp.bfloat16)                          # [C*D, T*D]
    wd = jnp.zeros((3 * D + 16, D), f32)
    wd = wd.at[0:D].set(params["w1"][:D])
    wd = wd.at[D:2 * D].set(params["w1"][D:])
    wd = wd.at[2 * D:3 * D].set(params["w2"])
    wd = wd.at[3 * D].set(params["b1"][0])
    wd = wd.at[3 * D + 8].set(params["b2"][0])

    # ---- grid-invariant expansion / group-reduce constants (hoisted) ----
    def block_expand(nout):                 # E[j, c*D+o] = (c == j)
        return jnp.repeat(jnp.eye(nout, dtype=f32), D, axis=1)

    E1, E2 = block_expand(C), block_expand(T)            # [C,K1], [T,K2]
    E1t, E2t = E1.T, E2.T
    FOLD = jnp.tile(jnp.eye(D, dtype=f32), (T, 1))       # [K2, D]
    TILE = jnp.tile(jnp.eye(D, dtype=f32), (1, NL))      # [D, NL*D]
    caps = jnp.arange(BBNL)
    EXPM = jnp.repeat(
        jax.nn.one_hot((caps // BBN) * N + (caps % N), NL, dtype=f32),
        D, axis=-1)                                      # [BBNL, NL*D]
    CEXP = jnp.concatenate([TILE, EXPM], axis=0)         # [D+BBNL, NL*D]
    X1 = jax.nn.one_hot((caps % BBN) // N, BB, dtype=f32)        # [BBNL, BB]
    R1 = X1.T
    X2 = jax.nn.one_hot(jnp.arange(BBC) // C, BB, dtype=f32)     # [BBC, BB]
    R2 = X2.T
    XN = jax.nn.one_hot(jnp.arange(BBN) // N, BB, dtype=f32)     # [BBN, BB]
    RN = XN.T
    E1TIL = jnp.tile(E1, (BB, 1))                                # [BBC, K1]

    consts = [w_gcn, wh_flat, wc_flat, wd, CEXP, E1, E1t, E1TIL,
              E2, E2t, FOLD, R1, X1, R2, X2, XN, RN]

    def cspec(arr):
        zero = (0,) * arr.ndim
        return pl.BlockSpec(arr.shape, lambda g, _z=zero: _z)

    kernel = functools.partial(_capsgnn_kernel, L=L, N=N, D=D, C=C, T=T,
                               BB=BB, num_iterations=num_iterations)

    out_slab = pl.pallas_call(
        kernel,
        out_shape=jax.ShapeDtypeStruct((G, 8, 128), f32),
        grid=(G,),
        in_specs=[
            pl.BlockSpec((1, BBN + 8, 128), lambda g: (g, 0, 0)),   # packed slab
            pl.BlockSpec((1, BBN, BBN), lambda g: (g, 0, 0)),       # block-diag adj
        ] + [cspec(a) for a in consts],
        out_specs=pl.BlockSpec((1, 8, 128), lambda g: (g, 0, 0)),
        compiler_params=pltpu.CompilerParams(
            dimension_semantics=("parallel",),
            vmem_limit_bytes=32 * 1024 * 1024),
    )(x_aug, a_blk, *consts)

    per_graph = out_slab[:, :BB, :].reshape(Bp, 128)[:B]       # [B, 128]
    out = per_graph[:, :T]
    recon_loss = jnp.sum(per_graph[:, T]) / (jnp.sum(per_graph[:, T + 1]) + EPS)
    return out, recon_loss


# --------------------------------------------------------------------------
# Parameter setup (deterministic), kept in the "reference" layouts.
# --------------------------------------------------------------------------
def init_params(key, N, F, D, L, C, T):
    ks = jax.random.split(key, 8)
    params = {
        "w_gcn": [jax.random.normal(ks[0], (F, D), jnp.float32) * 0.1],
        "w_hidden": jax.random.normal(ks[3], (N * L, C, D, D), jnp.float32) * 0.1,
        "w_class": jax.random.normal(ks[4], (C, T, D, D), jnp.float32) * 0.1,
        "w1": jax.random.normal(ks[5], (2 * D, D), jnp.float32) * 0.1,
        "b1": jnp.zeros((1, D), jnp.float32),
        "w2": jax.random.normal(ks[6], (D, D), jnp.float32) * 0.1,
        "b2": jnp.zeros((1, D), jnp.float32),
    }
    for l in range(1, L):
        params["w_gcn"].append(
            jax.random.normal(ks[l], (D, D), jnp.float32) * 0.1)
    return params


if __name__ == "__main__":
    # args analogue: capsule_dimensions d=4 (=> capsule dim D=d**2=16),
    # num_gcn_layers=2, capsule_num=8, num_iterations=3, dropout omitted (eval).
    B, N, F, T = 2, 16, 8, 4
    d = 4
    D = d * d
    L = 2
    C = 8
    NUM_ITER = 3

    key = jax.random.PRNGKey(0)
    k_x, k_a, k_p = jax.random.split(key, 3)

    x = jax.random.normal(k_x, (B, N, F), jnp.float32)

    # symmetric 0/1 adjacency with self loops, row-normalized
    a_rnd = (jax.random.uniform(k_a, (B, N, N)) > 0.7).astype(jnp.float32)
    a_sym = jnp.clip(a_rnd + jnp.transpose(a_rnd, (0, 2, 1)), 0.0, 1.0)
    adj = jnp.clip(a_sym + jnp.eye(N)[None], 0.0, 1.0)
    adj = adj / jnp.sum(adj, axis=-1, keepdims=True)

    # node mask: graph 0 has all 16 nodes, graph 1 has 12 valid nodes
    mask = jnp.stack([jnp.ones((N,), jnp.float32),
                      (jnp.arange(N) < 12).astype(jnp.float32)], axis=0)
    y = jnp.array([0, 2], jnp.int32)

    params = init_params(k_p, N, F, D, L, C, T)

    fwd = jax.jit(functools.partial(capsgnn_forward, num_iterations=NUM_ITER))
    out, recon_loss = fwd(params, x, adj, y, mask)
    out = jax.block_until_ready(out)
    recon_loss = jax.block_until_ready(recon_loss)

    assert out.shape == (B, T), out.shape
    assert recon_loss.shape == (), recon_loss.shape
    assert bool(jnp.all(jnp.isfinite(out))) and bool(jnp.isfinite(recon_loss))
    print("KERNEL_OK")
</pallas_src>

<mosaic_0001>
module attributes {stable_mosaic.version = 11 : i64} {
  func.func @_capsgnn_kernel(%arg0: i32, %arg1: memref<1x40x128xf32, #tpu.memory_space<vmem>>, %arg2: memref<1x32x32xf32, #tpu.memory_space<vmem>>, %arg3: memref<2x16x16xf32, #tpu.memory_space<vmem>>, %arg4: memref<512x128xbf16, #tpu.memory_space<vmem>>, %arg5: memref<128x64xbf16, #tpu.memory_space<vmem>>, %arg6: memref<64x16xf32, #tpu.memory_space<vmem>>, %arg7: memref<80x512xf32, #tpu.memory_space<vmem>>, %arg8: memref<8x128xf32, #tpu.memory_space<vmem>>, %arg9: memref<128x8xf32, #tpu.memory_space<vmem>>, %arg10: memref<16x128xf32, #tpu.memory_space<vmem>>, %arg11: memref<4x64xf32, #tpu.memory_space<vmem>>, %arg12: memref<64x4xf32, #tpu.memory_space<vmem>>, %arg13: memref<64x16xf32, #tpu.memory_space<vmem>>, %arg14: memref<2x64xf32, #tpu.memory_space<vmem>>, %arg15: memref<64x2xf32, #tpu.memory_space<vmem>>, %arg16: memref<2x16xf32, #tpu.memory_space<vmem>>, %arg17: memref<16x2xf32, #tpu.memory_space<vmem>>, %arg18: memref<32x2xf32, #tpu.memory_space<vmem>>, %arg19: memref<2x32xf32, #tpu.memory_space<vmem>>, %arg20: memref<1x8x128xf32, #tpu.memory_space<vmem>>) attributes {dimension_semantics = [#tpu.dimension_semantics<parallel>], iteration_bounds = array<i64: 1>, scalar_prefetch = 0 : i64, scratch_operands = 0 : i64, tpu.core_type = #tpu.core_type<tc>, window_params = [{transform_indices = @transform_0, window_bounds = array<i64: 1, 40, 128>}, {transform_indices = @transform_1, window_bounds = array<i64: 1, 32, 32>}, {pipeline_mode = #tpu.pipeline_mode<synchronous>, transform_indices = @transform_2, window_bounds = array<i64: 2, 16, 16>}, {pipeline_mode = #tpu.pipeline_mode<synchronous>, transform_indices = @transform_3, window_bounds = array<i64: 512, 128>}, {pipeline_mode = #tpu.pipeline_mode<synchronous>, transform_indices = @transform_4, window_bounds = array<i64: 128, 64>}, {pipeline_mode = #tpu.pipeline_mode<synchronous>, transform_indices = @transform_5, window_bounds = array<i64: 64, 16>}, {pipeline_mode = #tpu.pipeline_mode<synchronous>, transform_indices = @transform_6, window_bounds = array<i64: 80, 512>}, {pipeline_mode = #tpu.pipeline_mode<synchronous>, transform_indices = @transform_7, window_bounds = array<i64: 8, 128>}, {pipeline_mode = #tpu.pipeline_mode<synchronous>, transform_indices = @transform_8, window_bounds = array<i64: 128, 8>}, {pipeline_mode = #tpu.pipeline_mode<synchronous>, transform_indices = @transform_9, window_bounds = array<i64: 16, 128>}, {pipeline_mode = #tpu.pipeline_mode<synchronous>, transform_indices = @transform_10, window_bounds = array<i64: 4, 64>}, {pipeline_mode = #tpu.pipeline_mode<synchronous>, transform_indices = @transform_11, window_bounds = array<i64: 64, 4>}, {pipeline_mode = #tpu.pipeline_mode<synchronous>, transform_indices = @transform_12, window_bounds = array<i64: 64, 16>}, {pipeline_mode = #tpu.pipeline_mode<synchronous>, transform_indices = @transform_13, window_bounds = array<i64: 2, 64>}, {pipeline_mode = #tpu.pipeline_mode<synchronous>, transform_indices = @transform_14, window_bounds = array<i64: 64, 2>}, {pipeline_mode = #tpu.pipeline_mode<synchronous>, transform_indices = @transform_15, window_bounds = array<i64: 2, 16>}, {pipeline_mode = #tpu.pipeline_mode<synchronous>, transform_indices = @transform_16, window_bounds = array<i64: 16, 2>}, {pipeline_mode = #tpu.pipeline_mode<synchronous>, transform_indices = @transform_17, window_bounds = array<i64: 32, 2>}, {pipeline_mode = #tpu.pipeline_mode<synchronous>, transform_indices = @transform_18, window_bounds = array<i64: 2, 32>}, {transform_indices = @transform_19, window_bounds = array<i64: 1, 8, 128>}]} {
    %c0 = arith.constant 0 : index
    %c0_0 = arith.constant 0 : index
    %c0_1 = arith.constant 0 : index
    %0 = vector.load %arg1[%c0, %c0_0, %c0_1] : memref<1x40x128xf32, #tpu.memory_space<vmem>>, vector<1x40x128xf32>
    %1 = vector.shape_cast %0 : vector<1x40x128xf32> to vector<40x128xf32>
    %c0_2 = arith.constant 0 : index
    %c0_3 = arith.constant 0 : index
    %c0_4 = arith.constant 0 : index
    %2 = vector.load %arg2[%c0_2, %c0_3, %c0_4] : memref<1x32x32xf32, #tpu.memory_space<vmem>>, vector<1x32x32xf32>
    %3 = vector.shape_cast %2 : vector<1x32x32xf32> to vector<32x32xf32>
    %4 = vector.extract_strided_slice %1 {offsets = [0, 0], sizes = [32, 16], strides = [1, 1]} : vector<40x128xf32> to vector<32x16xf32>
    %5 = vector.extract_strided_slice %1 {offsets = [0, 16], sizes = [32, 1], strides = [1, 1]} : vector<40x128xf32> to vector<32x1xf32>
    %6 = vector.extract_strided_slice %1 {offsets = [32, 0], sizes = [1, 32], strides = [1, 1]} : vector<40x128xf32> to vector<1x32xf32>
    %7 = vector.extract_strided_slice %1 {offsets = [0, 64], sizes = [2, 64], strides = [1, 1]} : vector<40x128xf32> to vector<2x64xf32>
    %c0_5 = arith.constant 0 : index
    %c0_6 = arith.constant 0 : index
    %c0_7 = arith.constant 0 : index
    %8 = vector.load %arg3[%c0_5, %c0_6, %c0_7] : memref<2x16x16xf32, #tpu.memory_space<vmem>>, vector<1x16x16xf32>
    %9 = vector.shape_cast %8 : vector<1x16x16xf32> to vector<16x16xf32>
    %cst = arith.constant dense<0.000000e+00> : vector<32x16xf32>
    %10 = tpu.matmul %4, %9, %cst {dimension_numbers = #tpu.dot_dimension_numbers<[1], [0], [0], [1], [0, 0, 1, 1], [], []>} : vector<32x16xf32>, vector<16x16xf32>, vector<32x16xf32> -> vector<32x16xf32>
    %cst_8 = arith.constant dense<0.000000e+00> : vector<32x16xf32>
    %11 = tpu.matmul %3, %10, %cst_8 {dimension_numbers = #tpu.dot_dimension_numbers<[1], [0], [0], [1], [0, 0, 1, 1], [], []>} : vector<32x32xf32>, vector<32x16xf32>, vector<32x16xf32> -> vector<32x16xf32>
    %12 = vector.broadcast %5 : vector<32x1xf32> to vector<32x16xf32>
    %13 = arith.mulf %11, %12 : vector<32x16xf32>
    %14 = arith.mulf %13, %13 : vector<32x16xf32>
    %cst_9 = arith.constant dense<0.000000e+00> : vector<32xf32>
    %15 = vector.multi_reduction <add>, %14, %cst_9 [1] : vector<32x16xf32> to vector<32xf32>
    %16 = vector.shape_cast %15 : vector<32xf32> to vector<32x1xf32>
    %17 = vector.broadcast %16 : vector<32x1xf32> to vector<32x16xf32>
    %18 = arith.mulf %13, %17 : vector<32x16xf32>
    %cst_10 = arith.constant 1.000000e-07 : f32
    %19 = vector.broadcast %cst_10 : f32 to vector<32x1xf32>
    %20 = arith.addf %16, %19 : vector<32x1xf32>
    %21 = math.rsqrt %20 : vector<32x1xf32>
    %22 = vector.broadcast %21 : vector<32x1xf32> to vector<32x16xf32>
    %23 = arith.mulf %18, %22 : vector<32x16xf32>
    %cst_11 = arith.constant 1.000000e+00 : f32
    %24 = vector.broadcast %cst_11 : f32 to vector<32x1xf32>
    %25 = arith.addf %24, %16 : vector<32x1xf32>
    %26 = vector.broadcast %25 : vector<32x1xf32> to vector<32x16xf32>
    %27 = arith.divf %23, %26 : vector<32x16xf32>
    %c1 = arith.constant 1 : index
    %c0_12 = arith.constant 0 : index
    %c0_13 = arith.constant 0 : index
    %28 = vector.load %arg3[%c1, %c0_12, %c0_13] : memref<2x16x16xf32, #tpu.memory_space<vmem>>, vector<1x16x16xf32>
    %29 = vector.shape_cast %28 : vector<1x16x16xf32> to vector<16x16xf32>
    %cst_14 = arith.constant dense<0.000000e+00> : vector<32x16xf32>
    %30 = tpu.matmul %27, %29, %cst_14 {dimension_numbers = #tpu.dot_dimension_numbers<[1], [0], [0], [1], [0, 0, 1, 1], [], []>} : vector<32x16xf32>, vector<16x16xf32>, vector<32x16xf32> -> vector<32x16xf32>
    %cst_15 = arith.constant dense<0.000000e+00> : vector<32x16xf32>
    %31 = tpu.matmul %3, %30, %cst_15 {dimension_numbers = #tpu.dot_dimension_numbers<[1], [0], [0], [1], [0, 0, 1, 1], [], []>} : vector<32x32xf32>, vector<32x16xf32>, vector<32x16xf32> -> vector<32x16xf32>
    %32 = vector.broadcast %5 : vector<32x1xf32> to vector<32x16xf32>
    %33 = arith.mulf %31, %32 : vector<32x16xf32>
    %34 = arith.mulf %33, %33 : vector<32x16xf32>
    %cst_16 = arith.constant dense<0.000000e+00> : vector<32xf32>
    %35 = vector.multi_reduction <add>, %34, %cst_16 [1] : vector<32x16xf32> to vector<32xf32>
    %36 = vector.shape_cast %35 : vector<32xf32> to vector<32x1xf32>
    %37 = vector.broadcast %36 : vector<32x1xf32> to vector<32x16xf32>
    %38 = arith.mulf %33, %37 : vector<32x16xf32>
    %cst_17 = arith.constant 1.000000e-07 : f32
    %39 = vector.broadcast %cst_17 : f32 to vector<32x1xf32>
    %40 = arith.addf %36, %39 : vector<32x1xf32>
    %41 = math.rsqrt %40 : vector<32x1xf32>
    %42 = vector.broadcast %41 : vector<32x1xf32> to vector<32x16xf32>
    %43 = arith.mulf %38, %42 : vector<32x16xf32>
    %cst_18 = arith.constant 1.000000e+00 : f32
    %44 = vector.broadcast %cst_18 : f32 to vector<32x1xf32>
    %45 = arith.addf %44, %36 : vector<32x1xf32>
    %46 = vector.broadcast %45 : vector<32x1xf32> to vector<32x16xf32>
    %47 = arith.divf %43, %46 : vector<32x16xf32>
    %48 = tpu.concatenate %27, %47 in 0 : vector<32x16xf32>, vector<32x16xf32> -> vector<64x16xf32>
    %c0_19 = arith.constant 0 : index
    %c0_20 = arith.constant 0 : index
    %49 = vector.load %arg7[%c0_19, %c0_20] : memref<80x512xf32, #tpu.memory_space<vmem>>, vector<80x512xf32>
    %50 = vector.extract_strided_slice %49 {offsets = [0, 0], sizes = [16, 512], strides = [1, 1]} : vector<80x512xf32> to vector<16x512xf32>
    %51 = vector.extract_strided_slice %49 {offsets = [16, 0], sizes = [64, 512], strides = [1, 1]} : vector<80x512xf32> to vector<64x512xf32>
    %cst_21 = arith.constant dense<0.000000e+00> : vector<64x512xf32>
    %52 = tpu.matmul %48, %50, %cst_21 {dimension_numbers = #tpu.dot_dimension_numbers<[1], [0], [0], [1], [0, 0, 1, 1], [], []>} : vector<64x16xf32>, vector<16x512xf32>, vector<64x512xf32> -> vector<64x512xf32>
    %53 = arith.mulf %52, %51 : vector<64x512xf32>
    %54 = arith.truncf %53 : vector<64x512xf32> to vector<64x512xbf16>
    %c0_22 = arith.constant 0 : index
    %c0_23 = arith.constant 0 : index
    %55 = vector.load %arg4[%c0_22, %c0_23] : memref<512x128xbf16, #tpu.memory_space<vmem>>, vector<512x128xbf16>
    %cst_24 = arith.constant dense<0.000000e+00> : vector<64x128xf32>
    %56 = tpu.matmul %54, %55, %cst_24 {dimension_numbers = #tpu.dot_dimension_numbers<[1], [0], [0], [1], [0, 0, 1, 1], [], []>} : vector<64x512xbf16>, vector<512x128xbf16>, vector<64x128xf32> -> vector<64x128xf32>
    %c0_25 = arith.constant 0 : index
    %c0_26 = arith.constant 0 : index
    %57 = vector.load %arg8[%c0_25, %c0_26] : memref<8x128xf32, #tpu.memory_space<vmem>>, vector<8x128xf32>
    %c0_27 = arith.constant 0 : index
    %c0_28 = arith.constant 0 : index
    %58 = vector.load %arg9[%c0_27, %c0_28] : memref<128x8xf32, #tpu.memory_space<vmem>>, vector<128x8xf32>
    %c0_29 = arith.constant 0 : index
    %c0_30 = arith.constant 0 : index
    %59 = vector.load %arg14[%c0_29, %c0_30] : memref<2x64xf32, #tpu.memory_space<vmem>>, vector<2x64xf32>
    %c0_31 = arith.constant 0 : index
    %c0_32 = arith.constant 0 : index
    %60 = vector.load %arg15[%c0_31, %c0_32] : memref<64x2xf32, #tpu.memory_space<vmem>>, vector<64x2xf32>
    %cst_33 = arith.constant 0.000000e+00 : f32
    %61 = vector.broadcast %cst_33 : f32 to vector<64x8xf32>
    %cst_34 = arith.constant dense<0xFF800000> : vector<64xf32>
    %62 = vector.multi_reduction <maximumf>, %61, %cst_34 [1] : vector<64x8xf32> to vector<64xf32>
    %63 = vector.shape_cast %62 : vector<64xf32> to vector<64x1xf32>
    %64 = vector.broadcast %63 : vector<64x1xf32> to vector<64x8xf32>
    %65 = arith.subf %61, %64 : vector<64x8xf32>
    %66 = math.exp %65 : vector<64x8xf32>
    %cst_35 = arith.constant dense<0.000000e+00> : vector<64xf32>
    %67 = vector.multi_reduction <add>, %66, %cst_35 [1] : vector<64x8xf32> to vector<64xf32>
    %68 = vector.shape_cast %67 : vector<64xf32> to vector<64x1xf32>
    %69 = tpu.reciprocal %68 {approx = true} : vector<64x1xf32> -> vector<64x1xf32>
    %70 = vector.broadcast %69 : vector<64x1xf32> to vector<64x8xf32>
    %71 = arith.mulf %66, %70 : vector<64x8xf32>
    %cst_36 = arith.constant dense<0.000000e+00> : vector<64x128xf32>
    %72 = tpu.matmul %71, %57, %cst_36 {dimension_numbers = #tpu.dot_dimension_numbers<[1], [0], [0], [1], [0, 0, 1, 1], [], []>} : vector<64x8xf32>, vector<8x128xf32>, vector<64x128xf32> -> vector<64x128xf32>
    %73 = arith.mulf %72, %56 : vector<64x128xf32>
    %cst_37 = arith.constant dense<0.000000e+00> : vector<2x128xf32>
    %74 = tpu.matmul %59, %73, %cst_37 {dimension_numbers = #tpu.dot_dimension_numbers<[1], [0], [0], [1], [0, 0, 1, 1], [], []>} : vector<2x64xf32>, vector<64x128xf32>, vector<2x128xf32> -> vector<2x128xf32>
    %75 = arith.mulf %74, %74 : vector<2x128xf32>
    %cst_38 = arith.constant dense<0.000000e+00> : vector<2x8xf32>
    %76 = tpu.matmul %75, %58, %cst_38 {dimension_numbers = #tpu.dot_dimension_numbers<[1], [0], [0], [1], [0, 0, 1, 1], [], []>} : vector<2x128xf32>, vector<128x8xf32>, vector<2x8xf32> -> vector<2x8xf32>
    %cst_39 = arith.constant dense<0.000000e+00> : vector<2x128xf32>
    %77 = tpu.matmul %76, %57, %cst_39 {dimension_numbers = #tpu.dot_dimension_numbers<[1], [0], [0], [1], [0, 0, 1, 1], [], []>} : vector<2x8xf32>, vector<8x128xf32>, vector<2x128xf32> -> vector<2x128xf32>
    %78 = arith.mulf %74, %77 : vector<2x128xf32>
    %cst_40 = arith.constant 1.000000e-07 : f32
    %79 = vector.broadcast %cst_40 : f32 to vector<2x128xf32>
    %80 = arith.addf %77, %79 : vector<2x128xf32>
    %81 = math.rsqrt %80 : vector<2x128xf32>
    %82 = arith.mulf %78, %81 : vector<2x128xf32>
    %cst_41 = arith.constant 1.000000e+00 : f32
    %83 = vector.broadcast %cst_41 : f32 to vector<2x128xf32>
    %84 = arith.addf %83, %77 : vector<2x128xf32>
    %85 = arith.divf %82, %84 : vector<2x128xf32>
    %cst_42 = arith.constant dense<0.000000e+00> : vector<64x128xf32>
    %86 = tpu.matmul %60, %85, %cst_42 {dimension_numbers = #tpu.dot_dimension_numbers<[1], [0], [0], [1], [0, 0, 1, 1], [], []>} : vector<64x2xf32>, vector<2x128xf32>, vector<64x128xf32> -> vector<64x128xf32>
    %87 = arith.mulf %56, %86 : vector<64x128xf32>
    %cst_43 = arith.constant dense<0.000000e+00> : vector<64x8xf32>
    %88 = tpu.matmul %87, %58, %cst_43 {dimension_numbers = #tpu.dot_dimension_numbers<[1], [0], [0], [1], [0, 0, 1, 1], [], []>} : vector<64x128xf32>, vector<128x8xf32>, vector<64x8xf32> -> vector<64x8xf32>
    %89 = arith.addf %61, %88 : vector<64x8xf32>
    %cst_44 = arith.constant dense<0xFF800000> : vector<64xf32>
    %90 = vector.multi_reduction <maximumf>, %89, %cst_44 [1] : vector<64x8xf32> to vector<64xf32>
    %91 = vector.shape_cast %90 : vector<64xf32> to vector<64x1xf32>
    %92 = vector.broadcast %91 : vector<64x1xf32> to vector<64x8xf32>
    %93 = arith.subf %89, %92 : vector<64x8xf32>
    %94 = math.exp %93 : vector<64x8xf32>
    %cst_45 = arith.constant dense<0.000000e+00> : vector<64xf32>
    %95 = vector.multi_reduction <add>, %94, %cst_45 [1] : vector<64x8xf32> to vector<64xf32>
    %96 = vector.shape_cast %95 : vector<64xf32> to vector<64x1xf32>
    %97 = tpu.reciprocal %96 {approx = true} : vector<64x1xf32> -> vector<64x1xf32>
    %98 = vector.broadcast %97 : vector<64x1xf32> to vector<64x8xf32>
    %99 = arith.mulf %94, %98 : vector<64x8xf32>
    %cst_46 = arith.constant dense<0.000000e+00> : vector<64x128xf32>
    %100 = tpu.matmul %99, %57, %cst_46 {dimension_numbers = #tpu.dot_dimension_numbers<[1], [0], [0], [1], [0, 0, 1, 1], [], []>} : vector<64x8xf32>, vector<8x128xf32>, vector<64x128xf32> -> vector<64x128xf32>
    %101 = arith.mulf %100, %56 : vector<64x128xf32>
    %cst_47 = arith.constant dense<0.000000e+00> : vector<2x128xf32>
    %102 = tpu.matmul %59, %101, %cst_47 {dimension_numbers = #tpu.dot_dimension_numbers<[1], [0], [0], [1], [0, 0, 1, 1], [], []>} : vector<2x64xf32>, vector<64x128xf32>, vector<2x128xf32> -> vector<2x128xf32>
    %103 = arith.mulf %102, %102 : vector<2x128xf32>
    %cst_48 = arith.constant dense<0.000000e+00> : vector<2x8xf32>
    %104 = tpu.matmul %103, %58, %cst_48 {dimension_numbers = #tpu.dot_dimension_numbers<[1], [0], [0], [1], [0, 0, 1, 1], [], []>} : vector<2x128xf32>, vector<128x8xf32>, vector<2x8xf32> -> vector<2x8xf32>
    %cst_49 = arith.constant dense<0.000000e+00> : vector<2x128xf32>
    %105 = tpu.matmul %104, %57, %cst_49 {dimension_numbers = #tpu.dot_dimension_numbers<[1], [0], [0], [1], [0, 0, 1, 1], [], []>} : vector<2x8xf32>, vector<8x128xf32>, vector<2x128xf32> -> vector<2x128xf32>
    %106 = arith.mulf %102, %105 : vector<2x128xf32>
    %cst_50 = arith.constant 1.000000e-07 : f32
    %107 = vector.broadcast %cst_50 : f32 to vector<2x128xf32>
    %108 = arith.addf %105, %107 : vector<2x128xf32>
    %109 = math.rsqrt %108 : vector<2x128xf32>
    %110 = arith.mulf %106, %109 : vector<2x128xf32>
    %cst_51 = arith.constant 1.000000e+00 : f32
    %111 = vector.broadcast %cst_51 : f32 to vector<2x128xf32>
    %112 = arith.addf %111, %105 : vector<2x128xf32>
    %113 = arith.divf %110, %112 : vector<2x128xf32>
    %cst_52 = arith.constant dense<0.000000e+00> : vector<64x128xf32>
    %114 = tpu.matmul %60, %113, %cst_52 {dimension_numbers = #tpu.dot_dimension_numbers<[1], [0], [0], [1], [0, 0, 1, 1], [], []>} : vector<64x2xf32>, vector<2x128xf32>, vector<64x128xf32> -> vector<64x128xf32>
    %115 = arith.mulf %56, %114 : vector<64x128xf32>
    %cst_53 = arith.constant dense<0.000000e+00> : vector<64x8xf32>
    %116 = tpu.matmul %115, %58, %cst_53 {dimension_numbers = #tpu.dot_dimension_numbers<[1], [0], [0], [1], [0, 0, 1, 1], [], []>} : vector<64x128xf32>, vector<128x8xf32>, vector<64x8xf32> -> vector<64x8xf32>
    %117 = arith.addf %89, %116 : vector<64x8xf32>
    %cst_54 = arith.constant dense<0xFF800000> : vector<64xf32>
    %118 = vector.multi_reduction <maximumf>, %117, %cst_54 [1] : vector<64x8xf32> to vector<64xf32>
    %119 = vector.shape_cast %118 : vector<64xf32> to vector<64x1xf32>
    %120 = vector.broadcast %119 : vector<64x1xf32> to vector<64x8xf32>
    %121 = arith.subf %117, %120 : vector<64x8xf32>
    %122 = math.exp %121 : vector<64x8xf32>
    %cst_55 = arith.constant dense<0.000000e+00> : vector<64xf32>
    %123 = vector.multi_reduction <add>, %122, %cst_55 [1] : vector<64x8xf32> to vector<64xf32>
    %124 = vector.shape_cast %123 : vector<64xf32> to vector<64x1xf32>
    %125 = tpu.reciprocal %124 {approx = true} : vector<64x1xf32> -> vector<64x1xf32>
    %126 = vector.broadcast %125 : vector<64x1xf32> to vector<64x8xf32>
    %127 = arith.mulf %122, %126 : vector<64x8xf32>
    %cst_56 = arith.constant dense<0.000000e+00> : vector<64x128xf32>
    %128 = tpu.matmul %127, %57, %cst_56 {dimension_numbers = #tpu.dot_dimension_numbers<[1], [0], [0], [1], [0, 0, 1, 1], [], []>} : vector<64x8xf32>, vector<8x128xf32>, vector<64x128xf32> -> vector<64x128xf32>
    %129 = arith.mulf %128, %56 : vector<64x128xf32>
    %cst_57 = arith.constant dense<0.000000e+00> : vector<2x128xf32>
    %130 = tpu.matmul %59, %129, %cst_57 {dimension_numbers = #tpu.dot_dimension_numbers<[1], [0], [0], [1], [0, 0, 1, 1], [], []>} : vector<2x64xf32>, vector<64x128xf32>, vector<2x128xf32> -> vector<2x128xf32>
    %131 = arith.mulf %130, %130 : vector<2x128xf32>
    %cst_58 = arith.constant dense<0.000000e+00> : vector<2x8xf32>
    %132 = tpu.matmul %131, %58, %cst_58 {dimension_numbers = #tpu.dot_dimension_numbers<[1], [0], [0], [1], [0, 0, 1, 1], [], []>} : vector<2x128xf32>, vector<128x8xf32>, vector<2x8xf32> -> vector<2x8xf32>
    %cst_59 = arith.constant dense<0.000000e+00> : vector<2x128xf32>
    %133 = tpu.matmul %132, %57, %cst_59 {dimension_numbers = #tpu.dot_dimension_numbers<[1], [0], [0], [1], [0, 0, 1, 1], [], []>} : vector<2x8xf32>, vector<8x128xf32>, vector<2x128xf32> -> vector<2x128xf32>
    %134 = arith.mulf %130, %133 : vector<2x128xf32>
    %cst_60 = arith.constant 1.000000e-07 : f32
    %135 = vector.broadcast %cst_60 : f32 to vector<2x128xf32>
    %136 = arith.addf %133, %135 : vector<2x128xf32>
    %137 = math.rsqrt %136 : vector<2x128xf32>
    %138 = arith.mulf %134, %137 : vector<2x128xf32>
    %cst_61 = arith.constant 1.000000e+00 : f32
    %139 = vector.broadcast %cst_61 : f32 to vector<2x128xf32>
    %140 = arith.addf %139, %133 : vector<2x128xf32>
    %141 = arith.divf %138, %140 : vector<2x128xf32>
    %c0_62 = arith.constant 0 : index
    %c0_63 = arith.constant 0 : index
    %142 = vector.load %arg17[%c0_62, %c0_63] : memref<16x2xf32, #tpu.memory_space<vmem>>, vector<16x2xf32>
    %cst_64 = arith.constant dense<0.000000e+00> : vector<16x128xf32>
    %143 = tpu.matmul %142, %141, %cst_64 {dimension_numbers = #tpu.dot_dimension_numbers<[1], [0], [0], [1], [0, 0, 1, 1], [], []>} : vector<16x2xf32>, vector<2x128xf32>, vector<16x128xf32> -> vector<16x128xf32>
    %c0_65 = arith.constant 0 : index
    %c0_66 = arith.constant 0 : index
    %144 = vector.load %arg10[%c0_65, %c0_66] : memref<16x128xf32, #tpu.memory_space<vmem>>, vector<16x128xf32>
    %145 = arith.mulf %143, %144 : vector<16x128xf32>
    %146 = arith.truncf %145 : vector<16x128xf32> to vector<16x128xbf16>
    %c0_67 = arith.constant 0 : index
    %c0_68 = arith.constant 0 : index
    %147 = vector.load %arg5[%c0_67, %c0_68] : memref<128x64xbf16, #tpu.memory_space<vmem>>, vector<128x64xbf16>
    %cst_69 = arith.constant dense<0.000000e+00> : vector<16x64xf32>
    %148 = tpu.matmul %146, %147, %cst_69 {dimension_numbers = #tpu.dot_dimension_numbers<[1], [0], [0], [1], [0, 0, 1, 1], [], []>} : vector<16x128xbf16>, vector<128x64xbf16>, vector<16x64xf32> -> vector<16x64xf32>
    %c0_70 = arith.constant 0 : index
    %c0_71 = arith.constant 0 : index
    %149 = vector.load %arg11[%c0_70, %c0_71] : memref<4x64xf32, #tpu.memory_space<vmem>>, vector<4x64xf32>
    %c0_72 = arith.constant 0 : index
    %c0_73 = arith.constant 0 : index
    %150 = vector.load %arg12[%c0_72, %c0_73] : memref<64x4xf32, #tpu.memory_space<vmem>>, vector<64x4xf32>
    %c0_74 = arith.constant 0 : index
    %c0_75 = arith.constant 0 : index
    %151 = vector.load %arg16[%c0_74, %c0_75] : memref<2x16xf32, #tpu.memory_space<vmem>>, vector<2x16xf32>
    %c0_76 = arith.constant 0 : index
    %c0_77 = arith.constant 0 : index
    %152 = vector.load %arg17[%c0_76, %c0_77] : memref<16x2xf32, #tpu.memory_space<vmem>>, vector<16x2xf32>
    %cst_78 = arith.constant 0.000000e+00 : f32
    %153 = vector.broadcast %cst_78 : f32 to vector<16x4xf32>
    %cst_79 = arith.constant dense<0xFF800000> : vector<16xf32>
    %154 = vector.multi_reduction <maximumf>, %153, %cst_79 [1] : vector<16x4xf32> to vector<16xf32>
    %155 = vector.shape_cast %154 : vector<16xf32> to vector<16x1xf32>
    %156 = vector.broadcast %155 : vector<16x1xf32> to vector<16x4xf32>
    %157 = arith.subf %153, %156 : vector<16x4xf32>
    %158 = math.exp %157 : vector<16x4xf32>
    %cst_80 = arith.constant dense<0.000000e+00> : vector<16xf32>
    %159 = vector.multi_reduction <add>, %158, %cst_80 [1] : vector<16x4xf32> to vector<16xf32>
    %160 = vector.shape_cast %159 : vector<16xf32> to vector<16x1xf32>
    %161 = tpu.reciprocal %160 {approx = true} : vector<16x1xf32> -> vector<16x1xf32>
    %162 = vector.broadcast %161 : vector<16x1xf32> to vector<16x4xf32>
    %163 = arith.mulf %158, %162 : vector<16x4xf32>
    %cst_81 = arith.constant dense<0.000000e+00> : vector<16x64xf32>
    %164 = tpu.matmul %163, %149, %cst_81 {dimension_numbers = #tpu.dot_dimension_numbers<[1], [0], [0], [1], [0, 0, 1, 1], [], []>} : vector<16x4xf32>, vector<4x64xf32>, vector<16x64xf32> -> vector<16x64xf32>
    %165 = arith.mulf %164, %148 : vector<16x64xf32>
    %cst_82 = arith.constant dense<0.000000e+00> : vector<2x64xf32>
    %166 = tpu.matmul %151, %165, %cst_82 {dimension_numbers = #tpu.dot_dimension_numbers<[1], [0], [0], [1], [0, 0, 1, 1], [], []>} : vector<2x16xf32>, vector<16x64xf32>, vector<2x64xf32> -> vector<2x64xf32>
    %167 = arith.mulf %166, %166 : vector<2x64xf32>
    %cst_83 = arith.constant dense<0.000000e+00> : vector<2x4xf32>
    %168 = tpu.matmul %167, %150, %cst_83 {dimension_numbers = #tpu.dot_dimension_numbers<[1], [0], [0], [1], [0, 0, 1, 1], [], []>} : vector<2x64xf32>, vector<64x4xf32>, vector<2x4xf32> -> vector<2x4xf32>
    %cst_84 = arith.constant dense<0.000000e+00> : vector<2x64xf32>
    %169 = tpu.matmul %168, %149, %cst_84 {dimension_numbers = #tpu.dot_dimension_numbers<[1], [0], [0], [1], [0, 0, 1, 1], [], []>} : vector<2x4xf32>, vector<4x64xf32>, vector<2x64xf32> -> vector<2x64xf32>
    %170 = arith.mulf %166, %169 : vector<2x64xf32>
    %cst_85 = arith.constant 1.000000e-07 : f32
    %171 = vector.broadcast %cst_85 : f32 to vector<2x64xf32>
    %172 = arith.addf %169, %171 : vector<2x64xf32>
    %173 = math.rsqrt %172 : vector<2x64xf32>
    %174 = arith.mulf %170, %173 : vector<2x64xf32>
    %cst_86 = arith.constant 1.000000e+00 : f32
    %175 = vector.broadcast %cst_86 : f32 to vector<2x64xf32>
    %176 = arith.addf %175, %169 : vector<2x64xf32>
    %177 = arith.divf %174, %176 : vector<2x64xf32>
    %cst_87 = arith.constant dense<0.000000e+00> : vector<16x64xf32>
    %178 = tpu.matmul %152, %177, %cst_87 {dimension_numbers = #tpu.dot_dimension_numbers<[1], [0], [0], [1], [0, 0, 1, 1], [], []>} : vector<16x2xf32>, vector<2x64xf32>, vector<16x64xf32> -> vector<16x64xf32>
    %179 = arith.mulf %148, %178 : vector<16x64xf32>
    %cst_88 = arith.constant dense<0.000000e+00> : vector<16x4xf32>
    %180 = tpu.matmul %179, %150, %cst_88 {dimension_numbers = #tpu.dot_dimension_numbers<[1], [0], [0], [1], [0, 0, 1, 1], [], []>} : vector<16x64xf32>, vector<64x4xf32>, vector<16x4xf32> -> vector<16x4xf32>
    %181 = arith.addf %153, %180 : vector<16x4xf32>
    %cst_89 = arith.constant dense<0xFF800000> : vector<16xf32>
    %182 = vector.multi_reduction <maximumf>, %181, %cst_89 [1] : vector<16x4xf32> to vector<16xf32>
    %183 = vector.shape_cast %182 : vector<16xf32> to vector<16x1xf32>
    %184 = vector.broadcast %183 : vector<16x1xf32> to vector<16x4xf32>
    %185 = arith.subf %181, %184 : vector<16x4xf32>
    %186 = math.exp %185 : vector<16x4xf32>
    %cst_90 = arith.constant dense<0.000000e+00> : vector<16xf32>
    %187 = vector.multi_reduction <add>, %186, %cst_90 [1] : vector<16x4xf32> to vector<16xf32>
    %188 = vector.shape_cast %187 : vector<16xf32> to vector<16x1xf32>
    %189 = tpu.reciprocal %188 {approx = true} : vector<16x1xf32> -> vector<16x1xf32>
    %190 = vector.broadcast %189 : vector<16x1xf32> to vector<16x4xf32>
    %191 = arith.mulf %186, %190 : vector<16x4xf32>
    %cst_91 = arith.constant dense<0.000000e+00> : vector<16x64xf32>
    %192 = tpu.matmul %191, %149, %cst_91 {dimension_numbers = #tpu.dot_dimension_numbers<[1], [0], [0], [1], [0, 0, 1, 1], [], []>} : vector<16x4xf32>, vector<4x64xf32>, vector<16x64xf32> -> vector<16x64xf32>
    %193 = arith.mulf %192, %148 : vector<16x64xf32>
    %cst_92 = arith.constant dense<0.000000e+00> : vector<2x64xf32>
    %194 = tpu.matmul %151, %193, %cst_92 {dimension_numbers = #tpu.dot_dimension_numbers<[1], [0], [0], [1], [0, 0, 1, 1], [], []>} : vector<2x16xf32>, vector<16x64xf32>, vector<2x64xf32> -> vector<2x64xf32>
    %195 = arith.mulf %194, %194 : vector<2x64xf32>
    %cst_93 = arith.constant dense<0.000000e+00> : vector<2x4xf32>
    %196 = tpu.matmul %195, %150, %cst_93 {dimension_numbers = #tpu.dot_dimension_numbers<[1], [0], [0], [1], [0, 0, 1, 1], [], []>} : vector<2x64xf32>, vector<64x4xf32>, vector<2x4xf32> -> vector<2x4xf32>
    %cst_94 = arith.constant dense<0.000000e+00> : vector<2x64xf32>
    %197 = tpu.matmul %196, %149, %cst_94 {dimension_numbers = #tpu.dot_dimension_numbers<[1], [0], [0], [1], [0, 0, 1, 1], [], []>} : vector<2x4xf32>, vector<4x64xf32>, vector<2x64xf32> -> vector<2x64xf32>
    %198 = arith.mulf %194, %197 : vector<2x64xf32>
    %cst_95 = arith.constant 1.000000e-07 : f32
    %199 = vector.broadcast %cst_95 : f32 to vector<2x64xf32>
    %200 = arith.addf %197, %199 : vector<2x64xf32>
    %201 = math.rsqrt %200 : vector<2x64xf32>
    %202 = arith.mulf %198, %201 : vector<2x64xf32>
    %cst_96 = arith.constant 1.000000e+00 : f32
    %203 = vector.broadcast %cst_96 : f32 to vector<2x64xf32>
    %204 = arith.addf %203, %197 : vector<2x64xf32>
    %205 = arith.divf %202, %204 : vector<2x64xf32>
    %cst_97 = arith.constant dense<0.000000e+00> : vector<16x64xf32>
    %206 = tpu.matmul %152, %205, %cst_97 {dimension_numbers = #tpu.dot_dimension_numbers<[1], [0], [0], [1], [0, 0, 1, 1], [], []>} : vector<16x2xf32>, vector<2x64xf32>, vector<16x64xf32> -> vector<16x64xf32>
    %207 = arith.mulf %148, %206 : vector<16x64xf32>
    %cst_98 = arith.constant dense<0.000000e+00> : vector<16x4xf32>
    %208 = tpu.matmul %207, %150, %cst_98 {dimension_numbers = #tpu.dot_dimension_numbers<[1], [0], [0], [1], [0, 0, 1, 1], [], []>} : vector<16x64xf32>, vector<64x4xf32>, vector<16x4xf32> -> vector<16x4xf32>
    %209 = arith.addf %181, %208 : vector<16x4xf32>
    %cst_99 = arith.constant dense<0xFF800000> : vector<16xf32>
    %210 = vector.multi_reduction <maximumf>, %209, %cst_99 [1] : vector<16x4xf32> to vector<16xf32>
    %211 = vector.shape_cast %210 : vector<16xf32> to vector<16x1xf32>
    %212 = vector.broadcast %211 : vector<16x1xf32> to vector<16x4xf32>
    %213 = arith.subf %209, %212 : vector<16x4xf32>
    %214 = math.exp %213 : vector<16x4xf32>
    %cst_100 = arith.constant dense<0.000000e+00> : vector<16xf32>
    %215 = vector.multi_reduction <add>, %214, %cst_100 [1] : vector<16x4xf32> to vector<16xf32>
    %216 = vector.shape_cast %215 : vector<16xf32> to vector<16x1xf32>
    %217 = tpu.reciprocal %216 {approx = true} : vector<16x1xf32> -> vector<16x1xf32>
    %218 = vector.broadcast %217 : vector<16x1xf32> to vector<16x4xf32>
    %219 = arith.mulf %214, %218 : vector<16x4xf32>
    %cst_101 = arith.constant dense<0.000000e+00> : vector<16x64xf32>
    %220 = tpu.matmul %219, %149, %cst_101 {dimension_numbers = #tpu.dot_dimension_numbers<[1], [0], [0], [1], [0, 0, 1, 1], [], []>} : vector<16x4xf32>, vector<4x64xf32>, vector<16x64xf32> -> vector<16x64xf32>
    %221 = arith.mulf %220, %148 : vector<16x64xf32>
    %cst_102 = arith.constant dense<0.000000e+00> : vector<2x64xf32>
    %222 = tpu.matmul %151, %221, %cst_102 {dimension_numbers = #tpu.dot_dimension_numbers<[1], [0], [0], [1], [0, 0, 1, 1], [], []>} : vector<2x16xf32>, vector<16x64xf32>, vector<2x64xf32> -> vector<2x64xf32>
    %223 = arith.mulf %222, %222 : vector<2x64xf32>
    %cst_103 = arith.constant dense<0.000000e+00> : vector<2x4xf32>
    %224 = tpu.matmul %223, %150, %cst_103 {dimension_numbers = #tpu.dot_dimension_numbers<[1], [0], [0], [1], [0, 0, 1, 1], [], []>} : vector<2x64xf32>, vector<64x4xf32>, vector<2x4xf32> -> vector<2x4xf32>
    %cst_104 = arith.constant dense<0.000000e+00> : vector<2x64xf32>
    %225 = tpu.matmul %224, %149, %cst_104 {dimension_numbers = #tpu.dot_dimension_numbers<[1], [0], [0], [1], [0, 0, 1, 1], [], []>} : vector<2x4xf32>, vector<4x64xf32>, vector<2x64xf32> -> vector<2x64xf32>
    %226 = arith.mulf %222, %225 : vector<2x64xf32>
    %cst_105 = arith.constant 1.000000e-07 : f32
    %227 = vector.broadcast %cst_105 : f32 to vector<2x64xf32>
    %228 = arith.addf %225, %227 : vector<2x64xf32>
    %229 = math.rsqrt %228 : vector<2x64xf32>
    %230 = arith.mulf %226, %229 : vector<2x64xf32>
    %cst_106 = arith.constant 1.000000e+00 : f32
    %231 = vector.broadcast %cst_106 : f32 to vector<2x64xf32>
    %232 = arith.addf %231, %225 : vector<2x64xf32>
    %233 = arith.divf %230, %232 : vector<2x64xf32>
    %234 = arith.mulf %233, %233 : vector<2x64xf32>
    %c0_107 = arith.constant 0 : index
    %c0_108 = arith.constant 0 : index
    %235 = vector.load %arg12[%c0_107, %c0_108] : memref<64x4xf32, #tpu.memory_space<vmem>>, vector<64x4xf32>
    %cst_109 = arith.constant dense<0.000000e+00> : vector<2x4xf32>
    %236 = tpu.matmul %234, %235, %cst_109 {dimension_numbers = #tpu.dot_dimension_numbers<[1], [0], [0], [1], [0, 0, 1, 1], [], []>} : vector<2x64xf32>, vector<64x4xf32>, vector<2x4xf32> -> vector<2x4xf32>
    %cst_110 = arith.constant 1.000000e-07 : f32
    %237 = vector.broadcast %cst_110 : f32 to vector<2x4xf32>
    %238 = arith.addf %236, %237 : vector<2x4xf32>
    %239 = math.sqrt %238 : vector<2x4xf32>
    %c0_111 = arith.constant 0 : index
    %c0_112 = arith.constant 0 : index
    %240 = vector.load %arg6[%c0_111, %c0_112] : memref<64x16xf32, #tpu.memory_space<vmem>>, vector<64x16xf32>
    %241 = vector.extract_strided_slice %240 {offsets = [0, 0], sizes = [16, 16], strides = [1, 1]} : vector<64x16xf32> to vector<16x16xf32>
    %242 = vector.extract_strided_slice %240 {offsets = [16, 0], sizes = [16, 16], strides = [1, 1]} : vector<64x16xf32> to vector<16x16xf32>
    %243 = vector.extract_strided_slice %240 {offsets = [32, 0], sizes = [16, 16], strides = [1, 1]} : vector<64x16xf32> to vector<16x16xf32>
    %244 = vector.extract_strided_slice %240 {offsets = [48, 0], sizes = [1, 16], strides = [1, 1]} : vector<64x16xf32> to vector<1x16xf32>
    %245 = vector.extract_strided_slice %240 {offsets = [56, 0], sizes = [1, 16], strides = [1, 1]} : vector<64x16xf32> to vector<1x16xf32>
    %246 = arith.mulf %233, %7 : vector<2x64xf32>
    %c0_113 = arith.constant 0 : index
    %c0_114 = arith.constant 0 : index
    %247 = vector.load %arg13[%c0_113, %c0_114] : memref<64x16xf32, #tpu.memory_space<vmem>>, vector<64x16xf32>
    %cst_115 = arith.constant dense<0.000000e+00> : vector<2x16xf32>
    %248 = tpu.matmul %246, %247, %cst_115 {dimension_numbers = #tpu.dot_dimension_numbers<[1], [0], [0], [1], [0, 0, 1, 1], [], []>} : vector<2x64xf32>, vector<64x16xf32>, vector<2x16xf32> -> vector<2x16xf32>
    %cst_116 = arith.constant dense<0.000000e+00> : vector<2x16xf32>
    %249 = tpu.matmul %248, %242, %cst_116 {dimension_numbers = #tpu.dot_dimension_numbers<[1], [0], [0], [1], [0, 0, 1, 1], [], []>} : vector<2x16xf32>, vector<16x16xf32>, vector<2x16xf32> -> vector<2x16xf32>
    %cst_117 = arith.constant dense<0.000000e+00> : vector<32x16xf32>
    %250 = tpu.matmul %47, %241, %cst_117 {dimension_numbers = #tpu.dot_dimension_numbers<[1], [0], [0], [1], [0, 0, 1, 1], [], []>} : vector<32x16xf32>, vector<16x16xf32>, vector<32x16xf32> -> vector<32x16xf32>
    %c0_118 = arith.constant 0 : index
    %c0_119 = arith.constant 0 : index
    %251 = vector.load %arg18[%c0_118, %c0_119] : memref<32x2xf32, #tpu.memory_space<vmem>>, vector<32x2xf32>
    %cst_120 = arith.constant dense<0.000000e+00> : vector<32x16xf32>
    %252 = tpu.matmul %251, %249, %cst_120 {dimension_numbers = #tpu.dot_dimension_numbers<[1], [0], [0], [1], [0, 0, 1, 1], [], []>} : vector<32x2xf32>, vector<2x16xf32>, vector<32x16xf32> -> vector<32x16xf32>
    %253 = arith.addf %250, %252 : vector<32x16xf32>
    %254 = vector.broadcast %244 : vector<1x16xf32> to vector<32x16xf32>
    %255 = arith.addf %253, %254 : vector<32x16xf32>
    %cst_121 = arith.constant 0.000000e+00 : f32
    %256 = vector.broadcast %cst_121 : f32 to vector<32x16xf32>
    %257 = arith.maximumf %255, %256 : vector<32x16xf32>
    %cst_122 = arith.constant dense<0.000000e+00> : vector<32x16xf32>
    %258 = tpu.matmul %257, %243, %cst_122 {dimension_numbers = #tpu.dot_dimension_numbers<[1], [0], [0], [1], [0, 0, 1, 1], [], []>} : vector<32x16xf32>, vector<16x16xf32>, vector<32x16xf32> -> vector<32x16xf32>
    %259 = vector.broadcast %245 : vector<1x16xf32> to vector<32x16xf32>
    %260 = arith.addf %258, %259 : vector<32x16xf32>
    %261 = tpu.transpose %260, [1, 0] : vector<32x16xf32> -> vector<16x32xf32>
    %cst_123 = arith.constant dense<0.000000e+00> : vector<32x32xf32>
    %262 = tpu.matmul %260, %261, %cst_123 {dimension_numbers = #tpu.dot_dimension_numbers<[1], [0], [0], [1], [0, 0, 1, 1], [], []>} : vector<32x16xf32>, vector<16x32xf32>, vector<32x32xf32> -> vector<32x32xf32>
    %263 = arith.negf %262 : vector<32x32xf32>
    %264 = math.exp %263 : vector<32x32xf32>
    %cst_124 = arith.constant 1.000000e+00 : f32
    %265 = vector.broadcast %cst_124 : f32 to vector<32x32xf32>
    %266 = arith.addf %265, %264 : vector<32x32xf32>
    %267 = arith.divf %265, %266 : vector<32x32xf32>
    %c0_125 = arith.constant 0 : index
    %c0_126 = arith.constant 0 : index
    %268 = vector.load %arg18[%c0_125, %c0_126] : memref<32x2xf32, #tpu.memory_space<vmem>>, vector<32x2xf32>
    %c0_127 = arith.constant 0 : index
    %c0_128 = arith.constant 0 : index
    %269 = vector.load %arg19[%c0_127, %c0_128] : memref<2x32xf32, #tpu.memory_space<vmem>>, vector<2x32xf32>
    %cst_129 = arith.constant dense<0.000000e+00> : vector<32x32xf32>
    %270 = tpu.matmul %268, %269, %cst_129 {dimension_numbers = #tpu.dot_dimension_numbers<[1], [0], [0], [1], [0, 0, 1, 1], [], []>} : vector<32x2xf32>, vector<2x32xf32>, vector<32x32xf32> -> vector<32x32xf32>
    %271 = vector.broadcast %5 : vector<32x1xf32> to vector<32x32xf32>
    %272 = vector.broadcast %6 : vector<1x32xf32> to vector<32x32xf32>
    %273 = arith.mulf %271, %272 : vector<32x32xf32>
    %274 = arith.mulf %273, %270 : vector<32x32xf32>
    %275 = arith.subf %267, %3 : vector<32x32xf32>
    %c0_130 = arith.constant 0 : index
    %c0_131 = arith.constant 0 : index
    %276 = vector.load %arg19[%c0_130, %c0_131] : memref<2x32xf32, #tpu.memory_space<vmem>>, vector<2x32xf32>
    %277 = arith.mulf %274, %275 : vector<32x32xf32>
    %278 = arith.mulf %277, %275 : vector<32x32xf32>
    %cst_132 = arith.constant dense<0.000000e+00> : vector<32xf32>
    %279 = vector.multi_reduction <add>, %278, %cst_132 [1] : vector<32x32xf32> to vector<32xf32>
    %280 = vector.shape_cast %279 : vector<32xf32> to vector<32x1xf32>
    %cst_133 = arith.constant dense<0.000000e+00> : vector<2x1xf32>
    %281 = tpu.matmul %276, %280, %cst_133 {dimension_numbers = #tpu.dot_dimension_numbers<[1], [0], [0], [1], [0, 0, 1, 1], [], []>} : vector<2x32xf32>, vector<32x1xf32>, vector<2x1xf32> -> vector<2x1xf32>
    %c0_134 = arith.constant 0 : index
    %c0_135 = arith.constant 0 : index
    %282 = vector.load %arg19[%c0_134, %c0_135] : memref<2x32xf32, #tpu.memory_space<vmem>>, vector<2x32xf32>
    %cst_136 = arith.constant dense<0.000000e+00> : vector<32xf32>
    %283 = vector.multi_reduction <add>, %274, %cst_136 [1] : vector<32x32xf32> to vector<32xf32>
    %284 = vector.shape_cast %283 : vector<32xf32> to vector<32x1xf32>
    %cst_137 = arith.constant dense<0.000000e+00> : vector<2x1xf32>
    %285 = tpu.matmul %282, %284, %cst_137 {dimension_numbers = #tpu.dot_dimension_numbers<[1], [0], [0], [1], [0, 0, 1, 1], [], []>} : vector<2x32xf32>, vector<32x1xf32>, vector<2x1xf32> -> vector<2x1xf32>
    %cst_138 = arith.constant 0.000000e+00 : f32
    %286 = vector.broadcast %cst_138 : f32 to vector<2x122xf32>
    %287 = tpu.concatenate %239, %281, %285, %286 in 1 : vector<2x4xf32>, vector<2x1xf32>, vector<2x1xf32>, vector<2x122xf32> -> vector<2x128xf32>
    %cst_139 = arith.constant 0.000000e+00 : f32
    %288 = vector.broadcast %cst_139 : f32 to vector<6x128xf32>
    %289 = tpu.concatenate %287, %288 in 0 : vector<2x128xf32>, vector<6x128xf32> -> vector<8x128xf32>
    %c0_140 = arith.constant 0 : index
    %c0_141 = arith.constant 0 : index
    %c0_142 = arith.constant 0 : index
    %290 = vector.load %arg20[%c0_140, %c0_141, %c0_142] : memref<1x8x128xf32, #tpu.memory_space<vmem>>, vector<1x8x128xf32>
    %291 = vector.shape_cast %290 : vector<1x8x128xf32> to vector<8x128xf32>
    %292 = vector.shape_cast %289 : vector<8x128xf32> to vector<1x8x128xf32>
    tpu.vector_store %arg20[%c0_140, %c0_141, %c0_142], %292 {strides = array<i32>} : memref<1x8x128xf32, #tpu.memory_space<vmem>>, vector<1x8x128xf32>,
    return
  }
  func.func @transform_0(%arg0: i32) -> (i32, i32, i32) {
    %c0_i32 = arith.constant 0 : i32
    %c0_i32_0 = arith.constant 0 : i32
    %c0_i32_1 = arith.constant 0 : i32
    return %arg0, %c0_i32, %c0_i32_0 : i32, i32, i32
  }
  func.func @transform_1(%arg0: i32) -> (i32, i32, i32) {
    %c0_i32 = arith.constant 0 : i32
    %c0_i32_0 = arith.constant 0 : i32
    %c0_i32_1 = arith.constant 0 : i32
    return %arg0, %c0_i32, %c0_i32_0 : i32, i32, i32
  }
  func.func @transform_2(%arg0: i32) -> (i32, i32, i32) {
    %c0_i32 = arith.constant 0 : i32
    %c0_i32_0 = arith.constant 0 : i32
    %c0_i32_1 = arith.constant 0 : i32
    %c0_i32_2 = arith.constant 0 : i32
    return %c0_i32, %c0_i32_0, %c0_i32_1 : i32, i32, i32
  }
  func.func @transform_3(%arg0: i32) -> (i32, i32) {
    %c0_i32 = arith.constant 0 : i32
    %c0_i32_0 = arith.constant 0 : i32
    %c0_i32_1 = arith.constant 0 : i32
    return %c0_i32, %c0_i32_0 : i32, i32
  }
  func.func @transform_4(%arg0: i32) -> (i32, i32) {
    %c0_i32 = arith.constant 0 : i32
    %c0_i32_0 = arith.constant 0 : i32
    %c0_i32_1 = arith.constant 0 : i32
    return %c0_i32, %c0_i32_0 : i32, i32
  }
  func.func @transform_5(%arg0: i32) -> (i32, i32) {
    %c0_i32 = arith.constant 0 : i32
    %c0_i32_0 = arith.constant 0 : i32
    %c0_i32_1 = arith.constant 0 : i32
    return %c0_i32, %c0_i32_0 : i32, i32
  }
  func.func @transform_6(%arg0: i32) -> (i32, i32) {
    %c0_i32 = arith.constant 0 : i32
    %c0_i32_0 = arith.constant 0 : i32
    %c0_i32_1 = arith.constant 0 : i32
    return %c0_i32, %c0_i32_0 : i32, i32
  }
  func.func @transform_7(%arg0: i32) -> (i32, i32) {
    %c0_i32 = arith.constant 0 : i32
    %c0_i32_0 = arith.constant 0 : i32
    %c0_i32_1 = arith.constant 0 : i32
    return %c0_i32, %c0_i32_0 : i32, i32
  }
  func.func @transform_8(%arg0: i32) -> (i32, i32) {
    %c0_i32 = arith.constant 0 : i32
    %c0_i32_0 = arith.constant 0 : i32
    %c0_i32_1 = arith.constant 0 : i32
    return %c0_i32, %c0_i32_0 : i32, i32
  }
  func.func @transform_9(%arg0: i32) -> (i32, i32) {
    %c0_i32 = arith.constant 0 : i32
    %c0_i32_0 = arith.constant 0 : i32
    %c0_i32_1 = arith.constant 0 : i32
    return %c0_i32, %c0_i32_0 : i32, i32
  }
  func.func @transform_10(%arg0: i32) -> (i32, i32) {
    %c0_i32 = arith.constant 0 : i32
    %c0_i32_0 = arith.constant 0 : i32
    %c0_i32_1 = arith.constant 0 : i32
    return %c0_i32, %c0_i32_0 : i32, i32
  }
  func.func @transform_11(%arg0: i32) -> (i32, i32) {
    %c0_i32 = arith.constant 0 : i32
    %c0_i32_0 = arith.constant 0 : i32
    %c0_i32_1 = arith.constant 0 : i32
    return %c0_i32, %c0_i32_0 : i32, i32
  }
  func.func @transform_12(%arg0: i32) -> (i32, i32) {
    %c0_i32 = arith.constant 0 : i32
    %c0_i32_0 = arith.constant 0 : i32
    %c0_i32_1 = arith.constant 0 : i32
    return %c0_i32, %c0_i32_0 : i32, i32
  }
  func.func @transform_13(%arg0: i32) -> (i32, i32) {
    %c0_i32 = arith.constant 0 : i32
    %c0_i32_0 = arith.constant 0 : i32
    %c0_i32_1 = arith.constant 0 : i32
    return %c0_i32, %c0_i32_0 : i32, i32
  }
  func.func @transform_14(%arg0: i32) -> (i32, i32) {
    %c0_i32 = arith.constant 0 : i32
    %c0_i32_0 = arith.constant 0 : i32
    %c0_i32_1 = arith.constant 0 : i32
    return %c0_i32, %c0_i32_0 : i32, i32
  }
  func.func @transform_15(%arg0: i32) -> (i32, i32) {
    %c0_i32 = arith.constant 0 : i32
    %c0_i32_0 = arith.constant 0 : i32
    %c0_i32_1 = arith.constant 0 : i32
    return %c0_i32, %c0_i32_0 : i32, i32
  }
  func.func @transform_16(%arg0: i32) -> (i32, i32) {
    %c0_i32 = arith.constant 0 : i32
    %c0_i32_0 = arith.constant 0 : i32
    %c0_i32_1 = arith.constant 0 : i32
    return %c0_i32, %c0_i32_0 : i32, i32
  }
  func.func @transform_17(%arg0: i32) -> (i32, i32) {
    %c0_i32 = arith.constant 0 : i32
    %c0_i32_0 = arith.constant 0 : i32
    %c0_i32_1 = arith.constant 0 : i32
    return %c0_i32, %c0_i32_0 : i32, i32
  }
  func.func @transform_18(%arg0: i32) -> (i32, i32) {
    %c0_i32 = arith.constant 0 : i32
    %c0_i32_0 = arith.constant 0 : i32
    %c0_i32_1 = arith.constant 0 : i32
    return %c0_i32, %c0_i32_0 : i32, i32
  }
  func.func @transform_19(%arg0: i32) -> (i32, i32, i32) {
    %c0_i32 = arith.constant 0 : i32
    %c0_i32_0 = arith.constant 0 : i32
    %c0_i32_1 = arith.constant 0 : i32
    return %arg0, %c0_i32, %c0_i32_0 : i32, i32, i32
  }
}

</mosaic_0001>

<bundles_post_ra>
// kernel: tile.23
= control target key start
LH: loop header
LB: loop body
LE: loop exit
PB: predicated region body
PF: predicated region fallthrough
CT: control target
= control target key end

     0   :  { %vm91_vm0 = vcmask 1041409   ;;  %vm95_vm1 = vcmask 1042434   ;;  %vm99_vm2 = vcmask 1043459   ;;  %vm103_vm3 = vcmask 1044484   ;;  %s2573_s25 = smov 112   ;;  %s2574_s23 = smov 96   ;;  %s4753_s0 = inlined_call_operand.vmem [shape: f32[16,32,16], index: 0, kind: input, shape index: {}]   ;;  %s4754_s1 = inlined_call_operand.vmem [shape: f32[16,512], index: 1, kind: output, shape index: {}]  }
   0x1   :  { %vm107_vm4 = vcmask 1045509   ;;  %v2086_v0 = vld [vmem:[%s4753_s0 + $0xf] sm:$0x1]   ;;  %vm111_vm5 = vcmask 1046534   ;;  %vm115_vm6 = vcmask 1047559   ;;  %s2575_s8 = smov 80  }
   0x2   :  { %v2087_v1 = vld [vmem:[%s4753_s0 + $0x2e] sm:$0x2]   ;;  %v2069_v9 = vld [vmem:[%s4753_s0 + $0x7] sm:$0x1]   ;;  %v2131_v52 = vld [vmem:[%s4753_s0 + $0x11f] sm:$0x1]  }
   0x3   :  { %v2088_v2 = vld [vmem:[%s4753_s0 + $0x4d] sm:$0x4]   ;;  %v161_v4 = vsel %vm91_vm0, %v2087_v1, %v2086_v0  ;;  %v2070_v10 = vld [vmem:[%s4753_s0 + $0x26] sm:$0x2]   ;;  %v2132_v53 = vld [vmem:[%s4753_s0 + $0x13e] sm:$0x2]  }
   0x4   :  { %v2089_v3 = vld [vmem:[%s4753_s0 + $0x6c] sm:$0x8]   ;;  %v165_v7 = vsel %vm95_vm1, %v2088_v2, %v161_v4  ;;  %v92_v12 = vsel %vm91_vm0, %v2070_v10, %v2069_v9  ;;  %v2071_v13 = vld [vmem:[%s4753_s0 + $0x45] sm:$0x4]   ;;  %v336_v56 = vsel %vm91_vm0, %v2132_v53, %v2131_v52  ;;  %v2133_v57 = vld [vmem:[%s4753_s0 + $0x15d] sm:$0x4]  }
   0x5   :  { %v2090_v5 = vld [vmem:[%s4753_s0 + $0x8b] sm:$0x10]   ;;  %v169_v11 = vsel %vm99_vm2, %v2089_v3, %v165_v7  ;;  %v2072_v14 = vld [vmem:[%s4753_s0 + $0x64] sm:$0x8]   ;;  %v96_v18 = vsel %vm95_vm1, %v2071_v13, %v92_v12  ;;  %v2134_v58 = vld [vmem:[%s4753_s0 + $0x17c] sm:$0x8]   ;;  %v340_v62 = vsel %vm95_vm1, %v2133_v57, %v336_v56 }
   0x6   :  { %v2091_v6 = vld [vmem:[%s4753_s0 + $0xaa] sm:$0x20]   ;;  %v2073_v15 = vld [vmem:[%s4753_s0 + $0x83] sm:$0x10]   ;;  %v173_v16 = vsel %vm103_vm3, %v2090_v5, %v169_v11  ;;  %v100_v22 = vsel %vm99_vm2, %v2072_v14, %v96_v18  ;;  %v2135_v59 = vld [vmem:[%s4753_s0 + $0x19b] sm:$0x10]   ;;  %v344_v2 = vsel %vm99_vm2, %v2134_v58, %v340_v62 }
   0x7   :  { %v2092_v8 = vld [vmem:[%s4753_s0 + $0xc9] sm:$0x40]   ;;  %v2074_v19 = vld [vmem:[%s4753_s0 + $0xa2] sm:$0x20]   ;;  %v177_v21 = vsel %vm107_vm4, %v2091_v6, %v173_v16  ;;  %v104_v27 = vsel %vm103_vm3, %v2073_v15, %v100_v22  ;;  %v2136_v63 = vld [vmem:[%s4753_s0 + $0x1ba] sm:$0x20]   ;;  %v348_v7 = vsel %vm103_vm3, %v2135_v59, %v344_v2 }
   0x8   :  { %v2093_v17 = vld [vmem:[%s4753_s0 + $0xe8] sm:$0x80]   ;;  %v2075_v20 = vld [vmem:[%s4753_s0 + $0xc1] sm:$0x40]   ;;  %v181_v26 = vsel %vm111_vm5, %v2092_v8, %v177_v21  ;;  %v108_v33 = vsel %vm107_vm4, %v2074_v19, %v104_v27  ;;  %v2122_v3 = vld [vmem:[%s4753_s0 + $0x1f] sm:$0x1]   ;;  %v352_v12 = vsel %vm107_vm4, %v2136_v63, %v348_v7 }
   0x9   :  { %v2095_v23 = vld [vmem:[%s4753_s0 + $0x10f] sm:$0x1]   ;;  %v2076_v28 = vld [vmem:[%s4753_s0 + $0xe0] sm:$0x80]   ;;  %v185_v32 = vsel %vm115_vm6, %v2093_v17, %v181_v26  ;;  %v112_v38 = vsel %vm111_vm5, %v2075_v20, %v108_v33  ;;  %v2123_v4 = vld [vmem:[%s4753_s0 + $0x3e] sm:$0x2]  }
   0xa   :  { %v2096_v24 = vld [vmem:[%s4753_s0 + $0x12e] sm:$0x2]   ;;  %v2077_v37 = vld [vmem:[%s4753_s0 + $0x107] sm:$0x1]   ;;  %186 = vrot.lane.b32.xlu1 %v185_v32, %s2573_s25  ;;  %v116_v43 = vsel %vm115_vm6, %v2076_v28, %v112_v38  ;;  %v2124_v5 = vld [vmem:[%s4753_s0 + $0x5d] sm:$0x4]   ;;  %v301_v8 = vsel %vm91_vm0, %v2123_v4, %v2122_v3 }
   0xb   :  { %v2097_v25 = vld [vmem:[%s4753_s0 + $0x14d] sm:$0x4]   ;;  %v196_v29 = vsel %vm91_vm0, %v2096_v24, %v2095_v23  ;;  %v2078_v40 = vld [vmem:[%s4753_s0 + $0x126] sm:$0x2]   ;;  %117 = vrot.lane.b32.xlu0 %v116_v43, %s2573_s25  ;;  %v2125_v9 = vld [vmem:[%s4753_s0 + $0x7c] sm:$0x8]   ;;  %v305_v14 = vsel %vm95_vm1, %v2124_v5, %v301_v8 }
   0xc   :  { %v2098_v30 = vld [vmem:[%s4753_s0 + $0x16c] sm:$0x8]   ;;  %v200_v34 = vsel %vm95_vm1, %v2097_v25, %v196_v29  ;;  %v2079_v41 = vld [vmem:[%s4753_s0 + $0x145] sm:$0x4]   ;;  %v126_v46 = vsel %vm91_vm0, %v2078_v40, %v2077_v37  ;;  %v2126_v10 = vld [vmem:[%s4753_s0 + $0x9b] sm:$0x10]   ;;  %v309_v17 = vsel %vm99_vm2, %v2125_v9, %v305_v14 }
   0xd   :  { %v2099_v31 = vld [vmem:[%s4753_s0 + $0x18b] sm:$0x10]   ;;  %v204_v39 = vsel %vm99_vm2, %v2098_v30, %v200_v34  ;;  %v2080_v42 = vld [vmem:[%s4753_s0 + $0x164] sm:$0x8]   ;;  %v130_v50 = vsel %vm95_vm1, %v2079_v41, %v126_v46  ;;  %v2137_v13 = vld [vmem:[%s4753_s0 + $0x1d9] sm:$0x40]   ;;  %v313_v21 = vsel %vm103_vm3, %v2126_v10, %v309_v17 }
   0xe   :  { %v2100_v35 = vld [vmem:[%s4753_s0 + $0x1aa] sm:$0x20]   ;;  %v208_v44 = vsel %vm103_vm3, %v2099_v31, %v204_v39  ;;  %v2081_v47 = vld [vmem:[%s4753_s0 + $0x183] sm:$0x10]   ;;  %v134_v55 = vsel %vm99_vm2, %v2080_v42, %v130_v50  ;;  %v2127_v15 = vld [vmem:[%s4753_s0 + $0xba] sm:$0x20]   ;;  %v356_v25 = vsel %vm111_vm5, %v2137_v13, %v352_v12 }
   0xf   :  { %v2101_v36 = vld [vmem:[%s4753_s0 + $0x1c9] sm:$0x40]   ;;  %v2082_v48 = vld [vmem:[%s4753_s0 + $0x1a2] sm:$0x20]   ;;  %v212_v49 = vsel %vm107_vm4, %v2100_v35, %v208_v44  ;;  %v138_v60 = vsel %vm103_vm3, %v2081_v47, %v134_v55  ;;  %v2157_v16 = vld [vmem:[%s4753_s0 + $0xe] sm:$0x1]   ;;  %v317_v27 = vsel %vm107_vm4, %v2127_v15, %v313_v21 }
  0x10   :  { %v2102_v45 = vld [vmem:[%s4753_s0 + $0x1e8] sm:$0x80]   ;;  %v2083_v51 = vld [vmem:[%s4753_s0 + $0x1c1] sm:$0x40]   ;;  %v216_v54 = vsel %vm111_vm5, %v2101_v36, %v212_v49  ;;  %v142_v1 = vsel %vm107_vm4, %v2082_v48, %v138_v60  ;;  %v2158_v18 = vld [vmem:[%s4753_s0 + $0x2d] sm:$0x2]  }
  0x11   :  { %v2084_v61 = vld [vmem:[%s4753_s0 + $0x1e0] sm:$0x80]   ;;  %v220_v0 = vsel %vm115_vm6, %v2102_v45, %v216_v54  ;;  %v146_v6 = vsel %vm111_vm5, %v2083_v51, %v142_v1  ;;  %v2159_v19 = vld [vmem:[%s4753_s0 + $0x4c] sm:$0x4]   ;;  %v2128_v22 = vld [vmem:[%s4753_s0 + $0xd9] sm:$0x40]   ;;  %v440_v23 = vsel %vm91_vm0, %v2158_v18, %v2157_v16 }
  0x12   :  { %v150_v11 = vsel %vm115_vm6, %v2084_v61, %v146_v6  ;;  %221 = vrot.lane.b32.xlu1 %v220_v0, %s2573_s25  ;;  %v2160_v20 = vld [vmem:[%s4753_s0 + $0x6b] sm:$0x8]   ;;  %v2138_v26 = vld [vmem:[%s4753_s0 + $0x1f8] sm:$0x80]   ;;  %v444_v28 = vsel %vm95_vm1, %v2159_v19, %v440_v23  ;;  %v2148_v29 = vld [vmem:[%s4753_s0 + $0x106] sm:$0x1]   ;;  %v321_v36 = vsel %vm111_vm5, %v2128_v22, %v317_v27 }
  0x13   :  { %v2161_v24 = vld [vmem:[%s4753_s0 + $0x8a] sm:$0x10]   ;;  %151 = vrot.lane.b32.xlu0 %v150_v11, %s2573_s25  ;;  %v2149_v30 = vld [vmem:[%s4753_s0 + $0x125] sm:$0x2]   ;;  %v448_v31 = vsel %vm99_vm2, %v2160_v20, %v444_v28  ;;  %v2129_v37 = vld [vmem:[%s4753_s0 + $0xf8] sm:$0x80]   ;;  %v360_v41 = vsel %vm115_vm6, %v2138_v26, %v356_v25 }
  0x14   :  { %v405_v32 = vsel %vm91_vm0, %v2149_v30, %v2148_v29  ;;  %v2150_v33 = vld [vmem:[%s4753_s0 + $0x144] sm:$0x4]   ;;  %v452_v38 = vsel %vm103_vm3, %v2161_v24, %v448_v31  ;;  %v2162_v39 = vld [vmem:[%s4753_s0 + $0xa9] sm:$0x20]   ;;  %v2104_v44 = vld [vmem:[%s4753_s0 + $0x17] sm:$0x1]   ;;  %v325_v52 = vsel %vm115_vm6, %v2129_v37, %v321_v36 }
  0x15   :  { %v2151_v34 = vld [vmem:[%s4753_s0 + $0x163] sm:$0x8]   ;;  %v409_v40 = vsel %vm95_vm1, %v2150_v33, %v405_v32  ;;  %v2163_v42 = vld [vmem:[%s4753_s0 + $0xc8] sm:$0x40]   ;;  %v2105_v45 = vld [vmem:[%s4753_s0 + $0x36] sm:$0x2]   ;;  %v456_v53 = vsel %vm107_vm4, %v2162_v39, %v452_v38 }
  0x16   :  { %v2152_v35 = vld [vmem:[%s4753_s0 + $0x182] sm:$0x10]   ;;  %v413_v43 = vsel %vm99_vm2, %v2151_v34, %v409_v40  ;;  %v2106_v46 = vld [vmem:[%s4753_s0 + $0x55] sm:$0x4]   ;;  %v231_v49 = vsel %vm91_vm0, %v2105_v45, %v2104_v44  ;;  %v2184_v57 = vld [vmem:[%s4753_s0 + $0x116] sm:$0x1]   ;;  %v460_v4 = vsel %vm111_vm5, %v2163_v42, %v456_v53 }
  0x17   :  { %v417_v47 = vsel %vm103_vm3, %v2152_v35, %v413_v43  ;;  %v2153_v48 = vld [vmem:[%s4753_s0 + $0x1a1] sm:$0x20]   ;;  %v2107_v50 = vld [vmem:[%s4753_s0 + $0x74] sm:$0x8]   ;;  %v235_v54 = vsel %vm95_vm1, %v2106_v46, %v231_v49  ;;  %v2185_v59 = vld [vmem:[%s4753_s0 + $0x135] sm:$0x2]  }
  0x18   :  { %v2108_v51 = vld [vmem:[%s4753_s0 + $0x93] sm:$0x10]   ;;  %v239_v58 = vsel %vm99_vm2, %v2107_v50, %v235_v54  ;;  %v2186_v60 = vld [vmem:[%s4753_s0 + $0x154] sm:$0x4]   ;;  %v421_v62 = vsel %vm107_vm4, %v2153_v48, %v417_v47  ;;  %v2154_v63 = vld [vmem:[%s4753_s0 + $0x1c0] sm:$0x40]   ;;  %v545_v2 = vsel %vm91_vm0, %v2185_v59, %v2184_v57 }
  0x19   :  { %v2109_v55 = vld [vmem:[%s4753_s0 + $0xb2] sm:$0x20]   ;;  %v2187_v61 = vld [vmem:[%s4753_s0 + $0x173] sm:$0x8]   ;;  %v243_v0 = vsel %vm103_vm3, %v2108_v51, %v239_v58  ;;  %v2164_v5 = vld [vmem:[%s4753_s0 + $0xe7] sm:$0x80]   ;;  %v549_v7 = vsel %vm95_vm1, %v2186_v60, %v545_v2  ;;  %v425_v16 = vsel %vm111_vm5, %v2154_v63, %v421_v62 }
  0x1a   :  { %v2110_v56 = vld [vmem:[%s4753_s0 + $0xd1] sm:$0x40]   ;;  %361 = vrot.lane.b32.xlu1 %v360_v41, %s2573_s25  ;;  %v2188_v3 = vld [vmem:[%s4753_s0 + $0x192] sm:$0x10]   ;;  %v247_v6 = vsel %vm107_vm4, %v2109_v55, %v243_v0  ;;  %v553_v11 = vsel %vm99_vm2, %v2187_v61, %v549_v7  ;;  %v2155_v17 = vld [vmem:[%s4753_s0 + $0x1df] sm:$0x80]   ;;  %v464_v22 = vsel %vm115_vm6, %v2164_v5, %v460_v4 }
  0x1b   :  { %v2111_v1 = vld [vmem:[%s4753_s0 + $0xf0] sm:$0x80]   ;;  %326 = vrot.lane.b32.xlu0 %v325_v52, %s2573_s25  ;;  %v2175_v8 = vld [vmem:[%s4753_s0 + $0x16] sm:$0x1]   ;;  %v251_v10 = vsel %vm111_vm5, %v2110_v56, %v247_v6  ;;  %v557_v19 = vsel %vm103_vm3, %v2188_v3, %v553_v11  ;;  %v429_v33 = vsel %vm115_vm6, %v2155_v17, %v425_v16  ;;  %v2211_v38 = vld [vmem:[%s4753_s0 + $0x5] sm:$0x1]  }
  0x1c   :  { %v2176_v9 = vld [vmem:[%s4753_s0 + $0x35] sm:$0x2]   ;;  %v255_v18 = vsel %vm115_vm6, %v2111_v1, %v251_v10  ;;  %v2113_v25 = vld [vmem:[%s4753_s0 + $0x117] sm:$0x1]   ;;  %v2212_v40 = vld [vmem:[%s4753_s0 + $0x24] sm:$0x2]  }
  0x1d   :  { %v510_v12 = vsel %vm91_vm0, %v2176_v9, %v2175_v8  ;;  %v2177_v13 = vld [vmem:[%s4753_s0 + $0x54] sm:$0x4]   ;;  %256 = vrot.lane.b32.xlu2 %v255_v18, %s2573_s25  ;;  %v2114_v26 = vld [vmem:[%s4753_s0 + $0x136] sm:$0x2]   ;;  %v2213_v41 = vld [vmem:[%s4753_s0 + $0x43] sm:$0x4]   ;;  %v650_v47 = vsel %vm91_vm0, %v2212_v40, %v2211_v38 }
  0x1e   :  { %v2178_v14 = vld [vmem:[%s4753_s0 + $0x73] sm:$0x8]   ;;  %v514_v21 = vsel %vm95_vm1, %v2177_v13, %v510_v12  ;;  %v2115_v27 = vld [vmem:[%s4753_s0 + $0x155] sm:$0x4]   ;;  %v266_v30 = vsel %vm91_vm0, %v2114_v26, %v2113_v25  ;;  %v2214_v42 = vld [vmem:[%s4753_s0 + $0x62] sm:$0x8]   ;;  %v654_v52 = vsel %vm95_vm1, %v2213_v41, %v650_v47 }
  0x1f   :  { %v2179_v15 = vld [vmem:[%s4753_s0 + $0x92] sm:$0x10]   ;;  %v518_v24 = vsel %vm99_vm2, %v2178_v14, %v514_v21  ;;  %v2116_v31 = vld [vmem:[%s4753_s0 + $0x174] sm:$0x8]   ;;  %v270_v35 = vsel %vm95_vm1, %v2115_v27, %v266_v30  ;;  %v2215_v48 = vld [vmem:[%s4753_s0 + $0x81] sm:$0x10]   ;;  %v658_v56 = vsel %vm99_vm2, %v2214_v42, %v654_v52 }
  0x20   :  { %v2189_v20 = vld [vmem:[%s4753_s0 + $0x1b1] sm:$0x20]   ;;  %v522_v28 = vsel %vm103_vm3, %v2179_v15, %v518_v24  ;;  %v2117_v32 = vld [vmem:[%s4753_s0 + $0x193] sm:$0x10]   ;;  %v274_v39 = vsel %vm99_vm2, %v2116_v31, %v270_v35  ;;  %v2202_v53 = vld [vmem:[%s4753_s0 + $0x11e] sm:$0x1]   ;;  %v662_v0 = vsel %vm103_vm3, %v2215_v48, %v658_v56 }
  0x21   :  { %v2190_v23 = vld [vmem:[%s4753_s0 + $0x1d0] sm:$0x40]   ;;  %v561_v34 = vsel %vm107_vm4, %v2189_v20, %v557_v19  ;;  %v2118_v36 = vld [vmem:[%s4753_s0 + $0x1b2] sm:$0x20]   ;;  %v278_v45 = vsel %vm103_vm3, %v2117_v32, %v274_v39  ;;  %v2203_v54 = vld [vmem:[%s4753_s0 + $0x13d] sm:$0x2]  }
  0x22   :  { %v2180_v29 = vld [vmem:[%s4753_s0 + $0xb1] sm:$0x20]   ;;  %v2119_v37 = vld [vmem:[%s4753_s0 + $0x1d1] sm:$0x40]   ;;  %465 = vrot.lane.b32.xlu1 %v464_v22, %s2574_s23  ;;  %v565_v49 = vsel %vm111_vm5, %v2190_v23, %v561_v34  ;;  %v282_v51 = vsel %vm107_vm4, %v2118_v36, %v278_v45  ;;  %v615_v57 = vsel %vm91_vm0, %v2203_v54, %v2202_v53  ;;  %v2204_v58 = vld [vmem:[%s4753_s0 + $0x15c] sm:$0x4]  }
  0x23   :  { %v526_v43 = vsel %vm107_vm4, %v2180_v29, %v522_v28  ;;  %v2181_v44 = vld [vmem:[%s4753_s0 + $0xd0] sm:$0x40]   ;;  %v2120_v46 = vld [vmem:[%s4753_s0 + $0x1f0] sm:$0x80]   ;;  %430 = vrot.lane.b32.xlu0 %v429_v33, %s2574_s23  ;;  %v286_v55 = vsel %vm111_vm5, %v2119_v37, %v282_v51  ;;  %v2205_v59 = vld [vmem:[%s4753_s0 + $0x17b] sm:$0x8]   ;;  %v619_v2 = vsel %vm95_vm1, %v2204_v58, %v615_v57 }
  0x24   :  { %v2191_v50 = vld [vmem:[%s4753_s0 + $0x1ef] sm:$0x80]   ;;  %v2206_v60 = vld [vmem:[%s4753_s0 + $0x19a] sm:$0x10]   ;;  %v530_v61 = vsel %vm111_vm5, %v2181_v44, %v526_v43  ;;  %v290_v63 = vsel %vm115_vm6, %v2120_v46, %v286_v55  ;;  %v2216_v1 = vld [vmem:[%s4753_s0 + $0xa0] sm:$0x20]   ;;  %v623_v5 = vsel %vm99_vm2, %v2205_v59, %v619_v2 }
  0x25   :  { %v2182_v62 = vld [vmem:[%s4753_s0 + $0xef] sm:$0x80]   ;;  %v569_v3 = vsel %vm115_vm6, %v2191_v50, %v565_v49  ;;  %291 = vrot.lane.b32.xlu2 %v290_v63, %s2573_s25  ;;  %v2217_v4 = vld [vmem:[%s4753_s0 + $0xbf] sm:$0x40]   ;;  %v2140_v6 = vld [vmem:[%s4753_s0 + $0x6] sm:$0x1]   ;;  %v627_v9 = vsel %vm103_vm3, %v2206_v60, %v623_v5  ;;  %v666_v15 = vsel %vm107_vm4, %v2216_v1, %v662_v0 }
  0x26   :  { %v2141_v7 = vld [vmem:[%s4753_s0 + $0x25] sm:$0x2]   ;;  %v2207_v10 = vld [vmem:[%s4753_s0 + $0x1b9] sm:$0x20]   ;;  %v534_v14 = vsel %vm115_vm6, %v2182_v62, %v530_v61  ;;  %v2237_v19 = vld [vmem:[%s4753_s0 + $0x10d] sm:$0x1]   ;;  %v670_v30 = vsel %vm111_vm5, %v2217_v4, %v666_v15 }
  0x27   :  { %v2142_v8 = vld [vmem:[%s4753_s0 + $0x44] sm:$0x4]   ;;  %v371_v11 = vsel %vm91_vm0, %v2141_v7, %v2140_v6  ;;  %v2238_v21 = vld [vmem:[%s4753_s0 + $0x12c] sm:$0x2]   ;;  %v631_v24 = vsel %vm107_vm4, %v2207_v10, %v627_v9  ;;  %v2208_v25 = vld [vmem:[%s4753_s0 + $0x1d8] sm:$0x40]  }
  0x28   :  { %v2143_v12 = vld [vmem:[%s4753_s0 + $0x63] sm:$0x8]   ;;  %v375_v16 = vsel %vm95_vm1, %v2142_v8, %v371_v11  ;;  %v2239_v22 = vld [vmem:[%s4753_s0 + $0x14b] sm:$0x4]   ;;  %v754_v28 = vsel %vm91_vm0, %v2238_v21, %v2237_v19  ;;  %v2218_v31 = vld [vmem:[%s4753_s0 + $0xde] sm:$0x80]   ;;  %v635_v42 = vsel %vm111_vm5, %v2208_v25, %v631_v24 }
  0x29   :  { %v2144_v13 = vld [vmem:[%s4753_s0 + $0x82] sm:$0x10]   ;;  %v379_v20 = vsel %vm99_vm2, %v2143_v12, %v375_v16  ;;  %v2240_v23 = vld [vmem:[%s4753_s0 + $0x16a] sm:$0x8]   ;;  %v758_v33 = vsel %vm95_vm1, %v2239_v22, %v754_v28  ;;  %v2209_v43 = vld [vmem:[%s4753_s0 + $0x1f7] sm:$0x80]   ;;  %v674_v48 = vsel %vm115_vm6, %v2218_v31, %v670_v30 }
  0x2a   :  { %v2145_v17 = vld [vmem:[%s4753_s0 + $0xa1] sm:$0x20]   ;;  %570 = vrot.lane.b32.xlu1 %v569_v3, %s2574_s23  ;;  %v383_v26 = vsel %vm103_vm3, %v2144_v13, %v379_v20  ;;  %v2241_v29 = vld [vmem:[%s4753_s0 + $0x189] sm:$0x10]   ;;  %v762_v37 = vsel %vm99_vm2, %v2240_v23, %v758_v33  ;;  %v2166_v51 = vld [vmem:[%s4753_s0 + $0x10e] sm:$0x1]   ;;  %v639_v59 = vsel %vm115_vm6, %v2209_v43, %v635_v42 }
  0x2b   :  { %v2146_v18 = vld [vmem:[%s4753_s0 + $0xc0] sm:$0x40]   ;;  %535 = vrot.lane.b32.xlu0 %v534_v14, %s2574_s23  ;;  %v387_v32 = vsel %vm107_vm4, %v2145_v17, %v383_v26  ;;  %v2228_v34 = vld [vmem:[%s4753_s0 + $0xd] sm:$0x1]   ;;  %v766_v45 = vsel %vm103_vm3, %v2241_v29, %v762_v37  ;;  %v2167_v52 = vld [vmem:[%s4753_s0 + $0x12d] sm:$0x2]  }
  0x2c   :  { %v2147_v27 = vld [vmem:[%s4753_s0 + $0xdf] sm:$0x80]   ;;  %v2229_v35 = vld [vmem:[%s4753_s0 + $0x2c] sm:$0x2]   ;;  %v391_v36 = vsel %vm111_vm5, %v2146_v18, %v387_v32  ;;  %v2168_v53 = vld [vmem:[%s4753_s0 + $0x14c] sm:$0x4]   ;;  %v475_v56 = vsel %vm91_vm0, %v2167_v52, %v2166_v51 }
  0x2d   :  { %v719_v38 = vsel %vm91_vm0, %v2229_v35, %v2228_v34  ;;  %v2230_v39 = vld [vmem:[%s4753_s0 + $0x4b] sm:$0x4]   ;;  %v395_v44 = vsel %vm115_vm6, %v2147_v27, %v391_v36  ;;  %v2169_v57 = vld [vmem:[%s4753_s0 + $0x16b] sm:$0x8]   ;;  %v479_v61 = vsel %vm95_vm1, %v2168_v53, %v475_v56  ;;  %v2264_v0 = vld [vmem:[%s4753_s0 + $0x1d] sm:$0x1]  }
  0x2e   :  { %v2231_v40 = vld [vmem:[%s4753_s0 + $0x6a] sm:$0x8]   ;;  %v723_v47 = vsel %vm95_vm1, %v2230_v39, %v719_v38  ;;  %396 = vrot.lane.b32.xlu2 %v395_v44, %s2574_s23  ;;  %v2170_v58 = vld [vmem:[%s4753_s0 + $0x18a] sm:$0x10]   ;;  %v483_v1 = vsel %vm99_vm2, %v2169_v57, %v479_v61  ;;  %v2265_v2 = vld [vmem:[%s4753_s0 + $0x3c] sm:$0x2]  }
  0x2f   :  { %v2232_v41 = vld [vmem:[%s4753_s0 + $0x89] sm:$0x10]   ;;  %v727_v50 = vsel %vm99_vm2, %v2231_v40, %v723_v47  ;;  %v2171_v62 = vld [vmem:[%s4753_s0 + $0x1a9] sm:$0x20]   ;;  %v2266_v3 = vld [vmem:[%s4753_s0 + $0x5b] sm:$0x4]   ;;  %v487_v7 = vsel %vm103_vm3, %v2170_v58, %v483_v1  ;;  %v859_v9 = vsel %vm91_vm0, %v2265_v2, %v2264_v0 }
  0x30   :  { %v2242_v46 = vld [vmem:[%s4753_s0 + $0x1a8] sm:$0x20]   ;;  %v731_v54 = vsel %vm103_vm3, %v2232_v41, %v727_v50  ;;  %v2172_v63 = vld [vmem:[%s4753_s0 + $0x1c8] sm:$0x40]   ;;  %v2267_v4 = vld [vmem:[%s4753_s0 + $0x7a] sm:$0x8]   ;;  %v491_v13 = vsel %vm107_vm4, %v2171_v62, %v487_v7  ;;  %v863_v14 = vsel %vm95_vm1, %v2266_v3, %v859_v9 }
  0x31   :  { %v2243_v49 = vld [vmem:[%s4753_s0 + $0x1c7] sm:$0x40]   ;;  %v770_v60 = vsel %vm107_vm4, %v2242_v46, %v766_v45  ;;  %v2173_v8 = vld [vmem:[%s4753_s0 + $0x1e7] sm:$0x80]   ;;  %v2268_v10 = vld [vmem:[%s4753_s0 + $0x99] sm:$0x10]   ;;  %v495_v17 = vsel %vm111_vm5, %v2172_v63, %v491_v13  ;;  %v867_v18 = vsel %vm99_vm2, %v2267_v4, %v863_v14 }
  0x32   :  { %v2233_v55 = vld [vmem:[%s4753_s0 + $0xa8] sm:$0x20]   ;;  %675 = vrot.lane.b32.xlu1 %v674_v48, %s2575_s8  ;;  %v774_v11 = vsel %vm111_vm5, %v2243_v49, %v770_v60  ;;  %v2255_v15 = vld [vmem:[%s4753_s0 + $0x115] sm:$0x1]   ;;  %v499_v25 = vsel %vm115_vm6, %v2173_v8, %v495_v17  ;;  %v871_v26 = vsel %vm103_vm3, %v2268_v10, %v867_v18  ;;  %v2269_v27 = vld [vmem:[%s4753_s0 + $0xb8] sm:$0x20]  }
  0x33   :  { %v735_v5 = vsel %vm107_vm4, %v2233_v55, %v731_v54  ;;  %v2234_v6 = vld [vmem:[%s4753_s0 + $0xc7] sm:$0x40]   ;;  %640 = vrot.lane.b32.xlu0 %v639_v59, %s2574_s23  ;;  %v2256_v16 = vld [vmem:[%s4753_s0 + $0x134] sm:$0x2]   ;;  %v2270_v30 = vld [vmem:[%s4753_s0 + $0xd7] sm:$0x40]   ;;  %v875_v41 = vsel %vm107_vm4, %v2269_v27, %v871_v26 }
  0x34   :  { %v2244_v12 = vld [vmem:[%s4753_s0 + $0x1e6] sm:$0x80]   ;;  %v824_v19 = vsel %vm91_vm0, %v2256_v16, %v2255_v15  ;;  %v2257_v20 = vld [vmem:[%s4753_s0 + $0x153] sm:$0x4]   ;;  %v739_v23 = vsel %vm111_vm5, %v2234_v6, %v735_v5  ;;  %v2193_v32 = vld [vmem:[%s4753_s0 + $0x1e] sm:$0x1]   ;;  %v879_v56 = vsel %vm111_vm5, %v2270_v30, %v875_v41 }
  0x35   :  { %v2258_v21 = vld [vmem:[%s4753_s0 + $0x172] sm:$0x8]   ;;  %v2235_v24 = vld [vmem:[%s4753_s0 + $0xe6] sm:$0x80]   ;;  %v828_v28 = vsel %vm95_vm1, %v2257_v20, %v824_v19  ;;  %v778_v29 = vsel %vm115_vm6, %v2244_v12, %v774_v11  ;;  %v2194_v33 = vld [vmem:[%s4753_s0 + $0x3d] sm:$0x2]  }
  0x36   :  { %v2259_v22 = vld [vmem:[%s4753_s0 + $0x191] sm:$0x10]   ;;  %500 = vrot.lane.b32.xlu2 %v499_v25, %s2574_s23  ;;  %v832_v31 = vsel %vm99_vm2, %v2258_v21, %v828_v28  ;;  %v2195_v34 = vld [vmem:[%s4753_s0 + $0x5c] sm:$0x4]   ;;  %v580_v37 = vsel %vm91_vm0, %v2194_v33, %v2193_v32  ;;  %v743_v40 = vsel %vm115_vm6, %v2235_v24, %v739_v23  ;;  %v2290_v47 = vld [vmem:[%s4753_s0 + $0x104] sm:$0x1]  }
  0x37   :  { %v836_v35 = vsel %vm103_vm3, %v2259_v22, %v832_v31  ;;  %v2260_v36 = vld [vmem:[%s4753_s0 + $0x1b0] sm:$0x20]   ;;  %v2196_v38 = vld [vmem:[%s4753_s0 + $0x7b] sm:$0x8]   ;;  %v584_v43 = vsel %vm95_vm1, %v2195_v34, %v580_v37  ;;  %v2291_v48 = vld [vmem:[%s4753_s0 + $0x123] sm:$0x2]  }
  0x38   :  { %v2197_v39 = vld [vmem:[%s4753_s0 + $0x9a] sm:$0x10]   ;;  %v2261_v42 = vld [vmem:[%s4753_s0 + $0x1cf] sm:$0x40]   ;;  %v588_v46 = vsel %vm99_vm2, %v2196_v38, %v584_v43  ;;  %v2292_v49 = vld [vmem:[%s4753_s0 + $0x142] sm:$0x4]   ;;  %v840_v50 = vsel %vm107_vm4, %v2260_v36, %v836_v35  ;;  %v963_v53 = vsel %vm91_vm0, %v2291_v48, %v2290_v47 }
  0x39   :  { %v2198_v44 = vld [vmem:[%s4753_s0 + $0xb9] sm:$0x20]   ;;  %v592_v51 = vsel %vm103_vm3, %v2197_v39, %v588_v46  ;;  %v2293_v54 = vld [vmem:[%s4753_s0 + $0x161] sm:$0x8]   ;;  %v2271_v57 = vld [vmem:[%s4753_s0 + $0xf6] sm:$0x80]   ;;  %v967_v59 = vsel %vm95_vm1, %v2292_v49, %v963_v53  ;;  %v844_v2 = vsel %vm111_vm5, %v2261_v42, %v840_v50 }
  0x3a   :  { %v2199_v45 = vld [vmem:[%s4753_s0 + $0xd8] sm:$0x40]   ;;  %779 = vrot.lane.b32.xlu1 %v778_v29, %s2575_s8  ;;  %v2294_v55 = vld [vmem:[%s4753_s0 + $0x180] sm:$0x10]   ;;  %v596_v58 = vsel %vm107_vm4, %v2198_v44, %v592_v51  ;;  %v971_v62 = vsel %vm99_vm2, %v2293_v54, %v967_v59  ;;  %v2262_v3 = vld [vmem:[%s4753_s0 + $0x1ee] sm:$0x80]   ;;  %v883_v9 = vsel %vm115_vm6, %v2271_v57, %v879_v56 }
  0x3b   :  { %v2200_v52 = vld [vmem:[%s4753_s0 + $0xf7] sm:$0x80]   ;;  %744 = vrot.lane.b32.xlu0 %v743_v40, %s2575_s8  ;;  %v2282_v60 = vld [vmem:[%s4753_s0 + $0x4] sm:$0x1]   ;;  %v600_v61 = vsel %vm111_vm5, %v2199_v45, %v596_v58  ;;  %v975_v5 = vsel %vm103_vm3, %v2294_v55, %v971_v62  ;;  %v2219_v13 = vld [vmem:[%s4753_s0 + $0x105] sm:$0x1]   ;;  %v848_v20 = vsel %vm115_vm6, %v2262_v3, %v844_v2 }
  0x3c   :  { %v2283_v63 = vld [vmem:[%s4753_s0 + $0x23] sm:$0x2]   ;;  %v604_v4 = vsel %vm115_vm6, %v2200_v52, %v600_v61  ;;  %v2220_v14 = vld [vmem:[%s4753_s0 + $0x124] sm:$0x2]   ;;  %v2317_v28 = vld [vmem:[%s4753_s0 + $0x14] sm:$0x1]  }
  0x3d   :  { %v2284_v0 = vld [vmem:[%s4753_s0 + $0x42] sm:$0x4]   ;;  %v929_v7 = vsel %vm91_vm0, %v2283_v63, %v2282_v60  ;;  %v684_v16 = vsel %vm91_vm0, %v2220_v14, %v2219_v13  ;;  %v2221_v17 = vld [vmem:[%s4753_s0 + $0x143] sm:$0x4]   ;;  %v2318_v29 = vld [vmem:[%s4753_s0 + $0x33] sm:$0x2]  }
  0x3e   :  { %v2285_v1 = vld [vmem:[%s4753_s0 + $0x61] sm:$0x8]   ;;  %605 = vrot.lane.b32.xlu2 %v604_v4, %s2574_s23  ;;  %v933_v11 = vsel %vm95_vm1, %v2284_v0, %v929_v7  ;;  %v2222_v18 = vld [vmem:[%s4753_s0 + $0x162] sm:$0x8]   ;;  %v688_v24 = vsel %vm95_vm1, %v2221_v17, %v684_v16  ;;  %v2319_v30 = vld [vmem:[%s4753_s0 + $0x52] sm:$0x4]   ;;  %v1068_v34 = vsel %vm91_vm0, %v2318_v29, %v2317_v28 }
  0x3f   :  { %v2295_v6 = vld [vmem:[%s4753_s0 + $0x19f] sm:$0x20]   ;;  %v937_v15 = vsel %vm99_vm2, %v2285_v1, %v933_v11  ;;  %v2223_v19 = vld [vmem:[%s4753_s0 + $0x181] sm:$0x10]   ;;  %v692_v27 = vsel %vm99_vm2, %v2222_v18, %v688_v24  ;;  %v2320_v35 = vld [vmem:[%s4753_s0 + $0x71] sm:$0x8]   ;;  %v1072_v40 = vsel %vm95_vm1, %v2319_v30, %v1068_v34 }
  0x40   :  { %v2286_v8 = vld [vmem:[%s4753_s0 + $0x80] sm:$0x10]   ;;  %v979_v21 = vsel %vm107_vm4, %v2295_v6, %v975_v5  ;;  %v2224_v25 = vld [vmem:[%s4753_s0 + $0x1a0] sm:$0x20]   ;;  %v696_v32 = vsel %vm103_vm3, %v2223_v19, %v692_v27  ;;  %v2321_v36 = vld [vmem:[%s4753_s0 + $0x90] sm:$0x10]   ;;  %v1076_v43 = vsel %vm99_vm2, %v2320_v35, %v1072_v40 }
  0x41   :  { %v2296_v10 = vld [vmem:[%s4753_s0 + $0x1be] sm:$0x40]   ;;  %v941_v22 = vsel %vm103_vm3, %v2286_v8, %v937_v15  ;;  %v2225_v26 = vld [vmem:[%s4753_s0 + $0x1bf] sm:$0x40]   ;;  %v700_v39 = vsel %vm107_vm4, %v2224_v25, %v696_v32  ;;  %v2308_v41 = vld [vmem:[%s4753_s0 + $0x10c] sm:$0x1]   ;;  %v1080_v50 = vsel %vm103_vm3, %v2321_v36, %v1076_v43 }
  0x42   :  { %v2287_v12 = vld [vmem:[%s4753_s0 + $0x9f] sm:$0x20]   ;;  %884 = vrot.lane.b32.xlu1 %v883_v9, %s2575_s8  ;;  %v2226_v33 = vld [vmem:[%s4753_s0 + $0x1de] sm:$0x80]   ;;  %v983_v37 = vsel %vm111_vm5, %v2296_v10, %v979_v21  ;;  %v704_v42 = vsel %vm111_vm5, %v2225_v26, %v700_v39  ;;  %v2309_v44 = vld [vmem:[%s4753_s0 + $0x12b] sm:$0x2]  }
  0x43   :  { %v2288_v23 = vld [vmem:[%s4753_s0 + $0xbe] sm:$0x40]   ;;  %v945_v31 = vsel %vm107_vm4, %v2287_v12, %v941_v22  ;;  %849 = vrot.lane.b32.xlu0 %v848_v20, %s2575_s8  ;;  %v2310_v45 = vld [vmem:[%s4753_s0 + $0x14a] sm:$0x4]   ;;  %v708_v49 = vsel %vm115_vm6, %v2226_v33, %v704_v42  ;;  %v2322_v51 = vld [vmem:[%s4753_s0 + $0xaf] sm:$0x20]   ;;  %v1033_v52 = vsel %vm91_vm0, %v2309_v44, %v2308_v41 }
  0x44   :  { %v2297_v38 = vld [vmem:[%s4753_s0 + $0x1dd] sm:$0x80]   ;;  %v2311_v46 = vld [vmem:[%s4753_s0 + $0x169] sm:$0x8]   ;;  %v949_v47 = vsel %vm111_vm5, %v2288_v23, %v945_v31  ;;  %v2323_v55 = vld [vmem:[%s4753_s0 + $0xce] sm:$0x40]   ;;  %v1037_v56 = vsel %vm95_vm1, %v2310_v45, %v1033_v52  ;;  %v1084_v2 = vsel %vm107_vm4, %v2322_v51, %v1080_v50 }
  0x45   :  { %v2289_v48 = vld [vmem:[%s4753_s0 + $0xdd] sm:$0x80]   ;;  %v2312_v53 = vld [vmem:[%s4753_s0 + $0x188] sm:$0x10]   ;;  %v987_v54 = vsel %vm115_vm6, %v2297_v38, %v983_v37  ;;  %v2246_v58 = vld [vmem:[%s4753_s0 + $0x15] sm:$0x1]   ;;  %v1041_v60 = vsel %vm99_vm2, %v2311_v46, %v1037_v56  ;;  %v1088_v18 = vsel %vm111_vm5, %v2323_v55, %v1084_v2 }
  0x46   :  { %709 = vrot.lane.b32.xlu2 %v708_v49, %s2575_s8  ;;  %v2313_v57 = vld [vmem:[%s4753_s0 + $0x1a7] sm:$0x20]   ;;  %v2247_v59 = vld [vmem:[%s4753_s0 + $0x34] sm:$0x2]   ;;  %v953_v1 = vsel %vm115_vm6, %v2289_v48, %v949_v47  ;;  %v1045_v3 = vsel %vm103_vm3, %v2312_v53, %v1041_v60  ;;  %s2576_s15 = smov 64   ;;  %s2577_s22 = smov 48  }
  0x47   :  { %v789_v61 = vsel %vm91_vm0, %v2247_v59, %v2246_v58  ;;  %v2248_v62 = vld [vmem:[%s4753_s0 + $0x53] sm:$0x4]   ;;  %v2314_v4 = vld [vmem:[%s4753_s0 + $0x1c6] sm:$0x40]   ;;  %v2344_v9 = vld [vmem:[%s4753_s0 + $0x11c] sm:$0x1]   ;;  %v1049_v12 = vsel %vm107_vm4, %v2313_v57, %v1045_v3 }
  0x48   :  { %v2249_v63 = vld [vmem:[%s4753_s0 + $0x72] sm:$0x8]   ;;  %v793_v5 = vsel %vm95_vm1, %v2248_v62, %v789_v61  ;;  %v2345_v10 = vld [vmem:[%s4753_s0 + $0x13b] sm:$0x2]   ;;  %v2324_v19 = vld [vmem:[%s4753_s0 + $0xed] sm:$0x80]   ;;  %v1053_v28 = vsel %vm111_vm5, %v2314_v4, %v1049_v12 }
  0x49   :  { %v2250_v0 = vld [vmem:[%s4753_s0 + $0x91] sm:$0x10]   ;;  %v797_v8 = vsel %vm99_vm2, %v2249_v63, %v793_v5  ;;  %v2346_v11 = vld [vmem:[%s4753_s0 + $0x15a] sm:$0x4]   ;;  %v1173_v15 = vsel %vm91_vm0, %v2345_v10, %v2344_v9  ;;  %v2315_v29 = vld [vmem:[%s4753_s0 + $0x1e5] sm:$0x80]   ;;  %v1092_v35 = vsel %vm115_vm6, %v2324_v19, %v1088_v18 }
  0x4a   :  { %v2251_v6 = vld [vmem:[%s4753_s0 + $0xb0] sm:$0x20]   ;;  %988 = vrot.lane.b32.xlu1 %v987_v54, %s2576_s15  ;;  %v801_v13 = vsel %vm103_vm3, %v2250_v0, %v797_v8  ;;  %v2347_v16 = vld [vmem:[%s4753_s0 + $0x179] sm:$0x8]   ;;  %v1177_v21 = vsel %vm95_vm1, %v2346_v11, %v1173_v15  ;;  %v2273_v39 = vld [vmem:[%s4753_s0 + $0x11d] sm:$0x1]   ;;  %v1057_v46 = vsel %vm115_vm6, %v2315_v29, %v1053_v28 }
  0x4b   :  { %v2252_v7 = vld [vmem:[%s4753_s0 + $0xcf] sm:$0x40]   ;;  %v2348_v17 = vld [vmem:[%s4753_s0 + $0x198] sm:$0x10]   ;;  %954 = vrot.lane.b32.xlu0 %v953_v1, %s2576_s15  ;;  %v805_v20 = vsel %vm107_vm4, %v2251_v6, %v801_v13  ;;  %v1181_v24 = vsel %vm99_vm2, %v2347_v16, %v1177_v21  ;;  %v2274_v40 = vld [vmem:[%s4753_s0 + $0x13c] sm:$0x2]  }
  0x4c   :  { %v2253_v14 = vld [vmem:[%s4753_s0 + $0xee] sm:$0x80]   ;;  %v2335_v22 = vld [vmem:[%s4753_s0 + $0x1c] sm:$0x1]   ;;  %v809_v23 = vsel %vm111_vm5, %v2252_v7, %v805_v20  ;;  %v1185_v31 = vsel %vm103_vm3, %v2348_v17, %v1181_v24  ;;  %v894_v42 = vsel %vm91_vm0, %v2274_v40, %v2273_v39  ;;  %v2275_v43 = vld [vmem:[%s4753_s0 + $0x15b] sm:$0x4]  }
  0x4d   :  { %v2336_v25 = vld [vmem:[%s4753_s0 + $0x3b] sm:$0x2]   ;;  %v813_v30 = vsel %vm115_vm6, %v2253_v14, %v809_v23  ;;  %v2276_v44 = vld [vmem:[%s4753_s0 + $0x17a] sm:$0x8]   ;;  %v898_v50 = vsel %vm95_vm1, %v2275_v43, %v894_v42  ;;  %v2370_v54 = vld [vmem:[%s4753_s0 + $0xb] sm:$0x1]  }
  0x4e   :  { %v2337_v26 = vld [vmem:[%s4753_s0 + $0x5a] sm:$0x4]   ;;  %v1138_v33 = vsel %vm91_vm0, %v2336_v25, %v2335_v22  ;;  %814 = vrot.lane.b32.xlu2 %v813_v30, %s2575_s8  ;;  %v2277_v45 = vld [vmem:[%s4753_s0 + $0x199] sm:$0x10]   ;;  %v902_v53 = vsel %vm99_vm2, %v2276_v44, %v898_v50  ;;  %v2371_v55 = vld [vmem:[%s4753_s0 + $0x2a] sm:$0x2]  }
  0x4f   :  { %v2338_v27 = vld [vmem:[%s4753_s0 + $0x79] sm:$0x8]   ;;  %v1142_v37 = vsel %vm95_vm1, %v2337_v26, %v1138_v33  ;;  %v2278_v51 = vld [vmem:[%s4753_s0 + $0x1b8] sm:$0x20]   ;;  %v2372_v56 = vld [vmem:[%s4753_s0 + $0x49] sm:$0x4]   ;;  %v906_v58 = vsel %vm103_vm3, %v2277_v45, %v902_v53  ;;  %v1277_v60 = vsel %vm91_vm0, %v2371_v55, %v2370_v54 }
  0x50   :  { %v2349_v32 = vld [vmem:[%s4753_s0 + $0x1b7] sm:$0x20]   ;;  %v1146_v41 = vsel %vm99_vm2, %v2338_v27, %v1142_v37  ;;  %v2279_v52 = vld [vmem:[%s4753_s0 + $0x1d7] sm:$0x40]   ;;  %v2373_v61 = vld [vmem:[%s4753_s0 + $0x68] sm:$0x8]   ;;  %v910_v1 = vsel %vm107_vm4, %v2278_v51, %v906_v58  ;;  %v1281_v2 = vsel %vm95_vm1, %v2372_v56, %v1277_v60 }
  0x51   :  { %v2339_v34 = vld [vmem:[%s4753_s0 + $0x98] sm:$0x10]   ;;  %v1189_v47 = vsel %vm107_vm4, %v2349_v32, %v1185_v31  ;;  %v2280_v59 = vld [vmem:[%s4753_s0 + $0x1f6] sm:$0x80]   ;;  %v2374_v62 = vld [vmem:[%s4753_s0 + $0x87] sm:$0x10]   ;;  %v914_v4 = vsel %vm111_vm5, %v2279_v52, %v910_v1  ;;  %v1285_v5 = vsel %vm99_vm2, %v2373_v61, %v1281_v2 }
  0x52   :  { %v2350_v36 = vld [vmem:[%s4753_s0 + $0x1d6] sm:$0x40]   ;;  %v1150_v48 = vsel %vm103_vm3, %v2339_v34, %v1146_v41  ;;  %1093 = vrot.lane.b32.xlu1 %v1092_v35, %s2576_s15  ;;  %v2361_v3 = vld [vmem:[%s4753_s0 + $0x103] sm:$0x1]   ;;  %v918_v11 = vsel %vm115_vm6, %v2280_v59, %v914_v4  ;;  %v1289_v12 = vsel %vm103_vm3, %v2374_v62, %v1285_v5  ;;  %v2375_v13 = vld [vmem:[%s4753_s0 + $0xa6] sm:$0x20]  }
  0x53   :  { %v2340_v38 = vld [vmem:[%s4753_s0 + $0xb7] sm:$0x20]   ;;  %1058 = vrot.lane.b32.xlu0 %v1057_v46, %s2576_s15  ;;  %v1193_v63 = vsel %vm111_vm5, %v2350_v36, %v1189_v47  ;;  %v2362_v6 = vld [vmem:[%s4753_s0 + $0x122] sm:$0x2]   ;;  %v2376_v17 = vld [vmem:[%s4753_s0 + $0xc5] sm:$0x40]   ;;  %v1293_v28 = vsel %vm107_vm4, %v2375_v13, %v1289_v12 }
  0x54   :  { %v2341_v49 = vld [vmem:[%s4753_s0 + $0xd6] sm:$0x40]   ;;  %v1154_v57 = vsel %vm107_vm4, %v2340_v38, %v1150_v48  ;;  %v2363_v7 = vld [vmem:[%s4753_s0 + $0x141] sm:$0x4]   ;;  %v1242_v14 = vsel %vm91_vm0, %v2362_v6, %v2361_v3  ;;  %v2299_v20 = vld [vmem:[%s4753_s0 + $0xc] sm:$0x1]   ;;  %v1297_v44 = vsel %vm111_vm5, %v2376_v17, %v1293_v28 }
  0x55   :  { %v2351_v0 = vld [vmem:[%s4753_s0 + $0x1f5] sm:$0x80]   ;;  %v2364_v8 = vld [vmem:[%s4753_s0 + $0x160] sm:$0x8]   ;;  %v1158_v9 = vsel %vm111_vm5, %v2341_v49, %v1154_v57  ;;  %v1246_v18 = vsel %vm95_vm1, %v2363_v7, %v1242_v14  ;;  %v2300_v21 = vld [vmem:[%s4753_s0 + $0x2b] sm:$0x2]  }
  0x56   :  { %v2342_v10 = vld [vmem:[%s4753_s0 + $0xf5] sm:$0x80]   ;;  %v2365_v15 = vld [vmem:[%s4753_s0 + $0x17f] sm:$0x10]   ;;  %v1197_v16 = vsel %vm115_vm6, %v2351_v0, %v1193_v63  ;;  %919 = vrot.lane.b32.xlu2 %v918_v11, %s2575_s8  ;;  %v1250_v22 = vsel %vm99_vm2, %v2364_v8, %v1246_v18  ;;  %v998_v23 = vsel %vm91_vm0, %v2300_v21, %v2299_v20  ;;  %v2301_v24 = vld [vmem:[%s4753_s0 + $0x4a] sm:$0x4]  }
  0x57   :  { %v2366_v19 = vld [vmem:[%s4753_s0 + $0x19e] sm:$0x20]   ;;  %v2302_v25 = vld [vmem:[%s4753_s0 + $0x69] sm:$0x8]   ;;  %v1162_v27 = vsel %vm115_vm6, %v2342_v10, %v1158_v9  ;;  %v1254_v29 = vsel %vm103_vm3, %v2365_v15, %v1250_v22  ;;  %v1002_v31 = vsel %vm95_vm1, %v2301_v24, %v998_v23  ;;  %v2397_v35 = vld [vmem:[%s4753_s0 + $0x113] sm:$0x1]  }
  0x58   :  { %v2303_v26 = vld [vmem:[%s4753_s0 + $0x88] sm:$0x10]   ;;  %v2367_v30 = vld [vmem:[%s4753_s0 + $0x1bd] sm:$0x40]   ;;  %v1006_v34 = vsel %vm99_vm2, %v2302_v25, %v1002_v31  ;;  %v2398_v36 = vld [vmem:[%s4753_s0 + $0x132] sm:$0x2]   ;;  %v1258_v38 = vsel %vm107_vm4, %v2366_v19, %v1254_v29 }
  0x59   :  { %v2304_v32 = vld [vmem:[%s4753_s0 + $0xa7] sm:$0x20]   ;;  %v2399_v37 = vld [vmem:[%s4753_s0 + $0x151] sm:$0x4]   ;;  %v1010_v39 = vsel %vm103_vm3, %v2303_v26, %v1006_v34  ;;  %v1382_v41 = vsel %vm91_vm0, %v2398_v36, %v2397_v35  ;;  %v2377_v45 = vld [vmem:[%s4753_s0 + $0xe4] sm:$0x80]   ;;  %v1262_v54 = vsel %vm111_vm5, %v2367_v30, %v1258_v38 }
  0x5a   :  { %v2305_v33 = vld [vmem:[%s4753_s0 + $0xc6] sm:$0x40]   ;;  %1198 = vrot.lane.b32.xlu1 %v1197_v16, %s2576_s15  ;;  %v2400_v42 = vld [vmem:[%s4753_s0 + $0x170] sm:$0x8]   ;;  %v1014_v46 = vsel %vm107_vm4, %v2304_v32, %v1010_v39  ;;  %v1386_v47 = vsel %vm95_vm1, %v2399_v37, %v1382_v41  ;;  %v2368_v55 = vld [vmem:[%s4753_s0 + $0x1dc] sm:$0x80]   ;;  %v1301_v61 = vsel %vm115_vm6, %v2377_v45, %v1297_v44 }
  0x5b   :  { %v2306_v40 = vld [vmem:[%s4753_s0 + $0xe5] sm:$0x80]   ;;  %v2401_v43 = vld [vmem:[%s4753_s0 + $0x18f] sm:$0x10]   ;;  %1163 = vrot.lane.b32.xlu0 %v1162_v27, %s2576_s15  ;;  %v1018_v49 = vsel %vm111_vm5, %v2305_v33, %v1014_v46  ;;  %v1390_v50 = vsel %vm99_vm2, %v2400_v42, %v1386_v47  ;;  %v2326_v1 = vld [vmem:[%s4753_s0 + $0x114] sm:$0x1]   ;;  %v1266_v8 = vsel %vm115_vm6, %v2368_v55, %v1262_v54 }
  0x5c   :  { %v2388_v48 = vld [vmem:[%s4753_s0 + $0x13] sm:$0x1]   ;;  %v1022_v56 = vsel %vm115_vm6, %v2306_v40, %v1018_v49  ;;  %v1394_v57 = vsel %vm103_vm3, %v2401_v43, %v1390_v50  ;;  %v2327_v2 = vld [vmem:[%s4753_s0 + $0x133] sm:$0x2]   ;;  %v2424_v16 = vld [vmem:[%s4753_s0 + $0x2] sm:$0x1]  }
  0x5d   :  { %v2389_v51 = vld [vmem:[%s4753_s0 + $0x32] sm:$0x2]   ;;  %v1103_v4 = vsel %vm91_vm0, %v2327_v2, %v2326_v1  ;;  %v2328_v5 = vld [vmem:[%s4753_s0 + $0x152] sm:$0x4]   ;;  %v2425_v17 = vld [vmem:[%s4753_s0 + $0x21] sm:$0x2]  }
  0x5e   :  { %v2390_v52 = vld [vmem:[%s4753_s0 + $0x51] sm:$0x4]   ;;  %v1347_v59 = vsel %vm91_vm0, %v2389_v51, %v2388_v48  ;;  %1023 = vrot.lane.b32.xlu2 %v1022_v56, %s2576_s15  ;;  %v2329_v6 = vld [vmem:[%s4753_s0 + $0x171] sm:$0x8]   ;;  %v1107_v12 = vsel %vm95_vm1, %v2328_v5, %v1103_v4  ;;  %v2426_v18 = vld [vmem:[%s4753_s0 + $0x40] sm:$0x4]   ;;  %v1487_v22 = vsel %vm91_vm0, %v2425_v17, %v2424_v16 }
  0x5f   :  { %v2391_v53 = vld [vmem:[%s4753_s0 + $0x70] sm:$0x8]   ;;  %v1351_v63 = vsel %vm95_vm1, %v2390_v52, %v1347_v59  ;;  %v2330_v7 = vld [vmem:[%s4753_s0 + $0x190] sm:$0x10]   ;;  %v1111_v15 = vsel %vm99_vm2, %v2329_v6, %v1107_v12  ;;  %v2427_v23 = vld [vmem:[%s4753_s0 + $0x5f] sm:$0x8]   ;;  %v1491_v29 = vsel %vm95_vm1, %v2426_v18, %v1487_v22 }
  0x60   :  { %v2402_v58 = vld [vmem:[%s4753_s0 + $0x1ae] sm:$0x20]   ;;  %v1355_v3 = vsel %vm99_vm2, %v2391_v53, %v1351_v63  ;;  %v2331_v13 = vld [vmem:[%s4753_s0 + $0x1af] sm:$0x20]   ;;  %v1115_v20 = vsel %vm103_vm3, %v2330_v7, %v1111_v15  ;;  %v2428_v24 = vld [vmem:[%s4753_s0 + $0x7e] sm:$0x10]   ;;  %v1495_v31 = vsel %vm99_vm2, %v2427_v23, %v1491_v29 }
  0x61   :  { %v2392_v60 = vld [vmem:[%s4753_s0 + $0x8f] sm:$0x10]   ;;  %v1398_v9 = vsel %vm107_vm4, %v2402_v58, %v1394_v57  ;;  %v2332_v14 = vld [vmem:[%s4753_s0 + $0x1ce] sm:$0x40]   ;;  %v1119_v28 = vsel %vm107_vm4, %v2331_v13, %v1115_v20  ;;  %v2415_v32 = vld [vmem:[%s4753_s0 + $0x11b] sm:$0x1]   ;;  %v1499_v37 = vsel %vm103_vm3, %v2428_v24, %v1495_v31 }
  0x62   :  { %v2403_v62 = vld [vmem:[%s4753_s0 + $0x1cd] sm:$0x40]   ;;  %v1359_v10 = vsel %vm103_vm3, %v2392_v60, %v1355_v3  ;;  %1302 = vrot.lane.b32.xlu1 %v1301_v61, %s2577_s22  ;;  %v2333_v21 = vld [vmem:[%s4753_s0 + $0x1ed] sm:$0x80]   ;;  %v1123_v30 = vsel %vm111_vm5, %v2332_v14, %v1119_v28  ;;  %v2416_v33 = vld [vmem:[%s4753_s0 + $0x13a] sm:$0x2]  }
  0x63   :  { %v2393_v0 = vld [vmem:[%s4753_s0 + $0xae] sm:$0x20]   ;;  %1267 = vrot.lane.b32.xlu0 %v1266_v8, %s2577_s22  ;;  %v1402_v25 = vsel %vm111_vm5, %v2403_v62, %v1398_v9  ;;  %v2417_v34 = vld [vmem:[%s4753_s0 + $0x159] sm:$0x4]   ;;  %v1127_v36 = vsel %vm115_vm6, %v2333_v21, %v1123_v30  ;;  %v2429_v38 = vld [vmem:[%s4753_s0 + $0x9d] sm:$0x20]   ;;  %v1452_v39 = vsel %vm91_vm0, %v2416_v33, %v2415_v32 }
  0x64   :  { %v2394_v11 = vld [vmem:[%s4753_s0 + $0xcd] sm:$0x40]   ;;  %v1363_v19 = vsel %vm107_vm4, %v2393_v0, %v1359_v10  ;;  %v2418_v40 = vld [vmem:[%s4753_s0 + $0x178] sm:$0x8]   ;;  %v2430_v43 = vld [vmem:[%s4753_s0 + $0xbc] sm:$0x40]   ;;  %v1456_v44 = vsel %vm95_vm1, %v2417_v34, %v1452_v39  ;;  %v1503_v52 = vsel %vm107_vm4, %v2429_v38, %v1499_v37 }
  0x65   :  { %v2404_v26 = vld [vmem:[%s4753_s0 + $0x1ec] sm:$0x80]   ;;  %v1367_v35 = vsel %vm111_vm5, %v2394_v11, %v1363_v19  ;;  %v2419_v41 = vld [vmem:[%s4753_s0 + $0x197] sm:$0x10]   ;;  %v2353_v46 = vld [vmem:[%s4753_s0 + $0x3] sm:$0x1]   ;;  %v1460_v47 = vsel %vm99_vm2, %v2418_v40, %v1456_v44  ;;  %v1507_v5 = vsel %vm111_vm5, %v2430_v43, %v1503_v52 }
  0x66   :  { %v2395_v27 = vld [vmem:[%s4753_s0 + $0xec] sm:$0x80]   ;;  %v1406_v42 = vsel %vm115_vm6, %v2404_v26, %v1402_v25  ;;  %1128 = vrot.lane.b32.xlu2 %v1127_v36, %s2576_s15  ;;  %v2420_v45 = vld [vmem:[%s4753_s0 + $0x1b6] sm:$0x20]   ;;  %v2354_v48 = vld [vmem:[%s4753_s0 + $0x22] sm:$0x2]   ;;  %v1464_v53 = vsel %vm103_vm3, %v2419_v41, %v1460_v47 }
  0x67   :  { %v2355_v49 = vld [vmem:[%s4753_s0 + $0x41] sm:$0x4]   ;;  %v1371_v51 = vsel %vm115_vm6, %v2395_v27, %v1367_v35  ;;  %v2421_v54 = vld [vmem:[%s4753_s0 + $0x1d5] sm:$0x40]   ;;  %v1208_v55 = vsel %vm91_vm0, %v2354_v48, %v2353_v46  ;;  %v2431_v58 = vld [vmem:[%s4753_s0 + $0xdb] sm:$0x80]   ;;  %v1468_v63 = vsel %vm107_vm4, %v2420_v45, %v1464_v53 }
  0x68   :  { %v2356_v50 = vld [vmem:[%s4753_s0 + $0x60] sm:$0x8]   ;;  %v1212_v59 = vsel %vm95_vm1, %v2355_v49, %v1208_v55  ;;  %v2450_v61 = vld [vmem:[%s4753_s0 + $0x10a] sm:$0x1]   ;;  %v2422_v6 = vld [vmem:[%s4753_s0 + $0x1f4] sm:$0x80]   ;;  %v1472_v15 = vsel %vm111_vm5, %v2421_v54, %v1468_v63  ;;  %v1511_v22 = vsel %vm115_vm6, %v2431_v58, %v1507_v5 }
  0x69   :  { %v2357_v56 = vld [vmem:[%s4753_s0 + $0x7f] sm:$0x10]   ;;  %v2451_v62 = vld [vmem:[%s4753_s0 + $0x129] sm:$0x2]   ;;  %v1216_v0 = vsel %vm99_vm2, %v2356_v50, %v1212_v59  ;;  %v2379_v27 = vld [vmem:[%s4753_s0 + $0x10b] sm:$0x1]   ;;  %v1476_v32 = vsel %vm115_vm6, %v2422_v6, %v1472_v15 }
  0x6a   :  { %v2358_v57 = vld [vmem:[%s4753_s0 + $0x9e] sm:$0x20]   ;;  %1407 = vrot.lane.b32.xlu1 %v1406_v42, %s2577_s22  ;;  %v1591_v1 = vsel %vm91_vm0, %v2451_v62, %v2450_v61  ;;  %v2452_v2 = vld [vmem:[%s4753_s0 + $0x148] sm:$0x4]   ;;  %v1220_v7 = vsel %vm103_vm3, %v2357_v56, %v1216_v0  ;;  %v2380_v29 = vld [vmem:[%s4753_s0 + $0x12a] sm:$0x2]  }
  0x6b   :  { %v2359_v60 = vld [vmem:[%s4753_s0 + $0xbd] sm:$0x40]   ;;  %v2453_v3 = vld [vmem:[%s4753_s0 + $0x167] sm:$0x8]   ;;  %1372 = vrot.lane.b32.xlu0 %v1371_v51, %s2577_s22  ;;  %v1595_v9 = vsel %vm95_vm1, %v2452_v2, %v1591_v1  ;;  %v1224_v10 = vsel %vm107_vm4, %v2358_v57, %v1220_v7  ;;  %v2381_v30 = vld [vmem:[%s4753_s0 + $0x149] sm:$0x4]   ;;  %v1312_v36 = vsel %vm91_vm0, %v2380_v29, %v2379_v27 }
  0x6c   :  { %v2454_v4 = vld [vmem:[%s4753_s0 + $0x186] sm:$0x10]   ;;  %v2360_v8 = vld [vmem:[%s4753_s0 + $0xdc] sm:$0x80]   ;;  %v1599_v11 = vsel %vm99_vm2, %v2453_v3, %v1595_v9  ;;  %v1228_v16 = vsel %vm111_vm5, %v2359_v60, %v1224_v10  ;;  %v2382_v31 = vld [vmem:[%s4753_s0 + $0x168] sm:$0x8]   ;;  %v1316_v39 = vsel %vm95_vm1, %v2381_v30, %v1312_v36 }
  0x6d   :  { %v2441_v12 = vld [vmem:[%s4753_s0 + $0xa] sm:$0x1]   ;;  %v1603_v17 = vsel %vm103_vm3, %v2454_v4, %v1599_v11  ;;  %v1232_v23 = vsel %vm115_vm6, %v2360_v8, %v1228_v16  ;;  %v2383_v37 = vld [vmem:[%s4753_s0 + $0x187] sm:$0x10]   ;;  %s2578_s4 = smov 32   ;;  %v1320_v44 = vsel %vm99_vm2, %v2382_v31, %v1316_v39  ;;  %vm4_vm7 = vcmask 1047556  }
  0x6e   :  { %v2442_v13 = vld [vmem:[%s4753_s0 + $0x29] sm:$0x2]   ;;  %1233 = vrot.lane.b32.xlu2 %v1232_v23, %s2577_s22  ;;  %v2384_v38 = vld [vmem:[%s4753_s0 + $0x1a6] sm:$0x20]   ;;  %v2477_v41 = vld [vmem:[%s4753_s0 + $0x1a] sm:$0x1]   ;;  %v1324_v52 = vsel %vm103_vm3, %v2383_v37, %v1320_v44 }
  0x6f   :  { %v2443_v14 = vld [vmem:[%s4753_s0 + $0x48] sm:$0x4]   ;;  %v1556_v19 = vsel %vm91_vm0, %v2442_v13, %v2441_v12  ;;  %v2385_v40 = vld [vmem:[%s4753_s0 + $0x1c5] sm:$0x40]   ;;  %v2478_v42 = vld [vmem:[%s4753_s0 + $0x39] sm:$0x2]   ;;  %v1328_v55 = vsel %vm107_vm4, %v2384_v38, %v1324_v52 }
  0x70   :  { %v2455_v18 = vld [vmem:[%s4753_s0 + $0x1a5] sm:$0x20]   ;;  %v1560_v25 = vsel %vm95_vm1, %v2443_v14, %v1556_v19  ;;  %v1696_v45 = vsel %vm91_vm0, %v2478_v42, %v2477_v41  ;;  %v2479_v46 = vld [vmem:[%s4753_s0 + $0x58] sm:$0x4]   ;;  %v2386_v53 = vld [vmem:[%s4753_s0 + $0x1e4] sm:$0x80]   ;;  %v1332_v61 = vsel %vm111_vm5, %v2385_v40, %v1328_v55 }
  0x71   :  { %v2444_v20 = vld [vmem:[%s4753_s0 + $0x67] sm:$0x8]   ;;  %v1607_v33 = vsel %vm107_vm4, %v2455_v18, %v1603_v17  ;;  %v2480_v47 = vld [vmem:[%s4753_s0 + $0x77] sm:$0x8]   ;;  %v1700_v54 = vsel %vm95_vm1, %v2479_v46, %v1696_v45  ;;  %v2468_v57 = vld [vmem:[%s4753_s0 + $0x112] sm:$0x1]   ;;  %v1336_v4 = vsel %vm115_vm6, %v2386_v53, %v1332_v61 }
  0x72   :  { %v2445_v21 = vld [vmem:[%s4753_s0 + $0x86] sm:$0x10]   ;;  %v1564_v28 = vsel %vm99_vm2, %v2444_v20, %v1560_v25  ;;  %1512 = vrot.lane.b32.xlu1 %v1511_v22, %s2578_s4  ;;  %v2481_v48 = vld [vmem:[%s4753_s0 + $0x96] sm:$0x10]   ;;  %v1704_v56 = vsel %vm99_vm2, %v2480_v47, %v1700_v54  ;;  %v2469_v58 = vld [vmem:[%s4753_s0 + $0x131] sm:$0x2]  }
  0x73   :  { %v2456_v24 = vld [vmem:[%s4753_s0 + $0x1c4] sm:$0x40]   ;;  %v1568_v34 = vsel %vm103_vm3, %v2445_v21, %v1564_v28  ;;  %1477 = vrot.lane.b32.xlu0 %v1476_v32, %s2577_s22  ;;  %v2470_v59 = vld [vmem:[%s4753_s0 + $0x150] sm:$0x4]   ;;  %v1708_v62 = vsel %vm103_vm3, %v2481_v48, %v1704_v56  ;;  %v2482_v63 = vld [vmem:[%s4753_s0 + $0xb5] sm:$0x20]   ;;  %v1661_v0 = vsel %vm91_vm0, %v2469_v58, %v2468_v57 }
  0x74   :  { %v2446_v26 = vld [vmem:[%s4753_s0 + $0xa5] sm:$0x20]   ;;  %v1611_v49 = vsel %vm111_vm5, %v2456_v24, %v1607_v33  ;;  %v2471_v1 = vld [vmem:[%s4753_s0 + $0x16f] sm:$0x8]   ;;  %v2483_v5 = vld [vmem:[%s4753_s0 + $0xd4] sm:$0x40]   ;;  %v1665_v6 = vsel %vm95_vm1, %v2470_v59, %v1661_v0  ;;  %v1712_v14 = vsel %vm107_vm4, %v2482_v63, %v1708_v62 }
  0x75   :  { %v2447_v35 = vld [vmem:[%s4753_s0 + $0xc4] sm:$0x40]   ;;  %v1572_v43 = vsel %vm107_vm4, %v2446_v26, %v1568_v34  ;;  %v2472_v2 = vld [vmem:[%s4753_s0 + $0x18e] sm:$0x10]   ;;  %v2406_v8 = vld [vmem:[%s4753_s0 + $0x1b] sm:$0x1]   ;;  %v1669_v9 = vsel %vm99_vm2, %v2471_v1, %v1665_v6  ;;  %v1716_v32 = vsel %vm111_vm5, %v2483_v5, %v1712_v14 }
  0x76   :  { %v2457_v50 = vld [vmem:[%s4753_s0 + $0x1e3] sm:$0x80]   ;;  %v1576_v60 = vsel %vm111_vm5, %v2447_v35, %v1572_v43  ;;  %v2473_v7 = vld [vmem:[%s4753_s0 + $0x1ad] sm:$0x20]   ;;  %1337 = vrot.lane.b32.xlu2 %v1336_v4, %s2577_s22  ;;  %v2407_v10 = vld [vmem:[%s4753_s0 + $0x3a] sm:$0x2]   ;;  %v1673_v15 = vsel %vm103_vm3, %v2472_v2, %v1669_v9 }
  0x77   :  { %v2448_v51 = vld [vmem:[%s4753_s0 + $0xe3] sm:$0x80]   ;;  %v1615_v3 = vsel %vm115_vm6, %v2457_v50, %v1611_v49  ;;  %v2408_v11 = vld [vmem:[%s4753_s0 + $0x59] sm:$0x4]   ;;  %v2474_v16 = vld [vmem:[%s4753_s0 + $0x1cc] sm:$0x40]   ;;  %v3995_v17 = vpop.permute.xlu2 %256   ;;  %v1417_v18 = vsel %vm91_vm0, %v2407_v10, %v2406_v8  ;;  %v1677_v25 = vsel %vm107_vm4, %v2473_v7, %v1673_v15 }
  0x78   :  { %v2409_v12 = vld [vmem:[%s4753_s0 + $0x78] sm:$0x8]   ;;  %v1580_v13 = vsel %vm115_vm6, %v2448_v51, %v1576_v60  ;;  %v1421_v21 = vsel %vm95_vm1, %v2408_v11, %v1417_v18  ;;  %v2503_v23 = vld [vmem:[%s4753_s0 + $0x101] sm:$0x1]   ;;  %v2484_v33 = vld [vmem:[%s4753_s0 + $0xf3] sm:$0x80]   ;;  %v1681_v44 = vsel %vm111_vm5, %v2474_v16, %v1677_v25 }
  0x79   :  { %v2410_v19 = vld [vmem:[%s4753_s0 + $0x97] sm:$0x10]   ;;  %v2504_v24 = vld [vmem:[%s4753_s0 + $0x120] sm:$0x2]   ;;  %v1425_v26 = vsel %vm99_vm2, %v2409_v12, %v1421_v21  ;;  %v2475_v34 = vld [vmem:[%s4753_s0 + $0x1eb] sm:$0x80]   ;;  %v1720_v51 = vsel %vm115_vm6, %v2484_v33, %v1716_v32 }
  0x7a   :  { %v2411_v20 = vld [vmem:[%s4753_s0 + $0xb6] sm:$0x20]   ;;  %1616 = vrot.lane.b32.xlu1 %v1615_v3, %s2578_s4  ;;  %v1800_v27 = vsel %vm91_vm0, %v2504_v24, %v2503_v23  ;;  %v2505_v28 = vld [vmem:[%s4753_s0 + $0x13f] sm:$0x4]   ;;  %v1429_v35 = vsel %vm103_vm3, %v2410_v19, %v1425_v26  ;;  %v2432_v56 = vld [vmem:[%s4753_s0 + $0x102] sm:$0x1]   ;;  %v1685_v61 = vsel %vm115_vm6, %v2475_v34, %v1681_v44 }
  0x7b   :  { %v2412_v22 = vld [vmem:[%s4753_s0 + $0xd5] sm:$0x40]   ;;  %v2506_v29 = vld [vmem:[%s4753_s0 + $0x15e] sm:$0x8]   ;;  %1581 = vrot.lane.b32.xlu0 %v1580_v13, %s2578_s4  ;;  %v1804_v37 = vsel %vm95_vm1, %v2505_v28, %v1800_v27  ;;  %v1433_v38 = vsel %vm107_vm4, %v2411_v20, %v1429_v35  ;;  %v2433_v58 = vld [vmem:[%s4753_s0 + $0x121] sm:$0x2]  }
  0x7c   :  { %v2507_v30 = vld [vmem:[%s4753_s0 + $0x17d] sm:$0x10]   ;;  %v4028_v31 = vpop.permute.xlu1 %186   ;;  %v2413_v36 = vld [vmem:[%s4753_s0 + $0xf4] sm:$0x80]   ;;  %v1808_v39 = vsel %vm99_vm2, %v2506_v29, %v1804_v37  ;;  %v1437_v45 = vsel %vm111_vm5, %v2412_v22, %v1433_v38  ;;  %v2434_v59 = vld [vmem:[%s4753_s0 + $0x140] sm:$0x4]   ;;  %v1521_v2 = vsel %vm91_vm0, %v2433_v58, %v2432_v56 }
  0x7d   :  { %v2495_v40 = vld [vmem:[%s4753_s0 + $0x1] sm:$0x1]   ;;  %v4053_v43 = vpop.permute.xlu0 %117   ;;  %v1812_v46 = vsel %vm103_vm3, %v2507_v30, %v1808_v39  ;;  %v1441_v52 = vsel %vm115_vm6, %v2413_v36, %v1437_v45  ;;  %v2435_v60 = vld [vmem:[%s4753_s0 + $0x15f] sm:$0x8]   ;;  %v1525_v5 = vsel %vm95_vm1, %v2434_v59, %v1521_v2  ;;  %v2530_v7 = vld [vmem:[%s4753_s0 + $0x11] sm:$0x1]  }
  0x7e   :  { %v2496_v41 = vld [vmem:[%s4753_s0 + $0x20] sm:$0x2]   ;;  %1442 = vrot.lane.b32.xlu2 %v1441_v52, %s2577_s22  ;;  %v2436_v3 = vld [vmem:[%s4753_s0 + $0x17e] sm:$0x10]   ;;  %v2531_v8 = vld [vmem:[%s4753_s0 + $0x30] sm:$0x2]   ;;  %v1529_v10 = vsel %vm99_vm2, %v2435_v60, %v1525_v5 }
  0x7f   :  { %v2497_v42 = vld [vmem:[%s4753_s0 + $0x3f] sm:$0x4]   ;;  %v1766_v48 = vsel %vm91_vm0, %v2496_v41, %v2495_v40  ;;  %v4097_v1 = vpop.permute.xlu2 %291   ;;  %v2437_v4 = vld [vmem:[%s4753_s0 + $0x19d] sm:$0x20]   ;;  %v1905_v11 = vsel %vm91_vm0, %v2531_v8, %v2530_v7  ;;  %v2532_v12 = vld [vmem:[%s4753_s0 + $0x4f] sm:$0x4]   ;;  %v1533_v20 = vsel %vm103_vm3, %v2436_v3, %v1529_v10 }
  0x80   :  { %v2508_v47 = vld [vmem:[%s4753_s0 + $0x19c] sm:$0x20]   ;;  %v1770_v54 = vsel %vm95_vm1, %v2497_v42, %v1766_v48  ;;  %v2438_v6 = vld [vmem:[%s4753_s0 + $0x1bc] sm:$0x40]   ;;  %v2533_v13 = vld [vmem:[%s4753_s0 + $0x6e] sm:$0x8]   ;;  %v1909_v22 = vsel %vm95_vm1, %v2532_v12, %v1905_v11  ;;  %v1537_v23 = vsel %vm107_vm4, %v2437_v4, %v1533_v20 }
  0x81   :  { %v2498_v49 = vld [vmem:[%s4753_s0 + $0x5e] sm:$0x8]   ;;  %v1816_v62 = vsel %vm107_vm4, %v2508_v47, %v1812_v46  ;;  %v2534_v14 = vld [vmem:[%s4753_s0 + $0x8d] sm:$0x10]   ;;  %v2439_v21 = vld [vmem:[%s4753_s0 + $0x1db] sm:$0x80]   ;;  %v1913_v24 = vsel %vm99_vm2, %v2533_v13, %v1909_v22  ;;  %v1541_v30 = vsel %vm111_vm5, %v2438_v6, %v1537_v23 }
  0x82   :  { %v2499_v50 = vld [vmem:[%s4753_s0 + $0x7d] sm:$0x10]   ;;  %v1774_v57 = vsel %vm99_vm2, %v2498_v49, %v1770_v54  ;;  %1721 = vrot.lane.b32.xlu1 %v1720_v51, %s2578_s4  ;;  %v2521_v25 = vld [vmem:[%s4753_s0 + $0x109] sm:$0x1]   ;;  %v1917_v32 = vsel %vm103_vm3, %v2534_v14, %v1913_v24  ;;  %v2535_v33 = vld [vmem:[%s4753_s0 + $0xac] sm:$0x20]   ;;  %v1545_v38 = vsel %vm115_vm6, %v2439_v21, %v1541_v30 }
  0x83   :  { %v2509_v53 = vld [vmem:[%s4753_s0 + $0x1bb] sm:$0x40]   ;;  %v1778_v63 = vsel %vm103_vm3, %v2499_v50, %v1774_v57  ;;  %1686 = vrot.lane.b32.xlu0 %v1685_v61, %s2578_s4  ;;  %v2522_v26 = vld [vmem:[%s4753_s0 + $0x128] sm:$0x2]   ;;  %v2536_v39 = vld [vmem:[%s4753_s0 + $0xcb] sm:$0x40]   ;;  %v1921_v46 = vsel %vm107_vm4, %v2535_v33, %v1917_v32 }
  0x84   :  { %v2500_v55 = vld [vmem:[%s4753_s0 + $0x9c] sm:$0x20]   ;;  %v4130_v15 = vpop.permute.xlu1 %221   ;;  %v1820_v16 = vsel %vm111_vm5, %v2509_v53, %v1816_v62  ;;  %v2523_v27 = vld [vmem:[%s4753_s0 + $0x147] sm:$0x4]   ;;  %v1870_v34 = vsel %vm91_vm0, %v2522_v26, %v2521_v25  ;;  %vm6_vm8 = vcmask 130048   ;;  %s2579_s3 = smov 16   ;;  %v1925_v59 = vsel %vm111_vm5, %v2536_v39, %v1921_v46 }
  0x85   :  { %v2501_v0 = vld [vmem:[%s4753_s0 + $0xbb] sm:$0x40]   ;;  %v1782_v9 = vsel %vm107_vm4, %v2500_v55, %v1778_v63  ;;  %v4155_v28 = vpop.permute.xlu0 %151   ;;  %v2524_v35 = vld [vmem:[%s4753_s0 + $0x166] sm:$0x8]   ;;  %v1874_v40 = vsel %vm95_vm1, %v2523_v27, %v1870_v34  ;;  %v2537_v51 = vld [vmem:[%s4753_s0 + $0xea] sm:$0x80]  }
  0x86   :  { %v2510_v18 = vld [vmem:[%s4753_s0 + $0x1da] sm:$0x80]   ;;  %v1786_v29 = vsel %vm111_vm5, %v2501_v0, %v1782_v9  ;;  %v2525_v36 = vld [vmem:[%s4753_s0 + $0x185] sm:$0x10]   ;;  %1546 = vrot.lane.b32.xlu2 %v1545_v38, %s2578_s4  ;;  %v1878_v41 = vsel %vm99_vm2, %v2524_v35, %v1874_v40  ;;  %v1929_v4 = vsel %vm115_vm6, %v2537_v51, %v1925_v59  ;;  %vm119_vm9 = vcmask 1048448  }
  0x87   :  { %v2502_v19 = vld [vmem:[%s4753_s0 + $0xda] sm:$0x80]   ;;  %v1824_v37 = vsel %vm115_vm6, %v2510_v18, %v1820_v16  ;;  %v2526_v42 = vld [vmem:[%s4753_s0 + $0x1a4] sm:$0x20]   ;;  %v1882_v47 = vsel %vm103_vm3, %v2525_v36, %v1878_v41  ;;  %vm398_vm10 = vcmask 917248   ;;  %vm677_vm11 = vcmask 786048  }
  0x88   :  { %v2_v44 = vld [vmem:[%s4753_s0] ss:$8 sm:$0xf]   ;;  %v1790_v45 = vsel %vm115_vm6, %v2502_v19, %v1786_v29  ;;  %v2527_v48 = vld [vmem:[%s4753_s0 + $0x1c3] sm:$0x40]   ;;  %v397_v49 = vpop.permute.xlu2 %396   ;;  %v1886_v55 = vsel %vm107_vm4, %v2526_v42, %v1882_v47  ;;  %vm956_vm12 = vcmask 654848  }
  0x89   :  { %v3_v50 = vld [vmem:[%s4753_s0] ss:$8 sm:$0xf0]   ;;  %v2528_v60 = vld [vmem:[%s4753_s0 + $0x1e2] sm:$0x80]   ;;  %v1890_v2 = vsel %vm111_vm5, %v2527_v48, %v1886_v55  ;;  %vm1235_vm13 = vcmask 523648  }
  0x8a   :  { %1825 = vrot.lane.b32.xlu1 %v1824_v37, %s2579_s3  ;;  %v5_v52 = vsel %vm4_vm7, %v3_v50, %v2_v44  ;;  %v2041_v53 = vld [vmem:[%s4753_s0 + $0x40] ss:$8 sm:$0xf]   ;;  %v2459_v6 = vld [vmem:[%s4753_s0 + $0x12] sm:$0x1]   ;;  %v1894_v7 = vsel %vm115_vm6, %v2528_v60, %v1890_v2  ;;  %vm1514_vm14 = vcmask 392448  }
  0x8b   :  { %v2042_v54 = vld [vmem:[%s4753_s0 + $0x40] ss:$8 sm:$0xf0]   ;;  %7 = vst.msk [vmem:[%s4754_s1] ss:$8 sm:$0xf] %vm6_vm8, %v5_v52   ;;  %1791 = vrot.lane.b32.xlu0 %v1790_v45, %s2579_s3 }
  0x8c   :  { %v15_v56 = vsel %vm4_vm7, %v2042_v54, %v2041_v53  ;;  %v2045_v57 = vld [vmem:[%s4753_s0 + $0x80] ss:$8 sm:$0xf]   ;;  %v4214_v58 = vpop.permute.xlu1 %361   ;;  %2040 = vst.msk [vmem:[%s4754_s1 - $0x1f] ss:$8 sm:$0xf0] %vm6_vm8, %v5_v52  }
  0x8d   :  { %v2046_v61 = vld [vmem:[%s4753_s0 + $0x80] ss:$8 sm:$0xf0]   ;;  %2043 = vst.msk [vmem:[%s4754_s1 + $0x2] ss:$8 sm:$0xf] %vm6_vm8, %v15_v56   ;;  %v327_v0 = vpop.permute.xlu0 %326  }
  0x8e   :  { %v26_v62 = vsel %vm4_vm7, %v2046_v61, %v2045_v57  ;;  %v2049_v63 = vld [vmem:[%s4753_s0 + $0xc0] ss:$8 sm:$0xf]   ;;  %2044 = vst.msk [vmem:[%s4754_s1 - $0x1d] ss:$8 sm:$0xf0] %vm6_vm8, %v15_v56  }
  0x8f   :  { %v2050_v3 = vld [vmem:[%s4753_s0 + $0xc0] ss:$8 sm:$0xf0]   ;;  %2047 = vst.msk [vmem:[%s4754_s1 + $0x4] ss:$8 sm:$0xf] %vm6_vm8, %v26_v62  }
  0x90   :  { %v37_v5 = vsel %vm4_vm7, %v2050_v3, %v2049_v63  ;;  %2048 = vst.msk [vmem:[%s4754_s1 - $0x1b] ss:$8 sm:$0xf0] %vm6_vm8, %v26_v62   ;;  %v2053_v8 = vld [vmem:[%s4753_s0 + $0x100] ss:$8 sm:$0xf]   ;;  %v4264_v9 = vpop.permute.xlu2 %500  }
  0x91   :  { %2051 = vst.msk [vmem:[%s4754_s1 + $0x6] ss:$8 sm:$0xf] %vm6_vm8, %v37_v5   ;;  %v2054_v10 = vld [vmem:[%s4753_s0 + $0x100] ss:$8 sm:$0xf0]  }
  0x92   :  { %1930 = vrot.lane.b32.xlu1 %v1929_v4, %s2579_s3  ;;  %2052 = vst.msk [vmem:[%s4754_s1 - $0x19] ss:$8 sm:$0xf0] %vm6_vm8, %v37_v5   ;;  %v2460_v11 = vld [vmem:[%s4753_s0 + $0x31] sm:$0x2]   ;;  %v48_v20 = vsel %vm4_vm7, %v2054_v10, %v2053_v8  ;;  %vm1793_vm15 = vcmask 261248  }
  0x93   :  { %120 = vst.msk [vmem:[%s4754_s1] sm:$0xff] %vm119_vm9, %v4053_v43   ;;  %v2057_v43 = vld [vmem:[%s4753_s0 + $0x140] ss:$8 sm:$0xf]   ;;  %1895 = vrot.lane.b32.xlu0 %v1894_v7, %s2579_s3  ;;  %v1626_v14 = vsel %vm91_vm0, %v2460_v11, %v2459_v6  ;;  %v2461_v16 = vld [vmem:[%s4753_s0 + $0x50] sm:$0x4]  }
  0x94   :  { %399 = vst.msk [vmem:[%s4754_s1] sm:$0xff] %vm398_vm10, %v397_v49   ;;  %v466_v12 = vpop.permute.xlu1 %465   ;;  %v2058_v13 = vld [vmem:[%s4753_s0 + $0x140] ss:$8 sm:$0xf0]   ;;  %v1630_v18 = vsel %vm95_vm1, %v2461_v16, %v1626_v14  ;;  %v2462_v19 = vld [vmem:[%s4753_s0 + $0x6f] sm:$0x8]  }
  0x95   :  { %2094 = vst.msk [vmem:[%s4754_s1 + $0x8] sm:$0xff] %vm119_vm9, %v4028_v31   ;;  %v2061_v31 = vld [vmem:[%s4753_s0 + $0x180] ss:$8 sm:$0xf]   ;;  %v1634_v22 = vsel %vm99_vm2, %v2462_v19, %v1630_v18  ;;  %v2463_v23 = vld [vmem:[%s4753_s0 + $0x8e] sm:$0x10]   ;;  %v59_v30 = vsel %vm4_vm7, %v2058_v13, %v2057_v43 }
  0x96   :  { %2112 = vst.msk [vmem:[%s4754_s1 + $0x10] sm:$0xff] %vm119_vm9, %v3995_v17   ;;  %v431_v17 = vpop.permute.xlu0 %430   ;;  %v2062_v21 = vld [vmem:[%s4753_s0 + $0x180] ss:$8 sm:$0xf0]   ;;  %v1638_v26 = vsel %vm103_vm3, %v2463_v23, %v1634_v22  ;;  %v2464_v27 = vld [vmem:[%s4753_s0 + $0xad] sm:$0x20]  }
  0x97   :  { %2130 = vst.msk [vmem:[%s4754_s1 + $0x18] sm:$0xff] %vm119_vm9, %v327_v0   ;;  %v2065_v24 = vld [vmem:[%s4753_s0 + $0x1c0] ss:$8 sm:$0xf]   ;;  %v2465_v29 = vld [vmem:[%s4753_s0 + $0xcc] sm:$0x40]   ;;  %v1642_v32 = vsel %vm107_vm4, %v2464_v27, %v1638_v26  ;;  %v70_v38 = vsel %vm4_vm7, %v2062_v21, %v2061_v31 }
  0x98   :  { %v2066_v25 = vld [vmem:[%s4753_s0 + $0x1c0] ss:$8 sm:$0xf0]   ;;  %2165 = vst.msk [vmem:[%s4754_s1 + $0x8] sm:$0xff] %vm398_vm10, %v466_v12   ;;  %v2466_v33 = vld [vmem:[%s4753_s0 + $0xeb] sm:$0x80]   ;;  %v1646_v35 = vsel %vm111_vm5, %v2465_v29, %v1642_v32  ;;  %v4359_v37 = vpop.permute.xlu2 %605  }
  0x99   :  { %v2557_v34 = vld [vmem:[%s4753_s0 + $0x119] sm:$0x1]   ;;  %2055 = vst.msk [vmem:[%s4754_s1 + $0x20] ss:$8 sm:$0xf] %vm6_vm8, %v48_v20   ;;  %v1650_v39 = vsel %vm115_vm6, %v2466_v33, %v1646_v35  ;;  %v81_v45 = vsel %vm4_vm7, %v2066_v25, %v2065_v24 }
  0x9a   :  { %v2558_v36 = vld [vmem:[%s4753_s0 + $0x138] sm:$0x2]   ;;  %2056 = vst.msk [vmem:[%s4754_s1 + $0x1] ss:$8 sm:$0xf0] %vm6_vm8, %v48_v20   ;;  %1651 = vrot.lane.b32.xlu2 %v1650_v39, %s2578_s4 }
  0x9b   :  { %v2010_v40 = vsel %vm91_vm0, %v2558_v36, %v2557_v34  ;;  %v2559_v41 = vld [vmem:[%s4753_s0 + $0x157] sm:$0x4]   ;;  %2059 = vst.msk [vmem:[%s4754_s1 + $0x22] ss:$8 sm:$0xf] %vm6_vm8, %v59_v30  }
  0x9c   :  { %v2014_v42 = vsel %vm95_vm1, %v2559_v41, %v2010_v40  ;;  %v2560_v44 = vld [vmem:[%s4753_s0 + $0x176] sm:$0x8]   ;;  %2060 = vst.msk [vmem:[%s4754_s1 + $0x3] ss:$8 sm:$0xf0] %vm6_vm8, %v59_v30   ;;  %v571_v48 = vpop.permute.xlu1 %570  }
  0x9d   :  { %v2018_v46 = vsel %vm99_vm2, %v2560_v44, %v2014_v42  ;;  %v2561_v47 = vld [vmem:[%s4753_s0 + $0x195] sm:$0x10]   ;;  %2063 = vst.msk [vmem:[%s4754_s1 + $0x24] ss:$8 sm:$0xf] %vm6_vm8, %v70_v38  }
  0x9e   :  { %v2022_v49 = vsel %vm103_vm3, %v2561_v47, %v2018_v46  ;;  %v2562_v50 = vld [vmem:[%s4753_s0 + $0x1b4] sm:$0x20]   ;;  %2064 = vst.msk [vmem:[%s4754_s1 + $0x5] ss:$8 sm:$0xf0] %vm6_vm8, %v70_v38   ;;  %v536_v53 = vpop.permute.xlu0 %535  }
  0x9f   :  { %v2026_v51 = vsel %vm107_vm4, %v2562_v50, %v2022_v49  ;;  %v2563_v52 = vld [vmem:[%s4753_s0 + $0x1d3] sm:$0x40]   ;;  %2067 = vst.msk [vmem:[%s4754_s1 + $0x26] ss:$8 sm:$0xf] %vm6_vm8, %v81_v45  }
  0xa0   :  { %v2030_v54 = vsel %vm111_vm5, %v2563_v52, %v2026_v51  ;;  %v2564_v55 = vld [vmem:[%s4753_s0 + $0x1f2] sm:$0x80]   ;;  %2068 = vst.msk [vmem:[%s4754_s1 + $0x7] ss:$8 sm:$0xf0] %vm6_vm8, %v81_v45   ;;  %v710_v60 = vpop.permute.xlu2 %709  }
  0xa1   :  { %v2034_v56 = vsel %vm115_vm6, %v2564_v55, %v2030_v54  ;;  %v2548_v57 = vld [vmem:[%s4753_s0 + $0x19] sm:$0x1]   ;;  %2085 = vst.msk [vmem:[%s4754_s1 + $0x20] sm:$0xff] %vm119_vm9, %v4155_v28   ;;  %v2486_v4 = vld [vmem:[%s4753_s0 + $0x11a] sm:$0x1]  }
  0xa2   :  { %2035 = vrot.lane.b32.xlu1 %v2034_v56, %s2579_s3  ;;  %v2549_v28 = vld [vmem:[%s4753_s0 + $0x38] sm:$0x2]   ;;  %2156 = vst.msk [vmem:[%s4754_s1 + $0x20] sm:$0xff] %vm398_vm10, %v431_v17   ;;  %v2487_v6 = vld [vmem:[%s4753_s0 + $0x139] sm:$0x2]  }
  0xa3   :  { %v2550_v59 = vld [vmem:[%s4753_s0 + $0x57] sm:$0x4]   ;;  %v1975_v61 = vsel %vm91_vm0, %v2549_v28, %v2548_v57  ;;  %2103 = vst.msk [vmem:[%s4754_s1 + $0x28] sm:$0xff] %vm119_vm9, %v4130_v15   ;;  %v2488_v7 = vld [vmem:[%s4753_s0 + $0x158] sm:$0x4]  }
  0xa4   :  { %v2551_v62 = vld [vmem:[%s4753_s0 + $0x76] sm:$0x8]   ;;  %v1979_v15 = vsel %vm95_vm1, %v2550_v59, %v1975_v61  ;;  %2121 = vst.msk [vmem:[%s4754_s1 + $0x30] sm:$0xff] %vm119_vm9, %v4097_v1   ;;  %v676_v5 = vpop.permute.xlu1 %675   ;;  %v2489_v10 = vld [vmem:[%s4753_s0 + $0x177] sm:$0x8]  }
  0xa5   :  { %v2552_v63 = vld [vmem:[%s4753_s0 + $0x95] sm:$0x10]   ;;  %v1983_v1 = vsel %vm99_vm2, %v2551_v62, %v1979_v15  ;;  %2139 = vst.msk [vmem:[%s4754_s1 + $0x38] sm:$0xff] %vm119_vm9, %v4214_v58   ;;  %v2490_v43 = vld [vmem:[%s4753_s0 + $0x196] sm:$0x10]  }
  0xa6   :  { %v2553_v0 = vld [vmem:[%s4753_s0 + $0xb4] sm:$0x20]   ;;  %v1987_v58 = vsel %vm103_vm3, %v2552_v63, %v1983_v1  ;;  %2174 = vst.msk [vmem:[%s4754_s1 + $0x28] sm:$0xff] %vm398_vm10, %v4264_v9   ;;  %v1731_v9 = vsel %vm91_vm0, %v2487_v6, %v2486_v4  ;;  %v641_v11 = vpop.permute.xlu0 %640   ;;  %v2491_v14 = vld [vmem:[%s4753_s0 + $0x1b5] sm:$0x20]  }
  0xa7   :  { %v2554_v2 = vld [vmem:[%s4753_s0 + $0xd3] sm:$0x40]   ;;  %v1991_v8 = vsel %vm107_vm4, %v2553_v0, %v1987_v58  ;;  %2192 = vst.msk [vmem:[%s4754_s1 + $0x30] sm:$0xff] %vm398_vm10, %v571_v48   ;;  %v1735_v13 = vsel %vm95_vm1, %v2488_v7, %v1731_v9  ;;  %v2492_v16 = vld [vmem:[%s4753_s0 + $0x1d4] sm:$0x40]  }
  0xa8   :  { %v2555_v3 = vld [vmem:[%s4753_s0 + $0xf2] sm:$0x80]   ;;  %v1995_v12 = vsel %vm111_vm5, %v2554_v2, %v1991_v8  ;;  %2183 = vst.msk [vmem:[%s4754_s1 + $0x10] sm:$0xff] %vm398_vm10, %v536_v53   ;;  %v1739_v18 = vsel %vm99_vm2, %v2489_v10, %v1735_v13  ;;  %v2493_v19 = vld [vmem:[%s4753_s0 + $0x1f3] sm:$0x80]   ;;  %v815_v23 = vpop.permute.xlu2 %814  }
  0xa9   :  { %v1999_v31 = vsel %vm115_vm6, %v2555_v3, %v1995_v12  ;;  %v2512_v17 = vld [vmem:[%s4753_s0 + $0x9] sm:$0x1]   ;;  %v1743_v20 = vsel %vm103_vm3, %v2490_v43, %v1739_v18  ;;  %2201 = vst.msk [vmem:[%s4754_s1 + $0x18] sm:$0xff] %vm398_vm10, %v4359_v37   ;;  %v2539_v37 = vld [vmem:[%s4753_s0 + $0x111] sm:$0x1]  }
  0xaa   :  { %2000 = vrot.lane.b32.xlu0 %v1999_v31, %s2579_s3  ;;  %v2513_v21 = vld [vmem:[%s4753_s0 + $0x28] sm:$0x2]   ;;  %v1747_v24 = vsel %vm107_vm4, %v2491_v14, %v1743_v20  ;;  %678 = vst.msk [vmem:[%s4754_s1] sm:$0xff] %vm677_vm11, %v676_v5   ;;  %v2540_v39 = vld [vmem:[%s4753_s0 + $0x130] sm:$0x2]  }
  0xab   :  { %v2514_v22 = vld [vmem:[%s4753_s0 + $0x47] sm:$0x4]   ;;  %v1835_v25 = vsel %vm91_vm0, %v2513_v21, %v2512_v17  ;;  %v1751_v29 = vsel %vm111_vm5, %v2492_v16, %v1747_v24  ;;  %2210 = vst.msk [vmem:[%s4754_s1 + $0x38] sm:$0xff] %vm398_vm10, %v641_v11   ;;  %v2541_v40 = vld [vmem:[%s4753_s0 + $0x14f] sm:$0x4]   ;;  %v1940_v44 = vsel %vm91_vm0, %v2540_v39, %v2539_v37 }
  0xac   :  { %v2515_v26 = vld [vmem:[%s4753_s0 + $0x66] sm:$0x8]   ;;  %v1839_v30 = vsel %vm95_vm1, %v2514_v22, %v1835_v25  ;;  %v1755_v33 = vsel %vm115_vm6, %v2493_v19, %v1751_v29  ;;  %2227 = vst.msk [vmem:[%s4754_s1 + $0x20] sm:$0xff] %vm677_vm11, %v710_v60   ;;  %v780_v36 = vpop.permute.xlu1 %779   ;;  %v2542_v45 = vld [vmem:[%s4753_s0 + $0x16e] sm:$0x8]   ;;  %v1944_v49 = vsel %vm95_vm1, %v2541_v40, %v1940_v44 }
  0xad   :  { %v2516_v27 = vld [vmem:[%s4753_s0 + $0x85] sm:$0x10]   ;;  %v1843_v34 = vsel %vm99_vm2, %v2515_v26, %v1839_v30  ;;  %1756 = vrot.lane.b32.xlu2 %v1755_v33, %s2578_s4  ;;  %2245 = vst.msk [vmem:[%s4754_s1 + $0x28] sm:$0xff] %vm677_vm11, %v780_v36   ;;  %v2543_v46 = vld [vmem:[%s4753_s0 + $0x18d] sm:$0x10]   ;;  %v1948_v50 = vsel %vm99_vm2, %v2542_v45, %v1944_v49 }
  0xae   :  { %v2517_v32 = vld [vmem:[%s4753_s0 + $0xa4] sm:$0x20]   ;;  %v1847_v38 = vsel %vm103_vm3, %v2516_v27, %v1843_v34  ;;  %v745_v42 = vpop.permute.xlu0 %744   ;;  %2254 = vst.msk [vmem:[%s4754_s1 + $0x10] sm:$0xff] %vm677_vm11, %v815_v23   ;;  %v1952_v51 = vsel %vm103_vm3, %v2543_v46, %v1948_v50  ;;  %v2544_v52 = vld [vmem:[%s4753_s0 + $0x1ac] sm:$0x20]  }
  0xaf   :  { %v2518_v35 = vld [vmem:[%s4753_s0 + $0xc3] sm:$0x40]   ;;  %v1851_v41 = vsel %vm107_vm4, %v2517_v32, %v1847_v38  ;;  %2236 = vst.msk [vmem:[%s4754_s1 + $0x8] sm:$0xff] %vm677_vm11, %v745_v42   ;;  %v1956_v55 = vsel %vm107_vm4, %v2544_v52, %v1952_v51  ;;  %v2545_v56 = vld [vmem:[%s4753_s0 + $0x1cb] sm:$0x40]  }
  0xb0   :  { %v1855_v47 = vsel %vm111_vm5, %v2518_v35, %v1851_v41  ;;  %v2519_v48 = vld [vmem:[%s4753_s0 + $0xe2] sm:$0x80]   ;;  %v920_v53 = vpop.permute.xlu2 %919   ;;  %v1960_v59 = vsel %vm111_vm5, %v2545_v56, %v1956_v55  ;;  %v2546_v60 = vld [vmem:[%s4753_s0 + $0x1ea] sm:$0x80]  }
  0xb1   :  { %v1859_v54 = vsel %vm115_vm6, %v2519_v48, %v1855_v47  ;;  %2281 = vst.msk [vmem:[%s4754_s1 + $0x38] sm:$0xff] %vm677_vm11, %v920_v53   ;;  %v1964_v62 = vsel %vm115_vm6, %v2546_v60, %v1960_v59 }
  0xb4   :  { %v885_v57 = vpop.permute.xlu1 %884  }
  0xb5   :  { %1860 = vrot.lane.b32.xlu2 %v1859_v54, %s2579_s3  ;;  %2272 = vst.msk [vmem:[%s4754_s1 + $0x18] sm:$0xff] %vm677_vm11, %v885_v57  }
  0xb6   :  { %v850_v28 = vpop.permute.xlu0 %849  }
  0xb7   :  { %2263 = vst.msk [vmem:[%s4754_s1 + $0x30] sm:$0xff] %vm677_vm11, %v850_v28  }
  0xb8   :  { %v1024_v61 = vpop.permute.xlu2 %1023  }
  0xb9   :  { %2307 = vst.msk [vmem:[%s4754_s1 + $0x8] sm:$0xff] %vm956_vm12, %v1024_v61  }
  0xbc   :  { %v989_v63 = vpop.permute.xlu1 %988  }
  0xbd   :  { %1965 = vrot.lane.b32.xlu2 %v1964_v62, %s2579_s3  ;;  %2298 = vst.msk [vmem:[%s4754_s1 + $0x20] sm:$0xff] %vm956_vm12, %v989_v63  }
  0xbe   :  { %v955_v15 = vpop.permute.xlu0 %954  }
  0xbf   :  { %957 = vst.msk [vmem:[%s4754_s1] sm:$0xff] %vm956_vm12, %v955_v15  }
  0xc0   :  { %v1129_v0 = vpop.permute.xlu2 %1128  }
  0xc1   :  { %2334 = vst.msk [vmem:[%s4754_s1 + $0x30] sm:$0xff] %vm956_vm12, %v1129_v0  }
  0xc4   :  { %v1094_v2 = vpop.permute.xlu1 %1093  }
  0xc5   :  { %2325 = vst.msk [vmem:[%s4754_s1 + $0x10] sm:$0xff] %vm956_vm12, %v1094_v2  }
  0xc6   :  { %v1059_v1 = vpop.permute.xlu0 %1058  }
  0xc7   :  { %2316 = vst.msk [vmem:[%s4754_s1 + $0x28] sm:$0xff] %vm956_vm12, %v1059_v1  }
  0xc8   :  { %v1234_v3 = vpop.permute.xlu2 %1233  }
  0xc9   :  { %1236 = vst.msk [vmem:[%s4754_s1] sm:$0xff] %vm1235_vm13, %v1234_v3  }
  0xcc   :  { %v1199_v4 = vpop.permute.xlu1 %1198  }
  0xcd   :  { %2352 = vst.msk [vmem:[%s4754_s1 + $0x38] sm:$0xff] %vm956_vm12, %v1199_v4  }
  0xce   :  { %v1164_v5 = vpop.permute.xlu0 %1163  }
  0xcf   :  { %2343 = vst.msk [vmem:[%s4754_s1 + $0x18] sm:$0xff] %vm956_vm12, %v1164_v5  }
  0xd0   :  { %v1338_v58 = vpop.permute.xlu2 %1337  }
  0xd1   :  { %2387 = vst.msk [vmem:[%s4754_s1 + $0x28] sm:$0xff] %vm1235_vm13, %v1338_v58  }
  0xd4   :  { %v1303_v6 = vpop.permute.xlu1 %1302  }
  0xd5   :  { %2378 = vst.msk [vmem:[%s4754_s1 + $0x8] sm:$0xff] %vm1235_vm13, %v1303_v6  }
  0xd6   :  { %v1268_v7 = vpop.permute.xlu0 %1267  }
  0xd7   :  { %2369 = vst.msk [vmem:[%s4754_s1 + $0x20] sm:$0xff] %vm1235_vm13, %v1268_v7  }
  0xd8   :  { %v1443_v8 = vpop.permute.xlu2 %1442  }
  0xd9   :  { %2414 = vst.msk [vmem:[%s4754_s1 + $0x18] sm:$0xff] %vm1235_vm13, %v1443_v8  }
  0xdc   :  { %v1408_v9 = vpop.permute.xlu1 %1407  }
  0xdd   :  { %2405 = vst.msk [vmem:[%s4754_s1 + $0x30] sm:$0xff] %vm1235_vm13, %v1408_v9  }
  0xde   :  { %v1373_v10 = vpop.permute.xlu0 %1372  }
  0xdf   :  { %2396 = vst.msk [vmem:[%s4754_s1 + $0x10] sm:$0xff] %vm1235_vm13, %v1373_v10  }
  0xe0   :  { %v1547_v43 = vpop.permute.xlu2 %1546  }
  0xe1   :  { %2440 = vst.msk [vmem:[%s4754_s1 + $0x20] sm:$0xff] %vm1514_vm14, %v1547_v43  }
  0xe4   :  { %v1513_v11 = vpop.permute.xlu1 %1512  }
  0xe5   :  { %1515 = vst.msk [vmem:[%s4754_s1] sm:$0xff] %vm1514_vm14, %v1513_v11  }
  0xe6   :  { %v1478_v12 = vpop.permute.xlu0 %1477  }
  0xe7   :  { %2423 = vst.msk [vmem:[%s4754_s1 + $0x38] sm:$0xff] %vm1235_vm13, %v1478_v12  }
  0xec   :  { %v1617_v13 = vpop.permute.xlu1 %1616  }
  0xed   :  { %2458 = vst.msk [vmem:[%s4754_s1 + $0x28] sm:$0xff] %vm1514_vm14, %v1617_v13  }
  0xee   :  { %v1582_v14 = vpop.permute.xlu0 %1581  }
  0xef   :  { %2449 = vst.msk [vmem:[%s4754_s1 + $0x8] sm:$0xff] %vm1514_vm14, %v1582_v14  }
  0xf4   :  { %v1722_v16 = vpop.permute.xlu1 %1721   ;;  %v1652_v31 = vpop.permute.xlu2 %1651  }
  0xf5   :  { %2485 = vst.msk [vmem:[%s4754_s1 + $0x18] sm:$0xff] %vm1514_vm14, %v1722_v16  }
  0xf6   :  { %2467 = vst.msk [vmem:[%s4754_s1 + $0x10] sm:$0xff] %vm1514_vm14, %v1652_v31   ;;  %v1687_v18 = vpop.permute.xlu0 %1686  }
  0xf7   :  { %2476 = vst.msk [vmem:[%s4754_s1 + $0x30] sm:$0xff] %vm1514_vm14, %v1687_v18  }
  0xfc   :  { %v1826_v19 = vpop.permute.xlu1 %1825  }
  0xfd   :  { %2511 = vst.msk [vmem:[%s4754_s1 + $0x20] sm:$0xff] %vm1793_vm15, %v1826_v19  }
  0xfe   :  { %v1792_v17 = vpop.permute.xlu0 %1791  }
  0xff   :  { %1794 = vst.msk [vmem:[%s4754_s1] sm:$0xff] %vm1793_vm15, %v1792_v17  }
 0x104   :  { %v1931_v20 = vpop.permute.xlu1 %1930  }
 0x105   :  { %2538 = vst.msk [vmem:[%s4754_s1 + $0x10] sm:$0xff] %vm1793_vm15, %v1931_v20  }
 0x106   :  { %v1896_v21 = vpop.permute.xlu0 %1895  }
 0x107   :  { %v1757_v22 = vpop.permute.xlu2 %1756   ;;  %2529 = vst.msk [vmem:[%s4754_s1 + $0x28] sm:$0xff] %vm1793_vm15, %v1896_v21  }
 0x108   :  { %2494 = vst.msk [vmem:[%s4754_s1 + $0x38] sm:$0xff] %vm1514_vm14, %v1757_v22  }
 0x10f   :  { %v1861_v23 = vpop.permute.xlu2 %1860  }
 0x110   :  { %2520 = vst.msk [vmem:[%s4754_s1 + $0x8] sm:$0xff] %vm1793_vm15, %v1861_v23  }
 0x114   :  { %v2036_v24 = vpop.permute.xlu1 %2035  }
 0x115   :  { %2565 = vst.msk [vmem:[%s4754_s1 + $0x38] sm:$0xff] %vm1793_vm15, %v2036_v24  }
 0x117   :  { %v1966_v25 = vpop.permute.xlu2 %1965  }
 0x118   :  { %2547 = vst.msk [vmem:[%s4754_s1 + $0x30] sm:$0xff] %vm1793_vm15, %v1966_v25  }
 0x11c   :  { %v2001_v26 = vpop.permute.xlu0 %2000  }
 0x11d   :  { %2556 = vst.msk [vmem:[%s4754_s1 + $0x18] sm:$0xff] %vm1793_vm15, %v2001_v26  }

// kernel: capsgnn_forward.1
= control target key start
LH: loop header
LB: loop body
LE: loop exit
PB: predicated region body
PF: predicated region fallthrough
CT: control target
= control target key end

     0   :  { %vm73_vm0 = vcmask 130048   ;;  %v3777_v7 = vmov 16   ;;  %vm115_vm1 = vcmask 261120   ;;  %s5377_s2 = inlined_call_operand.vmem [shape: f32[2,16,16], index: 2, kind: input, shape index: {}]   ;;  %s5378_s0 = inlined_call_operand.vmem [shape: f32[1,40,128], index: 0, kind: input, shape index: {}]   ;;  %s5379_s1 = inlined_call_operand.vmem [shape: f32[1,32,32], index: 1, kind: input, shape index: {}]   ;;  %s5380_s6 = inlined_call_operand.vmem [shape: f32[80,512], index: 6, kind: input, shape index: {}]   ;;  %s5381_s3 = inlined_call_operand.vmem [shape: bf16[512,128], index: 3, kind: input, shape index: {}]   ;;  %s5382_s7 = inlined_call_operand.vmem [shape: f32[8,128], index: 7, kind: input, shape index: {}]   ;;  %s5383_s8 = inlined_call_operand.vmem [shape: f32[128,8], index: 8, kind: input, shape index: {}]   ;;  %s5384_s13 = inlined_call_operand.vmem [shape: f32[2,64], index: 13, kind: input, shape index: {}]   ;;  %s5385_s14 = inlined_call_operand.vmem [shape: f32[64,2], index: 14, kind: input, shape index: {}]   ;;  %s5386_s4 = inlined_call_operand.vmem [shape: bf16[128,64], index: 4, kind: input, shape index: {}]   ;;  %s5387_s16 = inlined_call_operand.vmem [shape: f32[16,2], index: 16, kind: input, shape index: {}]   ;;  %s5388_s10 = inlined_call_operand.vmem [shape: f32[4,64], index: 10, kind: input, shape index: {}]   ;;  %s5389_s9 = inlined_call_operand.vmem [shape: f32[16,128], index: 9, kind: input, shape index: {}]   ;;  %s5390_s11 = inlined_call_operand.vmem [shape: f32[64,4], index: 11, kind: input, shape index: {}]   ;;  %s5391_s15 = inlined_call_operand.vmem [shape: f32[2,16], index: 15, kind: input, shape index: {}]   ;;  %s5392_s12 = inlined_call_operand.vmem [shape: f32[64,16], index: 12, kind: input, shape index: {}]   ;;  %s5393_s5 = inlined_call_operand.vmem [shape: f32[64,16], index: 5, kind: input, shape index: {}]   ;;  %s5394_s17 = inlined_call_operand.vmem [shape: f32[32,2], index: 17, kind: input, shape index: {}]   ;;  %s5395_s18 = inlined_call_operand.vmem [shape: f32[2,32], index: 18, kind: input, shape index: {}]   ;;  %s5396_s19 = inlined_call_operand.vmem [shape: f32[1,8,128], index: 19, kind: output, shape index: {}]  }
   0x1   :  { %5401 = sst [smem:[#allocation2_spill]] %s5377_s2  ;;  %3597 = vset.pattern.permute.xlu0 %v3777_v7  ;;  %3598 = vset.pattern.permute.xlu1 %v3777_v7 }
   0x2   :  { %5402 = sst [smem:[#allocation3_spill]] %s5378_s0 }
   0x3   :  { %5403 = sst [smem:[#allocation4_spill]] %s5379_s1 }
   0x4   :  { %5404 = sst [smem:[#allocation5_spill]] %s5380_s6 }
   0x5   :  { %s5405_s20 = sld [smem:[#allocation2_spill]] }
   0x6   :  { %s5406_s23 = sld [smem:[#allocation3_spill]] }
   0x7   :  { %s5407_s30 = sld [smem:[#allocation4_spill]] }
   0x8   :  { %s5408_s29 = sld [smem:[#allocation5_spill]] }
   0xb   :  { %v72_v0 = vld [vmem:[%s5405_s20 + $0x8] sm:$0xff]  ;;  %v71_v1 = vld [vmem:[%s5405_s20] sm:$0xff]  ;;  %v3234_v35 = vld [vmem:[%s5405_s20 + $0x18] sm:$0xff] }
   0xc   :  { %100 = vmatpush.msra.mxu0 %v72_v0  ;;  %v62_v2 = vld [vmem:[%s5406_s23] sm:$0xff]  ;;  %v63_v3 = vld [vmem:[%s5406_s23 + $0x8] sm:$0xff]  ;;  %v64_v4 = vld [vmem:[%s5406_s23 + $0x10] sm:$0xff]  ;;  %338 = vmatpush.msra.mxu2 %v3234_v35 }
   0xd   :  { %v65_v5 = vld [vmem:[%s5406_s23 + $0x18] sm:$0xff]  ;;  %158 = vperm.xlu0 %3597, %v62_v2   ;;  %166 = vperm.xlu1 %3598, %v64_v4   ;;  %v3907_v11 = vld [vmem:[%s5407_s30] sm:$0xff]  ;;  %v3914_v12 = vld [vmem:[%s5407_s30 + $0x8] sm:$0xff] }
   0xe   :  { %101 = vmatpush.msra.mxu0 %v71_v1  ;;  %v3921_v13 = vld [vmem:[%s5407_s30 + $0x10] sm:$0xff]  ;;  %v3928_v14 = vld [vmem:[%s5407_s30 + $0x18] sm:$0xff]  ;;  %v522_v36 = vld [vmem:[%s5408_s29 + $0x20] sm:$0xff] }
   0xf   :  { %3225 = vmatmul.msk.f32.vlgmr.msra.gmra.mxu0 %vm73_vm0, %v62_v2  ;;  %v524_v37 = vld [vmem:[%s5408_s29 + $0x30] sm:$0xff]  ;;  %v518_v39 = vld [vmem:[%s5408_s29] sm:$0xff] }
  0x10   :  { %584 = vmatpush.msrb.mxu0 %v522_v36  ;;  %v3233_v38 = vld [vmem:[%s5405_s20 + $0x10] sm:$0xff] }
  0x11   :  { %v520_v40 = vld [vmem:[%s5408_s29 + $0x10] sm:$0xff]  ;;  %339 = vmatpush.msra.mxu2 %v3233_v38 }
  0x12   :  { %585 = vmatpush.msrb.mxu0 %v518_v39 }
  0x15   :  { %162 = vperm.xlu0 %3597, %v63_v3   ;;  %170 = vperm.xlu1 %3598, %v65_v5  }
  0x17   :  { %3226 = vmatmul.msk.f32.gmra.mxu0 %vm73_vm0, %v63_v3  ;;  %v523_v3 = vld [vmem:[%s5408_s29 + $0x28] sm:$0xff] }
  0x18   :  { %625 = vmatpush.msrb.mxu2 %v523_v3 }
  0x1f   :  { %3227 = vmatmul.msk.f32.gmra.mxu0 %vm73_vm0, %v64_v4  ;;  %v519_v4 = vld [vmem:[%s5408_s29 + $0x8] sm:$0xff] }
  0x20   :  { %626 = vmatpush.msrb.mxu2 %v519_v4 }
  0x27   :  { %3228 = vmatmul.msk.f32.gmra.mxu0 %vm73_vm0, %v65_v5 }
  0x7f   :  { %v3932_v15 = vpop.permute.xlu0 %158  ;;  %v3948_v25 = vpop.permute.xlu1 %166 }
  0x87   :  { %v3940_v20 = vpop.permute.xlu0 %162  ;;  %v3956_v30 = vpop.permute.xlu1 %170 }
  0x8c   :  { %v103_v6 = vpop.f32.mrf.mxu0 }
  0x94   :  { %v106_v8 = vpop.f32.mrf.mxu0 }
  0x9c   :  { %v109_v9 = vpop.f32.mrf.mxu0 }
  0xa4   :  { %v112_v10 = vpop.f32.mrf.mxu0 }
  0xa5   :  { %140 = vmatpush.msra.mxu1 %v112_v10 }
  0xa7   :  { %141 = vmatpush.msra.mxu1 %v109_v9 }
  0xa9   :  { %142 = vmatpush.msra.mxu1 %v106_v8 }
  0xab   :  { %143 = vmatpush.msra.mxu1 %v103_v6 }
  0xac   :  { %3229 = vmatmul.msk.f32.vlgmr.msra.gmra.mxu1 %vm115_vm1, %v3907_v11 }
  0xad   :  { %666 = vmatpush.msrb.mxu1 %v524_v37 }
  0xaf   :  { %667 = vmatpush.msrb.mxu1 %v520_v40 }
  0xb4   :  { %3230 = vmatmul.msk.f32.gmra.mxu1 %vm115_vm1, %v3914_v12 }
  0xbc   :  { %3231 = vmatmul.msk.f32.gmra.mxu1 %vm115_vm1, %v3921_v13 }
  0xc4   :  { %3232 = vmatmul.msk.f32.gmra.mxu1 %vm115_vm1, %v3928_v14 }
 0x129   :  { %v145_v16 = vpop.f32.mrf.mxu1 }
 0x12a   :  { %v3935_v17 = vmul.f32 %v3932_v15, %v145_v16 }
 0x12c   :  { %v177_v18 = vmul.f32 %v3935_v17, %v3935_v17 }
 0x12e   :  { %v181_v19 = vsel %vm73_vm0, %v177_v18, 0.0 }
 0x12f   :  { %182 = vadd.xlane.f32.xlu2 %v181_v19 }
 0x131   :  { %v148_v21 = vpop.f32.mrf.mxu1 }
 0x132   :  { %v3943_v22 = vmul.f32 %v3940_v20, %v148_v21 }
 0x134   :  { %v178_v23 = vmul.f32 %v3943_v22, %v3943_v22 }
 0x136   :  { %v184_v24 = vsel %vm73_vm0, %v178_v23, 0.0 }
 0x137   :  { %185 = vadd.xlane.f32.xlu2 %v184_v24 }
 0x139   :  { %v151_v26 = vpop.f32.mrf.mxu1 }
 0x13a   :  { %v3951_v27 = vmul.f32 %v3948_v25, %v151_v26 }
 0x13c   :  { %v179_v28 = vmul.f32 %v3951_v27, %v3951_v27 }
 0x13e   :  { %v187_v29 = vsel %vm73_vm0, %v179_v28, 0.0 }
 0x13f   :  { %188 = vadd.xlane.f32.xlu0 %v187_v29 }
 0x141   :  { %v154_v31 = vpop.f32.mrf.mxu1 }
 0x142   :  { %v3959_v32 = vmul.f32 %v3956_v30, %v154_v31 }
 0x144   :  { %v180_v33 = vmul.f32 %v3959_v32, %v3959_v32 }
 0x146   :  { %v190_v34 = vsel %vm73_vm0, %v180_v33, 0.0 }
 0x147   :  { %191 = vadd.xlane.f32.xlu1 %v190_v34 }
 0x1a2   :  { %v183_v41 = vpop.xlane.xlu2 %182 }
 0x1a3   :  { %v197_v42 = vadd.f32 1e-07, %v183_v41  ;;  %v245_v43 = vadd.f32 1.0, %v183_v41  ;;  %v193_v5 = vmul.f32 %v183_v41, %v3935_v17 }
 0x1a5   :  { %3599 = vrsqrt.f32 %v197_v42  ;;  %vm254_vm4 = vweird.f32 %v245_v43  ;;  %v260_v56 = vand.u32 2147483648, %v245_v43  ;;  %v258_v60 = vand.u32 2147483647, %v245_v43 }
 0x1a6   :  { %3601 = vrcp.f32 %v245_v43  ;;  %vm207_vm5 = vweird.f32 %v197_v42 }
 0x1a7   :  { %v261_v9 = vor.u32 1.1754944e-38, %v260_v56  ;;  %vm259_vm8 = vcmp.eq.f32.partialorder %v258_v60, 8.507059e+37 }
 0x1aa   :  { %v3982_v44 = vpop.xlane.xlu2 %185 }
 0x1ab   :  { %v3600_v45 = vpop.eup %3599  ;;  %v3985_v46 = vadd.f32 1e-07, %v3982_v44  ;;  %v3988_v47 = vadd.f32 1.0, %v3982_v44  ;;  %v194_v40 = vmul.f32 %v3982_v44, %v3943_v22 }
 0x1ac   :  { %v3602_v48 = vpop.eup %3601  ;;  %v202_v49 = vmul.f32 %v3600_v45, %v197_v42  ;;  %vm208_vm3 = vweird.f32 %v3600_v45 }
 0x1ad   :  { %v250_v50 = vmul.f32 %v3602_v48, %v245_v43  ;;  %3603 = vrsqrt.f32 %v3985_v46  ;;  %vm255_vm2 = vweird.f32 %v3602_v48  ;;  %vm209_vm7 = vmor %vm207_vm5, %vm208_vm3  ;;  %vm269_vm11 = vweird.f32 %v3988_v47 }
 0x1ae   :  { %v203_v51 = vmul.f32 %v3600_v45, %v202_v49  ;;  %3605 = vrcp.f32 %v3988_v47  ;;  %vm4000_vm6 = vmor %vm254_vm4, %vm255_vm2  ;;  %v275_v26 = vand.u32 2147483648, %v3988_v47  ;;  %v273_v33 = vand.u32 2147483647, %v3988_v47 }
 0x1af   :  { %v251_v52 = vsub.f32 1.0, %v250_v50  ;;  %vm217_vm12 = vweird.f32 %v3985_v46 }
 0x1b0   :  { %v204_v53 = vmul.f32 0.5, %v203_v51  ;;  %v276_v43 = vor.u32 1.1754944e-38, %v275_v26  ;;  %vm274_vm15 = vcmp.eq.f32.partialorder %v273_v33, 8.507059e+37  ;;  %v525_v33 = vld [vmem:[%s5408_s29 + $0x38] sm:$0xff] }
 0x1b1   :  { %v252_v54 = vmul.f32 %v3602_v48, %v251_v52 }
 0x1b2   :  { %v205_v55 = vsub.f32 1.5, %v204_v53  ;;  %v3992_v57 = vpop.xlane.xlu0 %188 }
 0x1b3   :  { %v3604_v58 = vpop.eup %3603  ;;  %v253_v59 = vadd.f32 %v3602_v48, %v252_v54  ;;  %v3995_v61 = vadd.f32 1e-07, %v3992_v57  ;;  %v3998_v62 = vadd.f32 1.0, %v3992_v57  ;;  %v195_v60 = vmul.f32 %v3992_v57, %v3951_v27 }
 0x1b4   :  { %v3606_v63 = vpop.eup %3605  ;;  %v206_v0 = vmul.f32 %v3600_v45, %v205_v55  ;;  %v212_v2 = vmul.f32 %v3604_v58, %v3985_v46  ;;  %vm218_vm10 = vweird.f32 %v3604_v58 }
 0x1b5   :  { %v257_v6 = vsel %vm4000_vm6, %v3602_v48, %v253_v59  ;;  %v265_v7 = vmul.f32 %v3606_v63, %v3988_v47  ;;  %3607 = vrsqrt.f32 %v3995_v61  ;;  %vm270_vm9 = vweird.f32 %v3606_v63  ;;  %vm219_vm14 = vmor %vm217_vm12, %vm218_vm10 }
 0x1b6   :  { %v210_v8 = vsel %vm209_vm7, %v3600_v45, %v206_v0  ;;  %v213_v10 = vmul.f32 %v3604_v58, %v212_v2  ;;  %3609 = vrcp.f32 %v3998_v62  ;;  %v262_v17 = vsel %vm259_vm8, %v261_v9, %v257_v6  ;;  %vm4037_vm13 = vmor %vm269_vm11, %vm270_vm9 }
 0x1b7   :  { %v241_v16 = vmul.f32 %v210_v8, %v193_v5  ;;  %v266_v18 = vsub.f32 1.0, %v265_v7  ;;  %v290_v44 = vand.u32 2147483648, %v3998_v62  ;;  %vm227_vm4 = vweird.f32 %v3995_v61 }
 0x1b8   :  { %v214_v19 = vmul.f32 0.5, %v213_v10  ;;  %v288_v54 = vand.u32 2147483647, %v3998_v62  ;;  %vm284_vm6 = vweird.f32 %v3998_v62 }
 0x1b9   :  { %v4018_v21 = vmul.f32 %v262_v17, %v241_v16  ;;  %v267_v23 = vmul.f32 %v3606_v63, %v266_v18 }
 0x1ba   :  { %v215_v24 = vsub.f32 1.5, %v214_v19  ;;  %v4022_v28 = vpop.xlane.xlu1 %191  ;;  %vm289_vm8 = vcmp.eq.f32.partialorder %v288_v54, 8.507059e+37 }
 0x1bb   :  { %v3608_v29 = vpop.eup %3607  ;;  %v268_v31 = vadd.f32 %v3606_v63, %v267_v23  ;;  %v4026_v34 = vadd.f32 1e-07, %v4022_v28  ;;  %v4029_v35 = vadd.f32 1.0, %v4022_v28  ;;  %3235 = vmatmul.msk.f32.vlgmr.msra.gmra.mxu2 %vm73_vm0, %v4018_v21  ;;  %3243 = vmatmul.msk.f32.vlgmr.msrb.gmra.mxu0 %vm73_vm0, %v4018_v21  ;;  %v196_v16 = vmul.f32 %v4022_v28, %v3959_v32 }
 0x1bc   :  { %v216_v36 = vmul.f32 %v3604_v58, %v215_v24  ;;  %v222_v38 = vmul.f32 %v3608_v29, %v3995_v61  ;;  %3259 = vmatmul.msk.f32.vlgmr.msrb.gmra.mxu1 %vm73_vm0, %v4018_v21  ;;  %v3610_v39 = vpop.eup %3609  ;;  %vm228_vm2 = vweird.f32 %v3608_v29  ;;  %v291_v61 = vor.u32 1.1754944e-38, %v290_v44  ;;  %v3566_v44 = vld [vmem:[%s5381_s3 + $0x70] sm:$0xff] }
 0x1bd   :  { %v272_v41 = vsel %vm4037_vm13, %v3606_v63, %v268_v31  ;;  %3611 = vrsqrt.f32 %v4026_v34  ;;  %v280_v46 = vmul.f32 %v3610_v39, %v3998_v62  ;;  %vm285_vm3 = vweird.f32 %v3610_v39  ;;  %vm229_vm5 = vmor %vm227_vm4, %vm228_vm2 }
 0x1be   :  { %v220_v42 = vsel %vm219_vm14, %v3604_v58, %v216_v36  ;;  %v223_v45 = vmul.f32 %v3608_v29, %v222_v38  ;;  %3613 = vrcp.f32 %v4029_v35  ;;  %v277_v48 = vsel %vm274_vm15, %v276_v43, %v272_v41  ;;  %vm286_vm7 = vmor %vm284_vm6, %vm285_vm3 }
 0x1bf   :  { %v242_v47 = vmul.f32 %v220_v42, %v194_v40  ;;  %v281_v50 = vsub.f32 1.0, %v280_v46  ;;  %v305_v9 = vand.u32 2147483648, %v4029_v35  ;;  %vm237_vm11 = vweird.f32 %v4026_v34 }
 0x1c0   :  { %v224_v49 = vmul.f32 0.5, %v223_v45  ;;  %v303_v27 = vand.u32 2147483647, %v4029_v35  ;;  %vm299_vm13 = vweird.f32 %v4029_v35 }
 0x1c1   :  { %v4052_v22 = vmul.f32 %v277_v48, %v242_v47  ;;  %v282_v52 = vmul.f32 %v3610_v39, %v281_v50  ;;  %v306_v19 = vor.u32 1.1754944e-38, %v305_v9  ;;  %v3559_v47 = vld [vmem:[%s5381_s3 + $0x38] sm:$0xff] }
 0x1c2   :  { %v225_v51 = vsub.f32 1.5, %v224_v49  ;;  %vm304_vm15 = vcmp.eq.f32.partialorder %v303_v27, 8.507059e+37  ;;  %v3567_v48 = vld [vmem:[%s5381_s3 + $0x78] sm:$0xff]  ;;  %1038 = vmatpush.bf16.msra.mxu0 %v3559_v47  ;;  %v3577_v47 = vld [vmem:[%s5381_s3 + $0xc8] sm:$0xff] }
 0x1c3   :  { %v3612_v53 = vpop.eup %3611  ;;  %3236 = vmatmul.msk.f32.gmra.mxu2 %vm73_vm0, %v4052_v22  ;;  %3244 = vmatmul.msk.f32.gmra.mxu0 %vm73_vm0, %v4052_v22  ;;  %v283_v56 = vadd.f32 %v3610_v39, %v282_v52  ;;  %v3575_v49 = vld [vmem:[%s5381_s3 + $0xb8] sm:$0xff] }
 0x1c4   :  { %v226_v55 = vmul.f32 %v3608_v29, %v225_v51  ;;  %v232_v58 = vmul.f32 %v3612_v53, %v4026_v34  ;;  %3260 = vmatmul.msk.f32.gmra.mxu1 %vm73_vm0, %v4052_v22  ;;  %v3614_v59 = vpop.eup %3613  ;;  %vm238_vm9 = vweird.f32 %v3612_v53  ;;  %v521_v34 = vld [vmem:[%s5408_s29 + $0x18] sm:$0xff]  ;;  %1067 = vmatpush.bf16.msra.mxu2 %v3567_v48  ;;  %v3574_v51 = vld [vmem:[%s5381_s3 + $0xb0] sm:$0xff] }
 0x1c5   :  { %v287_v0 = vsel %vm286_vm7, %v3610_v39, %v283_v56  ;;  %v295_v2 = vmul.f32 %v3614_v59, %v4029_v35  ;;  %vm300_vm10 = vweird.f32 %v3614_v59  ;;  %vm239_vm12 = vmor %vm237_vm11, %vm238_vm9  ;;  %v3583_v50 = vld [vmem:[%s5381_s3 + $0xf8] sm:$0xff]  ;;  %1096 = vmatpush.bf16.msra.mxu1 %v3575_v49  ;;  %v3557_v56 = vld [vmem:[%s5381_s3 + $0x28] sm:$0xff] }
 0x1c6   :  { %v230_v63 = vsel %vm229_vm5, %v3608_v29, %v226_v55  ;;  %v233_v1 = vmul.f32 %v3612_v53, %v232_v58  ;;  %v292_v4 = vsel %vm289_vm8, %v291_v61, %v287_v0  ;;  %vm301_vm14 = vmor %vm299_vm13, %vm300_vm10  ;;  %v3565_v58 = vld [vmem:[%s5381_s3 + $0x68] sm:$0xff]  ;;  %v3556_v61 = vld [vmem:[%s5381_s3 + $0x20] sm:$0xff] }
 0x1c7   :  { %v243_v3 = vmul.f32 %v230_v63, %v195_v60  ;;  %v296_v5 = vsub.f32 1.0, %v295_v2  ;;  %v3581_v60 = vld [vmem:[%s5381_s3 + $0xe8] sm:$0xff]  ;;  %v3564_v63 = vld [vmem:[%s5381_s3 + $0x60] sm:$0xff]  ;;  %v3563_v9 = vld [vmem:[%s5381_s3 + $0x58] sm:$0xff] }
 0x1c8   :  { %v234_v62 = vmul.f32 0.5, %v233_v1  ;;  %1068 = vmatpush.bf16.msra.mxu2 %v3566_v44  ;;  %v3572_v0 = vld [vmem:[%s5381_s3 + $0xa0] sm:$0xff] }
 0x1c9   :  { %v293_v6 = vmul.f32 %v292_v4, %v243_v3  ;;  %v297_v8 = vmul.f32 %v3614_v59, %v296_v5  ;;  %1097 = vmatpush.bf16.msra.mxu1 %v3574_v51  ;;  %v3580_v2 = vld [vmem:[%s5381_s3 + $0xe0] sm:$0xff] }
 0x1ca   :  { %v235_v7 = vsub.f32 1.5, %v234_v62 }
 0x1cb   :  { %3237 = vmatmul.msk.f32.gmra.mxu2 %vm73_vm0, %v293_v6  ;;  %3245 = vmatmul.msk.f32.gmra.mxu0 %vm73_vm0, %v293_v6  ;;  %v298_v10 = vadd.f32 %v3614_v59, %v297_v8  ;;  %v3555_v8 = vld [vmem:[%s5381_s3 + $0x18] sm:$0xff] }
 0x1cc   :  { %v236_v57 = vmul.f32 %v3612_v53, %v235_v7  ;;  %3261 = vmatmul.msk.f32.gmra.mxu1 %vm73_vm0, %v293_v6  ;;  %1069 = vmatpush.bf16.msra.mxu2 %v3565_v58 }
 0x1cd   :  { %v302_v17 = vsel %vm301_vm14, %v3614_v59, %v298_v10  ;;  %v3573_v59 = vld [vmem:[%s5381_s3 + $0xa8] sm:$0xff]  ;;  %v3579_v10 = vld [vmem:[%s5381_s3 + $0xd8] sm:$0xff] }
 0x1ce   :  { %v240_v18 = vsel %vm239_vm12, %v3612_v53, %v236_v57  ;;  %v307_v24 = vsel %vm304_vm15, %v306_v19, %v302_v17  ;;  %v3582_v53 = vld [vmem:[%s5381_s3 + $0xf0] sm:$0xff]  ;;  %1098 = vmatpush.bf16.msra.mxu1 %v3573_v59  ;;  %v3571_v57 = vld [vmem:[%s5381_s3 + $0x98] sm:$0xff]  ;;  %vm1180_vm15 = vcmask 64512  }
 0x1cf   :  { %v244_v23 = vmul.f32 %v240_v18, %v196_v16  ;;  %v3554_v19 = vld [vmem:[%s5381_s3 + $0x10] sm:$0xff] }
 0x1d0   :  { %1070 = vmatpush.bf16.msra.mxu2 %v3564_v63 }
 0x1d1   :  { %v308_v26 = vmul.f32 %v307_v24, %v244_v23  ;;  %v3562_v23 = vld [vmem:[%s5381_s3 + $0x50] sm:$0xff] }
 0x1d2   :  { %1099 = vmatpush.bf16.msra.mxu1 %v3572_v0  ;;  %v3570_v24 = vld [vmem:[%s5381_s3 + $0x90] sm:$0xff] }
 0x1d3   :  { %3238 = vmatmul.msk.f32.gmra.mxu2 %vm73_vm0, %v308_v26  ;;  %3246 = vmatmul.msk.f32.gmra.mxu0 %vm73_vm0, %v308_v26 }
 0x1d4   :  { %3262 = vmatmul.msk.f32.gmra.mxu1 %vm73_vm0, %v308_v26  ;;  %1071 = vmatpush.bf16.msra.mxu2 %v3563_v9 }
 0x1d6   :  { %1100 = vmatpush.bf16.msra.mxu1 %v3571_v57 }
 0x1d8   :  { %1072 = vmatpush.bf16.msra.mxu2 %v3562_v23 }
 0x1da   :  { %1101 = vmatpush.bf16.msra.mxu1 %v3570_v24  ;;  %v3778_v24 = vmov 0.0  }
 0x1db   :  { %3251 = vmatmul.msk.f32.vlgmr.msrb.gmra.mxu2 %vm73_vm0, %v4018_v21 }
 0x1e3   :  { %3252 = vmatmul.msk.f32.gmra.mxu2 %vm73_vm0, %v4052_v22 }
 0x1eb   :  { %3253 = vmatmul.msk.f32.gmra.mxu2 %vm73_vm0, %v293_v6 }
 0x1f3   :  { %3254 = vmatmul.msk.f32.gmra.mxu2 %vm73_vm0, %v308_v26 }
 0x23e   :  { %v341_v32 = vpop.f32.mrf.mxu2 }
 0x246   :  { %v344_v28 = vpop.f32.mrf.mxu2 }
 0x24e   :  { %v347_v29 = vpop.f32.mrf.mxu2 }
 0x256   :  { %v350_v31 = vpop.f32.mrf.mxu2 }
 0x257   :  { %365 = vmatpush.msra.mxu3 %v350_v31 }
 0x259   :  { %366 = vmatpush.msra.mxu3 %v347_v29  ;;  %v3578_v29 = vld [vmem:[%s5381_s3 + $0xd0] sm:$0xff] }
 0x25b   :  { %367 = vmatpush.msra.mxu3 %v344_v28 }
 0x25d   :  { %368 = vmatpush.msra.mxu3 %v341_v32 }
 0x25e   :  { %3239 = vmatmul.msk.f32.vlgmr.msra.gmra.mxu3 %vm115_vm1, %v3907_v11 }
 0x25f   :  { %707 = vmatpush.msrb.mxu3 %v525_v33 }
 0x261   :  { %708 = vmatpush.msrb.mxu3 %v521_v34  ;;  %v4350_v34 = vpop.f32.mrf.mxu0 }
 0x263   :  { %1125 = vmatpush.bf16.msra.mxu3 %v3583_v50 }
 0x266   :  { %3240 = vmatmul.msk.f32.gmra.mxu3 %vm115_vm1, %v3914_v12 }
 0x267   :  { %1126 = vmatpush.bf16.msra.mxu3 %v3582_v53 }
 0x26b   :  { %1127 = vmatpush.bf16.msra.mxu3 %v3581_v60  ;;  %v3568_v60 = vld [vmem:[%s5381_s3 + $0x80] sm:$0xff] }
 0x26e   :  { %3241 = vmatmul.msk.f32.gmra.mxu3 %vm115_vm1, %v3921_v13 }
 0x26f   :  { %1128 = vmatpush.bf16.msra.mxu3 %v3580_v2 }
 0x273   :  { %1129 = vmatpush.bf16.msra.mxu3 %v3579_v10 }
 0x276   :  { %3242 = vmatmul.msk.f32.gmra.mxu3 %vm115_vm1, %v3928_v14 }
 0x277   :  { %1130 = vmatpush.bf16.msra.mxu3 %v3578_v29 }
 0x27b   :  { %1131 = vmatpush.bf16.msra.mxu3 %v3577_v47 }
 0x27e   :  { %3267 = vmatmul.msk.f32.vlgmr.msrb.gmra.mxu3 %vm73_vm0, %v4018_v21 }
 0x286   :  { %3268 = vmatmul.msk.f32.gmra.mxu3 %vm73_vm0, %v4052_v22  ;;  %v3558_v22 = vld [vmem:[%s5381_s3 + $0x30] sm:$0xff] }
 0x287   :  { %1039 = vmatpush.bf16.msra.mxu0 %v3558_v22 }
 0x28b   :  { %1040 = vmatpush.bf16.msra.mxu0 %v3557_v56  ;;  %v3560_v56 = vld [vmem:[%s5381_s3 + $0x40] sm:$0xff] }
 0x28e   :  { %3269 = vmatmul.msk.f32.gmra.mxu3 %vm73_vm0, %v293_v6 }
 0x28f   :  { %1041 = vmatpush.bf16.msra.mxu0 %v3556_v61 }
 0x293   :  { %1042 = vmatpush.bf16.msra.mxu0 %v3555_v8 }
 0x296   :  { %3270 = vmatmul.msk.f32.gmra.mxu3 %vm73_vm0, %v308_v26 }
 0x297   :  { %1043 = vmatpush.bf16.msra.mxu0 %v3554_v19 }
 0x2e1   :  { %v370_v11 = vpop.f32.mrf.mxu3 }
 0x2e2   :  { %v4107_v35 = vmul.f32 %v370_v11, %v3932_v15 }
 0x2e4   :  { %v386_v12 = vmul.f32 %v4107_v35, %v4107_v35 }
 0x2e6   :  { %v390_v13 = vsel %vm73_vm0, %v386_v12, 0.0 }
 0x2e7   :  { %391 = vadd.xlane.f32.xlu2 %v390_v13 }
 0x2e9   :  { %v373_v14 = vpop.f32.mrf.mxu3 }
 0x2ea   :  { %v4113_v21 = vmul.f32 %v373_v14, %v3940_v20 }
 0x2ec   :  { %v387_v36 = vmul.f32 %v4113_v21, %v4113_v21 }
 0x2ee   :  { %v393_v37 = vsel %vm73_vm0, %v387_v36, 0.0 }
 0x2ef   :  { %394 = vadd.xlane.f32.xlu2 %v393_v37 }
 0x2f1   :  { %v376_v38 = vpop.f32.mrf.mxu3 }
 0x2f2   :  { %v4119_v39 = vmul.f32 %v376_v38, %v3948_v25  ;;  %v3553_v38 = vld [vmem:[%s5381_s3 + $0x8] sm:$0xff] }
 0x2f3   :  { %1044 = vmatpush.bf16.msra.mxu0 %v3553_v38 }
 0x2f4   :  { %v388_v40 = vmul.f32 %v4119_v39, %v4119_v39 }
 0x2f6   :  { %v396_v41 = vsel %vm73_vm0, %v388_v40, 0.0  ;;  %v3561_v40 = vld [vmem:[%s5381_s3 + $0x48] sm:$0xff] }
 0x2f7   :  { %397 = vadd.xlane.f32.xlu2 %v396_v41  ;;  %v3569_v41 = vld [vmem:[%s5381_s3 + $0x88] sm:$0xff]  ;;  %1073 = vmatpush.bf16.msra.mxu2 %v3561_v40  ;;  %v669_v40 = vpop.f32.mrf.mxu1 }
 0x2f8   :  { %1102 = vmatpush.bf16.msra.mxu1 %v3569_v41 }
 0x2f9   :  { %v379_v42 = vpop.f32.mrf.mxu3 }
 0x2fa   :  { %v4125_v43 = vmul.f32 %v379_v42, %v3956_v30 }
 0x2fb   :  { %1074 = vmatpush.bf16.msra.mxu2 %v3560_v56 }
 0x2fc   :  { %v389_v45 = vmul.f32 %v4125_v43, %v4125_v43  ;;  %1103 = vmatpush.bf16.msra.mxu1 %v3568_v60 }
 0x2fe   :  { %v399_v46 = vsel %vm73_vm0, %v389_v45, 0.0 }
 0x2ff   :  { %400 = vadd.xlane.f32.xlu2 %v399_v46 }
 0x301   :  { %v4367_v41 = vpop.f32.mrf.mxu3 }
 0x35a   :  { %v4151_v52 = vpop.xlane.xlu2 %391 }
 0x35b   :  { %v4157_v54 = vadd.f32 1e-07, %v4151_v52  ;;  %v4160_v55 = vadd.f32 1.0, %v4151_v52  ;;  %v402_v42 = vmul.f32 %v4151_v52, %v4107_v35 }
 0x35d   :  { %3615 = vrsqrt.f32 %v4157_v54  ;;  %vm463_vm4 = vweird.f32 %v4160_v55  ;;  %v469_v32 = vand.u32 2147483648, %v4160_v55  ;;  %v467_v11 = vand.u32 2147483647, %v4160_v55 }
 0x35e   :  { %3617 = vrcp.f32 %v4160_v55  ;;  %vm416_vm6 = vweird.f32 %v4157_v54 }
 0x35f   :  { %v470_v49 = vor.u32 1.1754944e-38, %v469_v32  ;;  %vm468_vm8 = vcmp.eq.f32.partialorder %v467_v11, 8.507059e+37  ;;  %v4352_v11 = vpop.f32.mrf.mxu2 }
 0x362   :  { %v4185_v1 = vpop.xlane.xlu2 %394 }
 0x363   :  { %v3616_v3 = vpop.eup %3615  ;;  %v4191_v4 = vadd.f32 1e-07, %v4185_v1  ;;  %v4194_v62 = vadd.f32 1.0, %v4185_v1  ;;  %v403_v9 = vmul.f32 %v4185_v1, %v4113_v21 }
 0x364   :  { %v4196_v5 = vpop.eup %3617  ;;  %v411_v6 = vmul.f32 %v3616_v3, %v4157_v54  ;;  %vm417_vm3 = vweird.f32 %v3616_v3 }
 0x365   :  { %v459_v7 = vmul.f32 %v4196_v5, %v4160_v55  ;;  %3619 = vrsqrt.f32 %v4191_v4  ;;  %vm464_vm2 = vweird.f32 %v4196_v5  ;;  %vm418_vm7 = vmor %vm416_vm6, %vm417_vm3  ;;  %v484_v54 = vand.u32 2147483648, %v4194_v62  ;;  %v3552_v55 = vld [vmem:[%s5381_s3] sm:$0xff] }
 0x366   :  { %v412_v27 = vmul.f32 %v3616_v3, %v411_v6  ;;  %3621 = vrcp.f32 %v4194_v62  ;;  %vm4238_vm5 = vmor %vm463_vm4, %vm464_vm2  ;;  %vm478_vm11 = vweird.f32 %v4194_v62  ;;  %v482_v0 = vand.u32 2147483647, %v4194_v62  ;;  %1045 = vmatpush.bf16.msra.mxu0 %v3552_v55 }
 0x367   :  { %v460_v16 = vsub.f32 1.0, %v459_v7  ;;  %vm426_vm12 = vweird.f32 %v4191_v4  ;;  %v631_v60 = vpop.f32.mrf.mxu2 }
 0x368   :  { %v413_v18 = vmul.f32 0.5, %v412_v27  ;;  %v485_v27 = vor.u32 1.1754944e-38, %v484_v54  ;;  %vm483_vm2 = vcmp.eq.f32.partialorder %v482_v0, 8.507059e+37 }
 0x369   :  { %v461_v17 = vmul.f32 %v4196_v5, %v460_v16 }
 0x36a   :  { %v414_v26 = vsub.f32 1.5, %v413_v18  ;;  %v4228_v28 = vpop.xlane.xlu2 %397 }
 0x36b   :  { %v4233_v31 = vpop.eup %3619  ;;  %v462_v33 = vadd.f32 %v4196_v5, %v461_v17  ;;  %v4244_v12 = vadd.f32 1e-07, %v4228_v28  ;;  %v4247_v13 = vadd.f32 1.0, %v4228_v28 }
 0x36c   :  { %v4249_v14 = vpop.eup %3621  ;;  %v415_v36 = vmul.f32 %v3616_v3, %v414_v26  ;;  %v421_v37 = vmul.f32 %v4233_v31, %v4191_v4  ;;  %vm427_vm10 = vweird.f32 %v4233_v31  ;;  %v1181_v26 = vsel %vm1180_vm15, 1.0, %v3778_v24 }
 0x36d   :  { %v466_v45 = vsel %vm4238_vm5, %v4196_v5, %v462_v33  ;;  %v474_v46 = vmul.f32 %v4249_v14, %v4194_v62  ;;  %3623 = vrsqrt.f32 %v4244_v12  ;;  %vm479_vm9 = vweird.f32 %v4249_v14  ;;  %v3576_v5 = vld [vmem:[%s5381_s3 + $0xc0] sm:$0xff]  ;;  %vm428_vm14 = vmor %vm426_vm12, %vm427_vm10  ;;  %1182 = vadd.xlane.f32.xlu2 %v1181_v26 }
 0x36e   :  { %v419_v48 = vsel %vm418_vm7, %v3616_v3, %v415_v36  ;;  %v422_v50 = vmul.f32 %v4233_v31, %v421_v37  ;;  %3625 = vrcp.f32 %v4247_v13  ;;  %v471_v44 = vsel %vm468_vm8, %v470_v49, %v466_v45  ;;  %vm4316_vm13 = vmor %vm478_vm11, %vm479_vm9  ;;  %1132 = vmatpush.bf16.msra.mxu3 %v3576_v5  ;;  %v713_v5 = vpop.f32.mrf.mxu3 }
 0x36f   :  { %v450_v35 = vmul.f32 %v419_v48, %v402_v42  ;;  %v475_v22 = vsub.f32 1.0, %v474_v46  ;;  %v499_v23 = vand.u32 2147483648, %v4247_v13  ;;  %vm436_vm5 = vweird.f32 %v4244_v12 }
 0x370   :  { %v423_v51 = vmul.f32 0.5, %v422_v50  ;;  %v497_v33 = vand.u32 2147483647, %v4247_v13  ;;  %vm493_vm7 = vweird.f32 %v4247_v13  ;;  %v404_v42 = vmul.f32 %v4228_v28, %v4119_v39 }
 0x371   :  { %v4277_v52 = vmul.f32 %v471_v44, %v450_v35  ;;  %v476_v53 = vmul.f32 %v4249_v14, %v475_v22  ;;  %v500_v45 = vor.u32 1.1754944e-38, %v499_v23 }
 0x372   :  { %v424_v58 = vsub.f32 1.5, %v423_v51  ;;  %v4290_v59 = vpop.xlane.xlu2 %400  ;;  %vm498_vm9 = vcmp.eq.f32.partialorder %v497_v33, 8.507059e+37 }
 0x373   :  { %v4295_v61 = vpop.eup %3623  ;;  %v477_v63 = vadd.f32 %v4249_v14, %v476_v53  ;;  %v4300_v2 = vadd.f32 1e-07, %v4290_v59  ;;  %v4303_v3 = vadd.f32 1.0, %v4290_v59  ;;  %3247 = vmatmul.msk.f32.gmra.mxu0 %vm73_vm0, %v4277_v52  ;;  %3255 = vmatmul.msk.f32.gmra.mxu2 %vm73_vm0, %v4277_v52  ;;  %v405_v56 = vmul.f32 %v4290_v59, %v4125_v43  ;;  %v531_v43 = vld [vmem:[%s5408_s29 + $0x68] sm:$0xff]  ;;  %v532_v59 = vld [vmem:[%s5408_s29 + $0x70] sm:$0xff] }
 0x374   :  { %v425_v6 = vmul.f32 %v4233_v31, %v424_v58  ;;  %v431_v7 = vmul.f32 %v4295_v61, %v4244_v12  ;;  %3263 = vmatmul.msk.f32.gmra.mxu1 %vm73_vm0, %v4277_v52  ;;  %3271 = vmatmul.msk.f32.gmra.mxu3 %vm73_vm0, %v4277_v52  ;;  %v3626_v8 = vpop.eup %3625  ;;  %vm437_vm3 = vweird.f32 %v4295_v61  ;;  %v590_v58 = vpop.f32.mrf.mxu0 }
 0x375   :  { %v481_v4 = vsel %vm4316_vm13, %v4249_v14, %v477_v63  ;;  %3627 = vrsqrt.f32 %v4300_v2  ;;  %v489_v16 = vmul.f32 %v3626_v8, %v4247_v13  ;;  %vm494_vm4 = vweird.f32 %v3626_v8  ;;  %vm4357_vm6 = vmor %vm436_vm5, %vm437_vm3 }
 0x376   :  { %v429_v57 = vsel %vm428_vm14, %v4233_v31, %v425_v6  ;;  %v432_v10 = vmul.f32 %v4295_v61, %v431_v7  ;;  %3629 = vrcp.f32 %v4303_v3  ;;  %v486_v1 = vsel %vm483_vm2, %v485_v27, %v481_v4  ;;  %vm495_vm8 = vmor %vm493_vm7, %vm494_vm4  ;;  %v530_v7 = vld [vmem:[%s5408_s29 + $0x60] sm:$0xff]  ;;  %v527_v4 = vld [vmem:[%s5408_s29 + $0x48] sm:$0xff]  ;;  %v716_v36 = vpop.f32.mrf.mxu3 }
 0x377   :  { %v451_v21 = vmul.f32 %v429_v57, %v403_v9  ;;  %v490_v17 = vsub.f32 1.0, %v489_v16  ;;  %v514_v51 = vand.u32 2147483648, %v4303_v3  ;;  %vm446_vm12 = vweird.f32 %v4300_v2  ;;  %v526_v9 = vld [vmem:[%s5408_s29 + $0x40] sm:$0xff]  ;;  %v528_v27 = vld [vmem:[%s5408_s29 + $0x50] sm:$0xff]  ;;  %v529_v16 = vld [vmem:[%s5408_s29 + $0x58] sm:$0xff] }
 0x378   :  { %v433_v18 = vmul.f32 0.5, %v432_v10  ;;  %v512_v53 = vand.u32 2147483647, %v4303_v3  ;;  %vm508_vm14 = vweird.f32 %v4303_v3  ;;  %v738_v57 = vmul.f32 %v590_v58, %v530_v7  ;;  %v548_v7 = vld [vmem:[%s5408_s29 + $0xf0] sm:$0xff] }
 0x379   :  { %v4338_v19 = vmul.f32 %v486_v1, %v451_v21  ;;  %v491_v29 = vmul.f32 %v3626_v8, %v490_v17  ;;  %v515_v0 = vor.u32 1.1754944e-38, %v514_v51  ;;  %v739_v10 = vmul.f32 %v631_v60, %v531_v43 }
 0x37a   :  { %v434_v32 = vsub.f32 1.5, %v433_v18  ;;  %vm513_vm3 = vcmp.eq.f32.partialorder %v512_v53, 8.507059e+37  ;;  %v734_v18 = vmul.f32 %v4350_v34, %v526_v9  ;;  %v735_v17 = vmul.f32 %v4352_v11, %v527_v4  ;;  %v538_v34 = vld [vmem:[%s5408_s29 + $0xa0] sm:$0xff] }
 0x37b   :  { %v3628_v31 = vpop.eup %3627  ;;  %3248 = vmatmul.msk.f32.gmra.mxu0 %vm73_vm0, %v4338_v19  ;;  %3256 = vmatmul.msk.f32.gmra.mxu2 %vm73_vm0, %v4338_v19  ;;  %v492_v12 = vadd.f32 %v3626_v8, %v491_v29  ;;  %v736_v23 = vmul.f32 %v669_v40, %v528_v27  ;;  %v737_v29 = vmul.f32 %v4367_v41, %v529_v16  ;;  %v540_v41 = vld [vmem:[%s5408_s29 + $0xb0] sm:$0xff]  ;;  %v543_v16 = vld [vmem:[%s5408_s29 + $0xc8] sm:$0xff]  ;;  %vm1237_vm4 = vcmask 523264  }
 0x37c   :  { %v435_v14 = vmul.f32 %v4295_v61, %v434_v32  ;;  %v441_v37 = vmul.f32 %v3628_v31, %v4300_v2  ;;  %3264 = vmatmul.msk.f32.gmra.mxu1 %vm73_vm0, %v4338_v19  ;;  %3272 = vmatmul.msk.f32.gmra.mxu3 %vm73_vm0, %v4338_v19  ;;  %v3630_v38 = vpop.eup %3629  ;;  %vm447_vm10 = vweird.f32 %v3628_v31  ;;  %v672_v2 = vpop.f32.mrf.mxu1 }
 0x37d   :  { %v496_v46 = vsel %vm495_vm8, %v3626_v8, %v492_v12  ;;  %v504_v48 = vmul.f32 %v3630_v38, %v4303_v3  ;;  %vm509_vm11 = vweird.f32 %v3630_v38  ;;  %vm448_vm13 = vmor %vm446_vm12, %vm447_vm10  ;;  %v533_v8 = vld [vmem:[%s5408_s29 + $0x78] sm:$0xff]  ;;  %v740_v21 = vmul.f32 %v672_v2, %v532_v59  ;;  %v593_v26 = vpop.f32.mrf.mxu0  ;;  %v634_v32 = vpop.f32.mrf.mxu2 }
 0x37e   :  { %v439_v13 = vsel %vm4357_vm6, %v4295_v61, %v435_v14  ;;  %v442_v47 = vmul.f32 %v3628_v31, %v441_v37  ;;  %v501_v50 = vsel %vm498_vm9, %v500_v45, %v496_v46  ;;  %vm510_vm2 = vmor %vm508_vm14, %vm509_vm11  ;;  %v741_v1 = vmul.f32 %v713_v5, %v533_v8  ;;  %v541_v45 = vld [vmem:[%s5408_s29 + $0xb8] sm:$0xff]  ;;  %v534_v46 = vld [vmem:[%s5408_s29 + $0x80] sm:$0xff] }
 0x37f   :  { %v452_v49 = vmul.f32 %v439_v13, %v404_v42  ;;  %v505_v22 = vsub.f32 1.0, %v504_v48  ;;  %v767_v14 = vpack.c.bf16 %v739_v10, %v735_v17  ;;  %v768_v12 = vpack.c.bf16 %v740_v21, %v736_v23  ;;  %v719_v13 = vpop.f32.mrf.mxu3  ;;  %v536_v48 = vld [vmem:[%s5408_s29 + $0x90] sm:$0xff]  ;;  %v546_v5 = vld [vmem:[%s5408_s29 + $0xe0] sm:$0xff]  ;;  %v549_v17 = vld [vmem:[%s5408_s29 + $0xf8] sm:$0xff] }
 0x380   :  { %v443_v35 = vmul.f32 0.5, %v442_v47  ;;  %v769_v37 = vpack.c.bf16 %v741_v1, %v737_v29  ;;  %v535_v47 = vld [vmem:[%s5408_s29 + $0x88] sm:$0xff]  ;;  %v4468_v10 = vld [vmem:[%s5382_s7] sm:$0xff]  ;;  %vm1359_vm12 = vcmask 1041408  }
 0x381   :  { %v4376_v44 = vmul.f32 %v501_v50, %v452_v49  ;;  %v506_v28 = vmul.f32 %v3630_v38, %v505_v22  ;;  %v743_v51 = vmul.f32 %v634_v32, %v535_v47  ;;  %v547_v1 = vld [vmem:[%s5408_s29 + $0xe8] sm:$0xff]  ;;  %1203 = vmatpush.msrb.mxu0 %v4468_v10 }
 0x382   :  { %v444_v39 = vsub.f32 1.5, %v443_v35  ;;  %v537_v35 = vld [vmem:[%s5408_s29 + $0x98] sm:$0xff] }
 0x383   :  { %3249 = vmatmul.msk.f32.gmra.mxu0 %vm73_vm0, %v4376_v44  ;;  %3257 = vmatmul.msk.f32.gmra.mxu2 %vm73_vm0, %v4376_v44  ;;  %v507_v55 = vadd.f32 %v3630_v38, %v506_v28  ;;  %v742_v28 = vmul.f32 %v593_v26, %v534_v46 }
 0x384   :  { %v445_v54 = vmul.f32 %v3628_v31, %v444_v39  ;;  %3265 = vmatmul.msk.f32.gmra.mxu1 %vm73_vm0, %v4376_v44  ;;  %3273 = vmatmul.msk.f32.gmra.mxu3 %vm73_vm0, %v4376_v44  ;;  %v675_v33 = vpop.f32.mrf.mxu1  ;;  %v749_v39 = vmul.f32 %v719_v13, %v541_v45 }
 0x385   :  { %v511_v63 = vsel %vm510_vm2, %v3630_v38, %v507_v55  ;;  %v596_v11 = vpop.f32.mrf.mxu0  ;;  %v539_v38 = vld [vmem:[%s5408_s29 + $0xa8] sm:$0xff]  ;;  %v637_v40 = vpop.f32.mrf.mxu2  ;;  %v744_v53 = vmul.f32 %v675_v33, %v536_v48 }
 0x386   :  { %v449_v61 = vsel %vm448_vm13, %v3628_v31, %v445_v54  ;;  %v516_v3 = vsel %vm513_vm3, %v515_v0, %v511_v63  ;;  %v766_v31 = vpack.c.bf16 %v738_v57, %v734_v18  ;;  %v746_v49 = vmul.f32 %v596_v11, %v538_v34  ;;  %v542_v0 = vld [vmem:[%s5408_s29 + $0xc0] sm:$0xff]  ;;  %v545_v18 = vld [vmem:[%s5408_s29 + $0xd8] sm:$0xff] }
 0x387   :  { %v453_v6 = vmul.f32 %v449_v61, %v405_v56  ;;  %v747_v50 = vmul.f32 %v637_v40, %v539_v38  ;;  %v745_v54 = vmul.f32 %v716_v36, %v537_v35  ;;  %v550_v34 = vld [vmem:[%s5408_s29 + $0x100] sm:$0xff]  ;;  %v552_v40 = vld [vmem:[%s5408_s29 + $0x110] sm:$0xff]  ;;  %v551_v35 = vld [vmem:[%s5408_s29 + $0x108] sm:$0xff]  ;;  %vm1334_vm13 = vcmask 15360  }
 0x388   :  { %v770_v55 = vpack.c.bf16 %v746_v49, %v742_v28  ;;  %v554_v38 = vld [vmem:[%s5408_s29 + $0x120] sm:$0xff]  ;;  %v553_v28 = vld [vmem:[%s5408_s29 + $0x118] sm:$0xff] }
 0x389   :  { %v4392_v62 = vmul.f32 %v516_v3, %v453_v6  ;;  %v771_v56 = vpack.c.bf16 %v747_v50, %v743_v51  ;;  %v773_v60 = vpack.c.bf16 %v749_v39, %v745_v54  ;;  %v544_v6 = vld [vmem:[%s5408_s29 + $0xd0] sm:$0xff]  ;;  %v555_v39 = vld [vmem:[%s5408_s29 + $0x128] sm:$0xff]  ;;  %v557_v51 = vld [vmem:[%s5408_s29 + $0x138] sm:$0xff] }
 0x38b   :  { %3250 = vmatmul.msk.f32.gmra.mxu0 %vm73_vm0, %v4392_v62  ;;  %3258 = vmatmul.msk.f32.gmra.mxu2 %vm73_vm0, %v4392_v62 }
 0x38c   :  { %3266 = vmatmul.msk.f32.gmra.mxu1 %vm73_vm0, %v4392_v62  ;;  %3274 = vmatmul.msk.f32.gmra.mxu3 %vm73_vm0, %v4392_v62  ;;  %v678_v42 = vpop.f32.mrf.mxu1 }
 0x38d   :  { %v748_v22 = vmul.f32 %v678_v42, %v540_v41  ;;  %v556_v42 = vld [vmem:[%s5408_s29 + $0x130] sm:$0xff] }
 0x38f   :  { %v772_v58 = vpack.c.bf16 %v748_v22, %v744_v53 }
 0x393   :  { %1046 = vmatmul.bf16.vlgmr.msra.gmra.mxu0 %v766_v31  ;;  %1075 = vmatmul.bf16.vlgmr.msra.gmra.mxu2 %v767_v14 }
 0x394   :  { %1104 = vmatmul.bf16.vlgmr.msra.gmra.mxu1 %v768_v12  ;;  %1133 = vmatmul.bf16.vlgmr.msra.gmra.mxu3 %v769_v37 }
 0x3a3   :  { %1051 = vmatmul.bf16.gmra.mxu0 %v770_v55  ;;  %1080 = vmatmul.bf16.gmra.mxu2 %v771_v56 }
 0x3a4   :  { %1109 = vmatmul.bf16.gmra.mxu1 %v772_v58  ;;  %1138 = vmatmul.bf16.gmra.mxu3 %v773_v60 }
 0x3f0   :  { %v599_v61 = vpop.f32.mrf.mxu0 }
 0x3f1   :  { %v681_v63 = vpop.f32.mrf.mxu1  ;;  %v750_v59 = vmul.f32 %v599_v61, %v542_v0 }
 0x3f2   :  { %v752_v4 = vmul.f32 %v681_v63, %v544_v6  ;;  %v1183_v63 = vpop.xlane.xlu2 %1182 }
 0x3f3   :  { %3631 = vrcp.f32 %v1183_v63 }
 0x3f6   :  { %v640_v2 = vpop.f32.mrf.mxu2 }
 0x3f7   :  { %v722_v3 = vpop.f32.mrf.mxu3  ;;  %v751_v26 = vmul.f32 %v640_v2, %v543_v16 }
 0x3f8   :  { %v602_v43 = vpop.f32.mrf.mxu0  ;;  %v753_v31 = vmul.f32 %v722_v3, %v545_v18 }
 0x3f9   :  { %v754_v8 = vmul.f32 %v602_v43, %v546_v5  ;;  %v684_v9 = vpop.f32.mrf.mxu1  ;;  %v3632_v2 = vpop.eup %3631 }
 0x3fa   :  { %v756_v27 = vmul.f32 %v684_v9, %v548_v7 }
 0x3fb   :  { %v774_v57 = vpack.c.bf16 %v754_v8, %v750_v59 }
 0x3fc   :  { %v776_v21 = vpack.c.bf16 %v756_v27, %v752_v4 }
 0x3fd   :  { %1056 = vmatmul.bf16.gmra.mxu0 %v774_v57 }
 0x3fe   :  { %1114 = vmatmul.bf16.gmra.mxu1 %v776_v21  ;;  %v643_v23 = vpop.f32.mrf.mxu2 }
 0x3ff   :  { %v755_v32 = vmul.f32 %v643_v23, %v547_v1  ;;  %v725_v29 = vpop.f32.mrf.mxu3 }
 0x400   :  { %v757_v33 = vmul.f32 %v725_v29, %v549_v17  ;;  %v605_v14 = vpop.f32.mrf.mxu0 }
 0x401   :  { %v687_v36 = vpop.f32.mrf.mxu1  ;;  %v775_v12 = vpack.c.bf16 %v755_v32, %v751_v26  ;;  %v758_v13 = vmul.f32 %v605_v14, %v550_v34 }
 0x402   :  { %v777_v37 = vpack.c.bf16 %v757_v33, %v753_v31  ;;  %v760_v48 = vmul.f32 %v687_v36, %v552_v40 }
 0x403   :  { %1085 = vmatmul.bf16.gmra.mxu2 %v775_v12 }
 0x404   :  { %1143 = vmatmul.bf16.gmra.mxu3 %v777_v37 }
 0x406   :  { %v646_v11 = vpop.f32.mrf.mxu2 }
 0x407   :  { %v728_v41 = vpop.f32.mrf.mxu3  ;;  %v759_v54 = vmul.f32 %v646_v11, %v551_v35  ;;  %v4575_v35 = vld [vmem:[%s5383_s8 + $0x60] sm:$0xff] }
 0x408   :  { %v608_v45 = vpop.f32.mrf.mxu0  ;;  %v761_v58 = vmul.f32 %v728_v41, %v553_v28  ;;  %v4582_v28 = vld [vmem:[%s5383_s8 + $0x58] sm:$0xff] }
 0x409   :  { %v762_v46 = vmul.f32 %v608_v45, %v554_v38  ;;  %v690_v47 = vpop.f32.mrf.mxu1 }
 0x40a   :  { %v764_v49 = vmul.f32 %v690_v47, %v556_v42  ;;  %v4561_v47 = vld [vmem:[%s5383_s8 + $0x70] sm:$0xff] }
 0x40b   :  { %v778_v50 = vpack.c.bf16 %v762_v46, %v758_v13  ;;  %v4556_v46 = vld [vmem:[%s5383_s8 + $0x78] sm:$0xff] }
 0x40c   :  { %v780_v22 = vpack.c.bf16 %v764_v49, %v760_v48  ;;  %1262 = vmatpush.msrb.mxu3 %v4556_v46  ;;  %1412 = vmatpush.msrb.mxu1 %v4556_v46 }
 0x40d   :  { %1061 = vmatmul.bf16.gmra.mxu0 %v778_v50  ;;  %v4568_v50 = vld [vmem:[%s5383_s8 + $0x68] sm:$0xff] }
 0x40e   :  { %1119 = vmatmul.bf16.gmra.mxu1 %v780_v22  ;;  %v649_v53 = vpop.f32.mrf.mxu2  ;;  %1263 = vmatpush.msrb.mxu3 %v4561_v47 }
 0x40f   :  { %v763_v55 = vmul.f32 %v649_v53, %v555_v39  ;;  %v731_v56 = vpop.f32.mrf.mxu3  ;;  %1413 = vmatpush.msrb.mxu1 %v4561_v47 }
 0x410   :  { %v765_v60 = vmul.f32 %v731_v56, %v557_v51  ;;  %v4514_v5 = vpop.f32.mrf.mxu0  ;;  %1264 = vmatpush.msrb.mxu3 %v4568_v50 }
 0x411   :  { %v779_v61 = vpack.c.bf16 %v763_v55, %v759_v54  ;;  %v4525_v9 = vpop.f32.mrf.mxu1  ;;  %1414 = vmatpush.msrb.mxu1 %v4568_v50  ;;  %v4589_v54 = vld [vmem:[%s5383_s8 + $0x50] sm:$0xff] }
 0x412   :  { %v781_v0 = vpack.c.bf16 %v765_v60, %v761_v58  ;;  %1265 = vmatpush.msrb.mxu3 %v4575_v35  ;;  %v4596_v58 = vld [vmem:[%s5383_s8 + $0x48] sm:$0xff] }
 0x413   :  { %1090 = vmatmul.bf16.gmra.mxu2 %v779_v61  ;;  %1415 = vmatpush.msrb.mxu1 %v4575_v35 }
 0x414   :  { %1148 = vmatmul.bf16.gmra.mxu3 %v781_v0  ;;  %v4603_v0 = vld [vmem:[%s5383_s8 + $0x40] sm:$0xff] }
 0x415   :  { %1266 = vmatpush.msrb.mxu3 %v4582_v28  ;;  %1416 = vmatpush.msrb.mxu1 %v4582_v28 }
 0x416   :  { %v4523_v59 = vpop.f32.mrf.mxu2 }
 0x417   :  { %v4527_v27 = vpop.f32.mrf.mxu3  ;;  %1267 = vmatpush.msrb.mxu3 %v4589_v54  ;;  %1417 = vmatpush.msrb.mxu1 %v4589_v54 }
 0x418   :  { %v4517_v6 = vpop.f32.mrf.mxu0 }
 0x419   :  { %v4531_v16 = vpop.f32.mrf.mxu1  ;;  %1268 = vmatpush.msrb.mxu3 %v4596_v58  ;;  %1418 = vmatpush.msrb.mxu1 %v4596_v58 }
 0x41b   :  { %1269 = vmatpush.msrb.mxu3 %v4603_v0  ;;  %1419 = vmatpush.msrb.mxu1 %v4603_v0 }
 0x41d   :  { %3403 = vmatmul.msk.f32.vlgmr.msrb.gmra.mxu0 %vm1180_vm15, %v3632_v2 }
 0x41e   :  { %v4529_v57 = vpop.f32.mrf.mxu2 }
 0x41f   :  { %v4533_v1 = vpop.f32.mrf.mxu3 }
 0x420   :  { %v4519_v3 = vpop.f32.mrf.mxu0 }
 0x421   :  { %v4537_v23 = vpop.f32.mrf.mxu1 }
 0x425   :  { %3404 = vmatmul.msk.f32.gmra.mxu0 %vm1180_vm15, %v3632_v2 }
 0x426   :  { %v1081_v18 = vpop.f32.mrf.mxu2 }
 0x427   :  { %v4539_v26 = vpop.f32.mrf.mxu3 }
 0x428   :  { %v4521_v7 = vpop.f32.mrf.mxu0 }
 0x429   :  { %v1112_v31 = vpop.f32.mrf.mxu1 }
 0x42d   :  { %3405 = vmatmul.msk.f32.gmra.mxu0 %vm1180_vm15, %v3632_v2 }
 0x42e   :  { %v1083_v32 = vpop.f32.mrf.mxu2 }
 0x42f   :  { %v4543_v14 = vpop.f32.mrf.mxu3 }
 0x435   :  { %3406 = vmatmul.msk.f32.gmra.mxu0 %vm1180_vm15, %v3632_v2 }
 0x43d   :  { %3407 = vmatmul.msk.f32.gmra.mxu0 %vm1180_vm15, %v3632_v2 }
 0x445   :  { %3408 = vmatmul.msk.f32.gmra.mxu0 %vm1180_vm15, %v3632_v2 }
 0x44d   :  { %3409 = vmatmul.msk.f32.gmra.mxu0 %vm1180_vm15, %v3632_v2 }
 0x455   :  { %3410 = vmatmul.msk.f32.gmra.mxu0 %vm1180_vm15, %v3632_v2  ;;  %v1084_v2 = vadd.f32 %v1083_v32, %v4521_v7  ;;  %v1079_v32 = vadd.f32 %v4529_v57, %v4517_v6  ;;  %v4637_v6 = vld [vmem:[%s5383_s8 + $0x28] sm:$0xff] }
 0x47a   :  { %v1057_v43 = vpop.f32.mrf.mxu0 }
 0x47b   :  { %v1115_v12 = vpop.f32.mrf.mxu1 }
 0x482   :  { %v1059_v8 = vpop.f32.mrf.mxu0 }
 0x483   :  { %v1117_v38 = vpop.f32.mrf.mxu1 }
 0x486   :  { %v1086_v33 = vpop.f32.mrf.mxu2 }
 0x487   :  { %v4547_v37 = vpop.f32.mrf.mxu3  ;;  %v1087_v60 = vadd.f32 %v1086_v33, %v1057_v43  ;;  %v1082_v43 = vadd.f32 %v1081_v18, %v4519_v3  ;;  %v4614_v33 = vld [vmem:[%s5383_s8 + $0x38] sm:$0xff]  ;;  %v4626_v3 = vld [vmem:[%s5383_s8 + $0x30] sm:$0xff]  ;;  %v1113_v18 = vadd.f32 %v1112_v31, %v1084_v2 }
 0x488   :  { %1270 = vmatpush.msrb.mxu3 %v4614_v33  ;;  %1420 = vmatpush.msrb.mxu1 %v4614_v33 }
 0x489   :  { %v1111_v57 = vadd.f32 %v4537_v23, %v1082_v43 }
 0x48a   :  { %v1062_v4 = vpop.f32.mrf.mxu0  ;;  %1271 = vmatpush.msrb.mxu3 %v4626_v3  ;;  %1421 = vmatpush.msrb.mxu1 %v4626_v3 }
 0x48b   :  { %v1120_v45 = vpop.f32.mrf.mxu1 }
 0x48c   :  { %1272 = vmatpush.msrb.mxu3 %v4637_v6  ;;  %1422 = vmatpush.msrb.mxu1 %v4637_v6 }
 0x48e   :  { %v1088_v34 = vpop.f32.mrf.mxu2 }
 0x48f   :  { %v1146_v41 = vpop.f32.mrf.mxu3  ;;  %v1089_v55 = vadd.f32 %v1088_v34, %v1059_v8  ;;  %v1116_v34 = vadd.f32 %v1115_v12, %v1087_v60 }
 0x491   :  { %v1118_v8 = vadd.f32 %v1117_v38, %v1089_v55  ;;  %v4642_v31 = vadd.f32 %v4547_v37, %v1116_v34  ;;  %v4662_v37 = vld [vmem:[%s5383_s8 + $0x18] sm:$0xff] }
 0x492   :  { %v1064_v21 = vpop.f32.mrf.mxu0 }
 0x493   :  { %v1122_v53 = vpop.f32.mrf.mxu1  ;;  %v4628_v38 = vadd.f32 %v1146_v41, %v1118_v8 }
 0x496   :  { %v1091_v42 = vpop.f32.mrf.mxu2 }
 0x497   :  { %v1149_v48 = vpop.f32.mrf.mxu3  ;;  %v1092_v51 = vadd.f32 %v1091_v42, %v1062_v4 }
 0x499   :  { %v1121_v61 = vadd.f32 %v1120_v45, %v1092_v51  ;;  %v1077_v45 = vadd.f32 %v4523_v59, %v4514_v5  ;;  %v4649_v5 = vld [vmem:[%s5383_s8 + $0x20] sm:$0xff]  ;;  %v1108_v59 = vadd.f32 %v4531_v16, %v1079_v32  ;;  %v4667_v16 = vadd.f32 %v4539_v26, %v1111_v57 }
 0x49a   :  { %v4535_v17 = vpop.f32.mrf.mxu0  ;;  %1273 = vmatpush.msrb.mxu3 %v4649_v5  ;;  %1423 = vmatpush.msrb.mxu1 %v4649_v5 }
 0x49b   :  { %v4616_v42 = vadd.f32 %v1149_v48, %v1121_v61  ;;  %v4654_v48 = vadd.f32 %v4543_v14, %v1113_v18 }
 0x49c   :  { %1274 = vmatpush.msrb.mxu3 %v4662_v37  ;;  %1424 = vmatpush.msrb.mxu1 %v4662_v37 }
 0x49e   :  { %v1093_v49 = vpop.f32.mrf.mxu2 }
 0x49f   :  { %v1094_v22 = vadd.f32 %v1093_v49, %v1064_v21  ;;  %v1151_v63 = vpop.f32.mrf.mxu3  ;;  %v4679_v49 = vadd.f32 %v4533_v1, %v1108_v59 }
 0x4a1   :  { %v1123_v56 = vadd.f32 %v1122_v53, %v1094_v22 }
 0x4a2   :  { %v4541_v29 = vpop.f32.mrf.mxu0 }
 0x4a3   :  { %v4606_v4 = vadd.f32 %v1151_v63, %v1123_v56 }
 0x4aa   :  { %v4545_v36 = vpop.f32.mrf.mxu0 }
 0x4b2   :  { %v4549_v11 = vpop.f32.mrf.mxu0 }
 0x4b3   :  { %v1232_v14 = vmul.f32 %v4549_v11, %v4654_v48  ;;  %v1230_v11 = vmul.f32 %v4541_v29, %v4679_v49 }
 0x4ba   :  { %v4551_v40 = vpop.f32.mrf.mxu0 }
 0x4bb   :  { %v1233_v23 = vmul.f32 %v4551_v40, %v4642_v31  ;;  %v4675_v40 = vld [vmem:[%s5383_s8 + $0x10] sm:$0xff] }
 0x4bc   :  { %1275 = vmatpush.msrb.mxu3 %v4675_v40  ;;  %1425 = vmatpush.msrb.mxu1 %v4675_v40 }
 0x4c2   :  { %v1220_v13 = vpop.f32.mrf.mxu0 }
 0x4c3   :  { %v1234_v41 = vmul.f32 %v1220_v13, %v4628_v38  ;;  %v1106_v13 = vadd.f32 %v4525_v9, %v1077_v45  ;;  %v1231_v9 = vmul.f32 %v4545_v36, %v4667_v16  ;;  %v4697_v36 = vld [vmem:[%s5384_s13] sm:$0x3] }
 0x4c5   :  { %v4686_v26 = vadd.f32 %v4527_v27, %v1106_v13  ;;  %v4704_v27 = vld [vmem:[%s5383_s8 + $0x8] sm:$0xff] }
 0x4c6   :  { %1276 = vmatpush.msrb.mxu3 %v4704_v27  ;;  %1426 = vmatpush.msrb.mxu1 %v4704_v27 }
 0x4c7   :  { %v1229_v1 = vmul.f32 %v4535_v17, %v4686_v26  ;;  %v4709_v17 = vld [vmem:[%s5383_s8] sm:$0xff] }
 0x4c8   :  { %1277 = vmatpush.msrb.mxu3 %v4709_v17  ;;  %1427 = vmatpush.msrb.mxu1 %v4709_v17 }
 0x4ca   :  { %v1223_v39 = vpop.f32.mrf.mxu0  ;;  %1300 = vmatpush.msra.mxu3 %v4468_v10  ;;  %1759 = vmatpush.msra.mxu1 %v4556_v46 }
 0x4cb   :  { %v1235_v12 = vmul.f32 %v1223_v39, %v4616_v42 }
 0x4cc   :  { %1760 = vmatpush.msra.mxu1 %v4561_v47 }
 0x4ce   :  { %1761 = vmatpush.msra.mxu1 %v4568_v50 }
 0x4d0   :  { %1762 = vmatpush.msra.mxu1 %v4575_v35 }
 0x4d2   :  { %v1226_v21 = vpop.f32.mrf.mxu0  ;;  %1763 = vmatpush.msra.mxu1 %v4582_v28 }
 0x4d3   :  { %v1236_v7 = vmul.f32 %v1226_v21, %v4606_v4 }
 0x4d4   :  { %1764 = vmatpush.msra.mxu1 %v4589_v54 }
 0x4d5   :  { %1249 = vmatpush.msrb.mxu2 %v1236_v7 }
 0x4d6   :  { %1765 = vmatpush.msra.mxu1 %v4596_v58 }
 0x4d7   :  { %1250 = vmatpush.msrb.mxu2 %v1235_v12 }
 0x4d8   :  { %1766 = vmatpush.msra.mxu1 %v4603_v0 }
 0x4d9   :  { %1251 = vmatpush.msrb.mxu2 %v1234_v41 }
 0x4da   :  { %1767 = vmatpush.msra.mxu1 %v4614_v33 }
 0x4db   :  { %1252 = vmatpush.msrb.mxu2 %v1233_v23 }
 0x4dc   :  { %1768 = vmatpush.msra.mxu1 %v4626_v3 }
 0x4dd   :  { %1253 = vmatpush.msrb.mxu2 %v1232_v14 }
 0x4de   :  { %1769 = vmatpush.msra.mxu1 %v4637_v6 }
 0x4df   :  { %1254 = vmatpush.msrb.mxu2 %v1231_v9  ;;  %v4737_v9 = vld [vmem:[%s5385_s14] sm:$0xff] }
 0x4e0   :  { %1770 = vmatpush.msra.mxu1 %v4649_v5 }
 0x4e1   :  { %1255 = vmatpush.msrb.mxu2 %v1230_v11  ;;  %v4747_v11 = vld [vmem:[%s5385_s14 + $0x8] sm:$0xff] }
 0x4e2   :  { %1771 = vmatpush.msra.mxu1 %v4662_v37 }
 0x4e3   :  { %1256 = vmatpush.msrb.mxu2 %v1229_v1 }
 0x4e4   :  { %3411 = vmatmul.msk.f32.vlgmr.msrb.gmra.mxu2 %vm1237_vm4, %v4697_v36  ;;  %1772 = vmatpush.msra.mxu1 %v4675_v40 }
 0x4e6   :  { %1773 = vmatpush.msra.mxu1 %v4704_v27 }
 0x4e8   :  { %1774 = vmatpush.msra.mxu1 %v4709_v17 }
 0x567   :  { %v1258_v29 = vpop.f32.mrf.mxu2 }
 0x568   :  { %v1261_v22 = vmul.f32 %v1258_v29, %v1258_v29 }
 0x56a   :  { %1278 = vmatmul.f32.vlgmr.msrb.gmra.mxu3 %v1261_v22 }
 0x56b   :  { %1580 = vmatpush.msrb.mxu3 %v4468_v10 }
 0x5ed   :  { %v1279_v39 = vpop.f32.mrf.mxu3 }
 0x5ee   :  { %3412 = vmatmul.msk.f32.vlgmr.msra.gmra.mxu3 %vm1180_vm15, %v1279_v39 }
 0x671   :  { %v1302_v51 = vpop.f32.mrf.mxu3 }
 0x672   :  { %v1306_v53 = vadd.f32 1e-07, %v1302_v51  ;;  %v1318_v55 = vadd.f32 1.0, %v1302_v51  ;;  %v1305_v45 = vmul.f32 %v1302_v51, %v1258_v29 }
 0x674   :  { %3633 = vrsqrt.f32 %v1306_v53  ;;  %v1330_v7 = vand.u32 2147483648, %v1318_v55  ;;  %vm1324_vm7 = vweird.f32 %v1318_v55  ;;  %v1328_v18 = vand.u32 2147483647, %v1318_v55 }
 0x675   :  { %3635 = vrcp.f32 %v1318_v55  ;;  %vm1313_vm8 = vweird.f32 %v1306_v53 }
 0x676   :  { %v1331_v59 = vor.u32 1.1754944e-38, %v1330_v7  ;;  %vm1329_vm11 = vcmp.eq.f32.partialorder %v1328_v18, 8.507059e+37 }
 0x67a   :  { %v3634_v56 = vpop.eup %3633 }
 0x67b   :  { %v3636_v60 = vpop.eup %3635  ;;  %v1308_v61 = vmul.f32 %v3634_v56, %v1306_v53  ;;  %vm1314_vm6 = vweird.f32 %v3634_v56 }
 0x67c   :  { %v1320_v63 = vmul.f32 %v3636_v60, %v1318_v55  ;;  %vm1325_vm5 = vweird.f32 %v3636_v60  ;;  %vm1315_vm10 = vmor %vm1313_vm8, %vm1314_vm6 }
 0x67d   :  { %v1309_v2 = vmul.f32 %v3634_v56, %v1308_v61  ;;  %vm1326_vm9 = vmor %vm1324_vm7, %vm1325_vm5 }
 0x67e   :  { %v1321_v8 = vsub.f32 1.0, %v1320_v63 }
 0x67f   :  { %v1310_v43 = vmul.f32 0.5, %v1309_v2 }
 0x680   :  { %v1322_v21 = vmul.f32 %v3636_v60, %v1321_v8 }
 0x681   :  { %v1311_v34 = vsub.f32 1.5, %v1310_v43 }
 0x682   :  { %v1323_v32 = vadd.f32 %v3636_v60, %v1322_v21 }
 0x683   :  { %v1312_v12 = vmul.f32 %v3634_v56, %v1311_v34 }
 0x684   :  { %v1327_v57 = vsel %vm1326_vm9, %v3636_v60, %v1323_v32  ;;  %vm2189_vm9 = vcmask 31744  }
 0x685   :  { %v1316_v41 = vsel %vm1315_vm10, %v3634_v56, %v1312_v12  ;;  %v1332_v13 = vsel %vm1329_vm11, %v1331_v59, %v1327_v57 }
 0x686   :  { %v1317_v23 = vmul.f32 %v1316_v41, %v1305_v45 }
 0x688   :  { %v1333_v14 = vmul.f32 %v1332_v13, %v1317_v23 }
 0x68a   :  { %3413 = vmatpush.msk.msra.mxu2 %vm1359_vm12, %v1333_v14 }
 0x68b   :  { %3414 = vmatmul.msk.f32.vlgmr.msra.gmra.mxu2 %vm1334_vm13, %v4737_v9 }
 0x68c   :  { %1635 = vmatpush.msrb.mxu2 %v4556_v46  ;;  %v4758_v46 = vld [vmem:[%s5385_s14 + $0x10] sm:$0xff] }
 0x68e   :  { %1636 = vmatpush.msrb.mxu2 %v4561_v47  ;;  %v4769_v47 = vld [vmem:[%s5385_s14 + $0x18] sm:$0xff] }
 0x690   :  { %1637 = vmatpush.msrb.mxu2 %v4568_v50  ;;  %v4780_v50 = vld [vmem:[%s5385_s14 + $0x20] sm:$0xff] }
 0x692   :  { %1638 = vmatpush.msrb.mxu2 %v4575_v35  ;;  %v4789_v35 = vld [vmem:[%s5385_s14 + $0x28] sm:$0xff] }
 0x693   :  { %3415 = vmatmul.msk.f32.gmra.mxu2 %vm1334_vm13, %v4747_v11 }
 0x694   :  { %1639 = vmatpush.msrb.mxu2 %v4582_v28  ;;  %v4796_v28 = vld [vmem:[%s5385_s14 + $0x30] sm:$0xff] }
 0x696   :  { %1640 = vmatpush.msrb.mxu2 %v4589_v54  ;;  %v4803_v54 = vld [vmem:[%s5385_s14 + $0x38] sm:$0xff] }
 0x698   :  { %1641 = vmatpush.msrb.mxu2 %v4596_v58 }
 0x69a   :  { %1642 = vmatpush.msrb.mxu2 %v4603_v0 }
 0x69b   :  { %3416 = vmatmul.msk.f32.gmra.mxu2 %vm1334_vm13, %v4758_v46 }
 0x69c   :  { %1643 = vmatpush.msrb.mxu2 %v4614_v33 }
 0x69e   :  { %1644 = vmatpush.msrb.mxu2 %v4626_v3 }
 0x6a0   :  { %1645 = vmatpush.msrb.mxu2 %v4637_v6 }
 0x6a2   :  { %1646 = vmatpush.msrb.mxu2 %v4649_v5 }
 0x6a3   :  { %3417 = vmatmul.msk.f32.gmra.mxu2 %vm1334_vm13, %v4769_v47 }
 0x6a4   :  { %1647 = vmatpush.msrb.mxu2 %v4662_v37 }
 0x6a6   :  { %1648 = vmatpush.msrb.mxu2 %v4675_v40 }
 0x6a8   :  { %1649 = vmatpush.msrb.mxu2 %v4704_v27 }
 0x6aa   :  { %1650 = vmatpush.msrb.mxu2 %v4709_v17 }
 0x6ab   :  { %3418 = vmatmul.msk.f32.gmra.mxu2 %vm1334_vm13, %v4780_v50 }
 0x6b3   :  { %3419 = vmatmul.msk.f32.gmra.mxu2 %vm1334_vm13, %v4789_v35 }
 0x6bb   :  { %3420 = vmatmul.msk.f32.gmra.mxu2 %vm1334_vm13, %v4796_v28 }
 0x6c3   :  { %3421 = vmatmul.msk.f32.gmra.mxu2 %vm1334_vm13, %v4803_v54 }
 0x70e   :  { %v1380_v58 = vpop.f32.mrf.mxu2 }
 0x70f   :  { %v1404_v0 = vmul.f32 %v1380_v58, %v4686_v26 }
 0x711   :  { %1428 = vmatmul.f32.vlgmr.msrb.gmra.mxu1 %v1404_v0 }
 0x716   :  { %v1383_v33 = vpop.f32.mrf.mxu2 }
 0x717   :  { %v1405_v3 = vmul.f32 %v1383_v33, %v4679_v49 }
 0x719   :  { %1431 = vmatmul.f32.gmra.mxu1 %v1405_v3 }
 0x71e   :  { %v1386_v6 = vpop.f32.mrf.mxu2 }
 0x71f   :  { %v1406_v5 = vmul.f32 %v1386_v6, %v4667_v16 }
 0x721   :  { %1434 = vmatmul.f32.gmra.mxu1 %v1406_v5 }
 0x726   :  { %v1389_v37 = vpop.f32.mrf.mxu2 }
 0x727   :  { %v1407_v40 = vmul.f32 %v1389_v37, %v4654_v48 }
 0x729   :  { %1437 = vmatmul.f32.gmra.mxu1 %v1407_v40 }
 0x72e   :  { %v1392_v1 = vpop.f32.mrf.mxu2 }
 0x72f   :  { %v1408_v29 = vmul.f32 %v1392_v1, %v4642_v31 }
 0x731   :  { %1440 = vmatmul.f32.gmra.mxu1 %v1408_v29 }
 0x736   :  { %v1395_v22 = vpop.f32.mrf.mxu2 }
 0x737   :  { %v1409_v39 = vmul.f32 %v1395_v22, %v4628_v38 }
 0x739   :  { %1443 = vmatmul.f32.gmra.mxu1 %v1409_v39 }
 0x73e   :  { %v1398_v51 = vpop.f32.mrf.mxu2 }
 0x73f   :  { %v1410_v53 = vmul.f32 %v1398_v51, %v4616_v42 }
 0x741   :  { %1446 = vmatmul.f32.gmra.mxu1 %v1410_v53 }
 0x746   :  { %v1401_v55 = vpop.f32.mrf.mxu2 }
 0x747   :  { %v1411_v56 = vmul.f32 %v1401_v55, %v4606_v4 }
 0x749   :  { %1449 = vmatmul.f32.gmra.mxu1 %v1411_v56 }
 0x78e   :  { %v4815_v60 = vpop.f32.mrf.mxu1 }
 0x78f   :  { %v1453_v61 = vsel %vm1180_vm15, %v4815_v60, -inf }
 0x790   :  { %1454 = vmax.xlane.f32.xlu2 %v1453_v61 }
 0x796   :  { %v4819_v63 = vpop.f32.mrf.mxu1 }
 0x797   :  { %v1456_v2 = vsel %vm1180_vm15, %v4819_v63, -inf }
 0x798   :  { %1457 = vmax.xlane.f32.xlu0 %v1456_v2 }
 0x79e   :  { %v4823_v8 = vpop.f32.mrf.mxu1 }
 0x79f   :  { %v1459_v43 = vsel %vm1180_vm15, %v4823_v8, -inf }
 0x7a0   :  { %1460 = vmax.xlane.f32.xlu1 %v1459_v43 }
 0x7a6   :  { %v4827_v21 = vpop.f32.mrf.mxu1 }
 0x7a7   :  { %v1462_v34 = vsel %vm1180_vm15, %v4827_v21, -inf }
 0x7a8   :  { %1463 = vmax.xlane.f32.xlu2 %v1462_v34 }
 0x7ae   :  { %v4831_v7 = vpop.f32.mrf.mxu1 }
 0x7af   :  { %v1465_v32 = vsel %vm1180_vm15, %v4831_v7, -inf }
 0x7b0   :  { %1466 = vmax.xlane.f32.xlu0 %v1465_v32 }
 0x7b6   :  { %v4835_v18 = vpop.f32.mrf.mxu1 }
 0x7b7   :  { %v1468_v12 = vsel %vm1180_vm15, %v4835_v18, -inf }
 0x7b8   :  { %1469 = vmax.xlane.f32.xlu1 %v1468_v12 }
 0x7be   :  { %v4839_v45 = vpop.f32.mrf.mxu1 }
 0x7bf   :  { %v1471_v57 = vsel %vm1180_vm15, %v4839_v45, -inf }
 0x7c0   :  { %1472 = vmax.xlane.f32.xlu2 %v1471_v57 }
 0x7c6   :  { %v4843_v41 = vpop.f32.mrf.mxu1 }
 0x7c7   :  { %v1474_v59 = vsel %vm1180_vm15, %v4843_v41, -inf }
 0x7c8   :  { %1475 = vmax.xlane.f32.xlu1 %v1474_v59 }
 0x803   :  { %v1455_v23 = vpop.xlane.xlu2 %1454 }
 0x804   :  { %v1477_v13 = vsub.f32 %v4815_v60, %v1455_v23 }
 0x806   :  { %v1485_v14 = vmul.f32 1.442695, %v1477_v13 }
 0x808   :  { %3637 = vpow2.f32 %v1485_v14 }
 0x80b   :  { %v1458_v58 = vpop.xlane.xlu0 %1457 }
 0x80c   :  { %v1478_v0 = vsub.f32 %v4819_v63, %v1458_v58 }
 0x80e   :  { %v3638_v33 = vpop.eup %3637  ;;  %v1487_v3 = vmul.f32 1.442695, %v1478_v0 }
 0x80f   :  { %v1501_v6 = vsel %vm1180_vm15, %v3638_v33, 0.0 }
 0x810   :  { %3639 = vpow2.f32 %v1487_v3  ;;  %1502 = vadd.xlane.f32.xlu0 %v1501_v6 }
 0x813   :  { %v1461_v5 = vpop.xlane.xlu1 %1460 }
 0x814   :  { %v1479_v37 = vsub.f32 %v4823_v8, %v1461_v5 }
 0x816   :  { %v3640_v40 = vpop.eup %3639  ;;  %v1489_v1 = vmul.f32 1.442695, %v1479_v37 }
 0x817   :  { %v1504_v29 = vsel %vm1180_vm15, %v3640_v40, 0.0 }
 0x818   :  { %3641 = vpow2.f32 %v1489_v1  ;;  %1505 = vadd.xlane.f32.xlu2 %v1504_v29 }
 0x81b   :  { %v1464_v22 = vpop.xlane.xlu2 %1463 }
 0x81c   :  { %v1480_v39 = vsub.f32 %v4827_v21, %v1464_v22 }
 0x81e   :  { %v3642_v51 = vpop.eup %3641  ;;  %v1491_v53 = vmul.f32 1.442695, %v1480_v39 }
 0x81f   :  { %v1507_v55 = vsel %vm1180_vm15, %v3642_v51, 0.0 }
 0x820   :  { %3643 = vpow2.f32 %v1491_v53  ;;  %1508 = vadd.xlane.f32.xlu0 %v1507_v55 }
 0x823   :  { %v1467_v56 = vpop.xlane.xlu0 %1466 }
 0x824   :  { %v1481_v61 = vsub.f32 %v4831_v7, %v1467_v56 }
 0x826   :  { %v3644_v2 = vpop.eup %3643  ;;  %v1493_v43 = vmul.f32 1.442695, %v1481_v61 }
 0x827   :  { %v1510_v34 = vsel %vm1180_vm15, %v3644_v2, 0.0 }
 0x828   :  { %3645 = vpow2.f32 %v1493_v43  ;;  %1511 = vadd.xlane.f32.xlu1 %v1510_v34 }
 0x82b   :  { %v1470_v32 = vpop.xlane.xlu1 %1469 }
 0x82c   :  { %v1482_v12 = vsub.f32 %v4835_v18, %v1470_v32 }
 0x82e   :  { %v3646_v57 = vpop.eup %3645  ;;  %v1495_v59 = vmul.f32 1.442695, %v1482_v12 }
 0x82f   :  { %v1513_v23 = vsel %vm1180_vm15, %v3646_v57, 0.0 }
 0x830   :  { %3647 = vpow2.f32 %v1495_v59  ;;  %1514 = vadd.xlane.f32.xlu2 %v1513_v23 }
 0x833   :  { %v1473_v13 = vpop.xlane.xlu2 %1472 }
 0x834   :  { %v1483_v14 = vsub.f32 %v4839_v45, %v1473_v13 }
 0x836   :  { %v3648_v58 = vpop.eup %3647  ;;  %v1497_v0 = vmul.f32 1.442695, %v1483_v14 }
 0x837   :  { %v1516_v3 = vsel %vm1180_vm15, %v3648_v58, 0.0 }
 0x838   :  { %3649 = vpow2.f32 %v1497_v0  ;;  %1517 = vadd.xlane.f32.xlu0 %v1516_v3 }
 0x83b   :  { %v1476_v6 = vpop.xlane.xlu1 %1475 }
 0x83c   :  { %v1484_v5 = vsub.f32 %v4843_v41, %v1476_v6 }
 0x83e   :  { %v3650_v37 = vpop.eup %3649  ;;  %v1499_v1 = vmul.f32 1.442695, %v1484_v5 }
 0x83f   :  { %v1519_v29 = vsel %vm1180_vm15, %v3650_v37, 0.0 }
 0x840   :  { %3651 = vpow2.f32 %v1499_v1  ;;  %1520 = vadd.xlane.f32.xlu1 %v1519_v29 }
 0x846   :  { %v3652_v22 = vpop.eup %3651 }
 0x847   :  { %v1522_v39 = vsel %vm1180_vm15, %v3652_v22, 0.0 }
 0x848   :  { %1523 = vadd.xlane.f32.xlu2 %v1522_v39 }
 0x883   :  { %v1503_v53 = vpop.xlane.xlu0 %1502 }
 0x884   :  { %3653 = vrcp.f32 %v1503_v53 }
 0x88a   :  { %v3654_v55 = vpop.eup %3653 }
 0x88b   :  { %v1533_v56 = vmul.f32 %v3654_v55, %v3638_v33  ;;  %v1506_v61 = vpop.xlane.xlu2 %1505 }
 0x88c   :  { %3655 = vrcp.f32 %v1506_v61 }
 0x88d   :  { %3422 = vmatmul.msk.f32.vlgmr.msrb.gmra.mxu3 %vm1180_vm15, %v1533_v56 }
 0x892   :  { %v3656_v43 = vpop.eup %3655 }
 0x893   :  { %v1509_v34 = vpop.xlane.xlu0 %1508  ;;  %v1534_v32 = vmul.f32 %v3656_v43, %v3640_v40 }
 0x894   :  { %3657 = vrcp.f32 %v1509_v34 }
 0x895   :  { %3423 = vmatmul.msk.f32.gmra.mxu3 %vm1180_vm15, %v1534_v32 }
 0x89a   :  { %v3658_v12 = vpop.eup %3657 }
 0x89b   :  { %v1512_v59 = vpop.xlane.xlu1 %1511  ;;  %v1535_v23 = vmul.f32 %v3658_v12, %v3642_v51 }
 0x89c   :  { %3659 = vrcp.f32 %v1512_v59 }
 0x89d   :  { %3424 = vmatmul.msk.f32.gmra.mxu3 %vm1180_vm15, %v1535_v23 }
 0x8a2   :  { %v3660_v13 = vpop.eup %3659 }
 0x8a3   :  { %v1515_v14 = vpop.xlane.xlu2 %1514  ;;  %v1536_v0 = vmul.f32 %v3660_v13, %v3644_v2 }
 0x8a4   :  { %3661 = vrcp.f32 %v1515_v14 }
 0x8a5   :  { %3425 = vmatmul.msk.f32.gmra.mxu3 %vm1180_vm15, %v1536_v0 }
 0x8aa   :  { %v3662_v33 = vpop.eup %3661 }
 0x8ab   :  { %v1518_v3 = vpop.xlane.xlu0 %1517  ;;  %v1537_v6 = vmul.f32 %v3662_v33, %v3646_v57 }
 0x8ac   :  { %3663 = vrcp.f32 %v1518_v3 }
 0x8ad   :  { %3426 = vmatmul.msk.f32.gmra.mxu3 %vm1180_vm15, %v1537_v6 }
 0x8b2   :  { %v3664_v40 = vpop.eup %3663 }
 0x8b3   :  { %v1521_v5 = vpop.xlane.xlu1 %1520  ;;  %v1538_v1 = vmul.f32 %v3664_v40, %v3648_v58 }
 0x8b4   :  { %3665 = vrcp.f32 %v1521_v5 }
 0x8b5   :  { %3427 = vmatmul.msk.f32.gmra.mxu3 %vm1180_vm15, %v1538_v1 }
 0x8ba   :  { %v3666_v51 = vpop.eup %3665 }
 0x8bb   :  { %v1524_v29 = vpop.xlane.xlu2 %1523  ;;  %v1539_v39 = vmul.f32 %v3666_v51, %v3650_v37 }
 0x8bc   :  { %3667 = vrcp.f32 %v1524_v29 }
 0x8bd   :  { %3428 = vmatmul.msk.f32.gmra.mxu3 %vm1180_vm15, %v1539_v39 }
 0x8c2   :  { %v3668_v2 = vpop.eup %3667 }
 0x8c3   :  { %v1540_v53 = vmul.f32 %v3668_v2, %v3652_v22 }
 0x8c5   :  { %3429 = vmatmul.msk.f32.gmra.mxu3 %vm1180_vm15, %v1540_v53 }
 0x910   :  { %v1582_v57 = vpop.f32.mrf.mxu3 }
 0x911   :  { %v1606_v0 = vmul.f32 %v1582_v57, %v4686_v26 }
 0x918   :  { %v1585_v55 = vpop.f32.mrf.mxu3 }
 0x919   :  { %v1607_v14 = vmul.f32 %v1585_v55, %v4679_v49 }
 0x920   :  { %v1588_v56 = vpop.f32.mrf.mxu3 }
 0x921   :  { %v1608_v13 = vmul.f32 %v1588_v56, %v4667_v16 }
 0x928   :  { %v1591_v61 = vpop.f32.mrf.mxu3 }
 0x929   :  { %v1609_v23 = vmul.f32 %v1591_v61, %v4654_v48 }
 0x930   :  { %v1594_v43 = vpop.f32.mrf.mxu3 }
 0x931   :  { %v1610_v22 = vmul.f32 %v1594_v43, %v4642_v31 }
 0x938   :  { %v1597_v34 = vpop.f32.mrf.mxu3 }
 0x939   :  { %v1611_v37 = vmul.f32 %v1597_v34, %v4628_v38 }
 0x940   :  { %v1600_v58 = vpop.f32.mrf.mxu3 }
 0x941   :  { %v1612_v59 = vmul.f32 %v1600_v58, %v4616_v42 }
 0x948   :  { %v1603_v32 = vpop.f32.mrf.mxu3 }
 0x949   :  { %v1613_v12 = vmul.f32 %v1603_v32, %v4606_v4 }
 0x94b   :  { %1622 = vmatpush.msra.mxu0 %v1613_v12 }
 0x94d   :  { %1623 = vmatpush.msra.mxu0 %v1612_v59 }
 0x94f   :  { %1624 = vmatpush.msra.mxu0 %v1611_v37 }
 0x951   :  { %1625 = vmatpush.msra.mxu0 %v1610_v22 }
 0x953   :  { %1626 = vmatpush.msra.mxu0 %v1609_v23 }
 0x955   :  { %1627 = vmatpush.msra.mxu0 %v1608_v13 }
 0x957   :  { %1628 = vmatpush.msra.mxu0 %v1607_v14 }
 0x959   :  { %1629 = vmatpush.msra.mxu0 %v1606_v0 }
 0x95a   :  { %3430 = vmatmul.msk.f32.vlgmr.msra.gmra.mxu0 %vm1237_vm4, %v4697_v36 }
 0x95b   :  { %1673 = vmatpush.msrb.mxu0 %v4468_v10 }
 0x95d   :  { %1935 = vmatpush.msra.mxu0 %v4468_v10 }
 0x9d7   :  { %v1631_v33 = vpop.f32.mrf.mxu0 }
 0x9d8   :  { %v1634_v3 = vmul.f32 %v1631_v33, %v1631_v33 }
 0x9da   :  { %1651 = vmatmul.f32.vlgmr.msrb.gmra.mxu2 %v1634_v3 }
 0xa5d   :  { %v1652_v6 = vpop.f32.mrf.mxu2 }
 0xa5e   :  { %3431 = vmatmul.msk.f32.vlgmr.msrb.gmra.mxu0 %vm1180_vm15, %v1652_v6 }
 0xadb   :  { %v1675_v40 = vpop.f32.mrf.mxu0 }
 0xadc   :  { %v1679_v5 = vadd.f32 1e-07, %v1675_v40  ;;  %v1691_v1 = vadd.f32 1.0, %v1675_v40  ;;  %v1678_v32 = vmul.f32 %v1675_v40, %v1631_v33 }
 0xade   :  { %3669 = vrsqrt.f32 %v1679_v5  ;;  %v1703_v61 = vand.u32 2147483648, %v1691_v1  ;;  %vm1697_vm3 = vweird.f32 %v1691_v1  ;;  %v1701_v34 = vand.u32 2147483647, %v1691_v1 }
 0xadf   :  { %3671 = vrcp.f32 %v1691_v1  ;;  %vm1686_vm5 = vweird.f32 %v1679_v5 }
 0xae0   :  { %v1704_v37 = vor.u32 1.1754944e-38, %v1703_v61  ;;  %vm1702_vm8 = vcmp.eq.f32.partialorder %v1701_v34, 8.507059e+37 }
 0xae4   :  { %v3670_v51 = vpop.eup %3669 }
 0xae5   :  { %v3672_v29 = vpop.eup %3671  ;;  %v1681_v39 = vmul.f32 %v3670_v51, %v1679_v5  ;;  %vm1687_vm2 = vweird.f32 %v3670_v51 }
 0xae6   :  { %v1693_v2 = vmul.f32 %v3672_v29, %v1691_v1  ;;  %vm1698_vm14 = vweird.f32 %v3672_v29  ;;  %vm1688_vm7 = vmor %vm1686_vm5, %vm1687_vm2 }
 0xae7   :  { %v1682_v53 = vmul.f32 %v3670_v51, %v1681_v39  ;;  %vm1699_vm6 = vmor %vm1697_vm3, %vm1698_vm14 }
 0xae8   :  { %v1694_v57 = vsub.f32 1.0, %v1693_v2 }
 0xae9   :  { %v1683_v55 = vmul.f32 0.5, %v1682_v53 }
 0xaea   :  { %v1695_v56 = vmul.f32 %v3672_v29, %v1694_v57 }
 0xaeb   :  { %v1684_v10 = vsub.f32 1.5, %v1683_v55 }
 0xaec   :  { %v1696_v43 = vadd.f32 %v3672_v29, %v1695_v56 }
 0xaed   :  { %v1685_v58 = vmul.f32 %v3670_v51, %v1684_v10 }
 0xaee   :  { %v1700_v12 = vsel %vm1699_vm6, %v3672_v29, %v1696_v43  ;;  %vm2197_vm6 = vcmask 1043456  }
 0xaef   :  { %v1689_v59 = vsel %vm1688_vm7, %v3670_v51, %v1685_v58  ;;  %v1705_v23 = vsel %vm1702_vm8, %v1704_v37, %v1700_v12 }
 0xaf0   :  { %v1690_v22 = vmul.f32 %v1689_v59, %v1678_v32 }
 0xaf2   :  { %v1706_v13 = vmul.f32 %v1705_v23, %v1690_v22 }
 0xaf4   :  { %3432 = vmatpush.msk.msra.mxu3 %vm1359_vm12, %v1706_v13 }
 0xaf5   :  { %3433 = vmatmul.msk.f32.vlgmr.msra.gmra.mxu3 %vm1334_vm13, %v4737_v9 }
 0xafd   :  { %3434 = vmatmul.msk.f32.gmra.mxu3 %vm1334_vm13, %v4747_v11 }
 0xb05   :  { %3435 = vmatmul.msk.f32.gmra.mxu3 %vm1334_vm13, %v4758_v46 }
 0xb0d   :  { %3436 = vmatmul.msk.f32.gmra.mxu3 %vm1334_vm13, %v4769_v47 }
 0xb15   :  { %3437 = vmatmul.msk.f32.gmra.mxu3 %vm1334_vm13, %v4780_v50 }
 0xb1d   :  { %3438 = vmatmul.msk.f32.gmra.mxu3 %vm1334_vm13, %v4789_v35 }
 0xb25   :  { %3439 = vmatmul.msk.f32.gmra.mxu3 %vm1334_vm13, %v4796_v28 }
 0xb2d   :  { %3440 = vmatmul.msk.f32.gmra.mxu3 %vm1334_vm13, %v4803_v54 }
 0xb78   :  { %v1727_v9 = vpop.f32.mrf.mxu3 }
 0xb79   :  { %v1751_v11 = vmul.f32 %v1727_v9, %v4686_v26 }
 0xb7b   :  { %1775 = vmatmul.f32.vlgmr.msra.gmra.mxu1 %v1751_v11 }
 0xb80   :  { %v1730_v46 = vpop.f32.mrf.mxu3 }
 0xb81   :  { %v1752_v14 = vmul.f32 %v1730_v46, %v4679_v49 }
 0xb83   :  { %1778 = vmatmul.f32.gmra.mxu1 %v1752_v14 }
 0xb88   :  { %v1733_v47 = vpop.f32.mrf.mxu3 }
 0xb89   :  { %v1753_v50 = vmul.f32 %v1733_v47, %v4667_v16 }
 0xb8b   :  { %1781 = vmatmul.f32.gmra.mxu1 %v1753_v50 }
 0xb90   :  { %v1736_v0 = vpop.f32.mrf.mxu3 }
 0xb91   :  { %v1754_v35 = vmul.f32 %v1736_v0, %v4654_v48 }
 0xb93   :  { %1784 = vmatmul.f32.gmra.mxu1 %v1754_v35 }
 0xb98   :  { %v1739_v28 = vpop.f32.mrf.mxu3 }
 0xb99   :  { %v1755_v33 = vmul.f32 %v1739_v28, %v4642_v31 }
 0xb9b   :  { %1787 = vmatmul.f32.gmra.mxu1 %v1755_v33 }
 0xba0   :  { %v1742_v54 = vpop.f32.mrf.mxu3 }
 0xba1   :  { %v1756_v3 = vmul.f32 %v1742_v54, %v4628_v38 }
 0xba3   :  { %1790 = vmatmul.f32.gmra.mxu1 %v1756_v3 }
 0xba8   :  { %v1745_v6 = vpop.f32.mrf.mxu3 }
 0xba9   :  { %v1757_v40 = vmul.f32 %v1745_v6, %v4616_v42 }
 0xbab   :  { %1793 = vmatmul.f32.gmra.mxu1 %v1757_v40 }
 0xbb0   :  { %v1748_v5 = vpop.f32.mrf.mxu3 }
 0xbb1   :  { %v1758_v1 = vmul.f32 %v1748_v5, %v4606_v4 }
 0xbb3   :  { %1796 = vmatmul.f32.gmra.mxu1 %v1758_v1 }
 0xbf8   :  { %v1776_v51 = vpop.f32.mrf.mxu1 }
 0xbf9   :  { %v1800_v29 = vadd.f32 %v1776_v51, %v4815_v60 }
 0xbfb   :  { %v1808_v39 = vsel %vm1180_vm15, %v1800_v29, -inf }
 0xbfc   :  { %1809 = vmax.xlane.f32.xlu0 %v1808_v39 }
 0xc00   :  { %v1779_v2 = vpop.f32.mrf.mxu1 }
 0xc01   :  { %v1801_v53 = vadd.f32 %v1779_v2, %v4819_v63 }
 0xc03   :  { %v1811_v57 = vsel %vm1180_vm15, %v1801_v53, -inf }
 0xc04   :  { %1812 = vmax.xlane.f32.xlu1 %v1811_v57 }
 0xc08   :  { %v1782_v55 = vpop.f32.mrf.mxu1 }
 0xc09   :  { %v1802_v56 = vadd.f32 %v1782_v55, %v4823_v8 }
 0xc0b   :  { %v1814_v10 = vsel %vm1180_vm15, %v1802_v56, -inf }
 0xc0c   :  { %1815 = vmax.xlane.f32.xlu2 %v1814_v10 }
 0xc10   :  { %v1785_v61 = vpop.f32.mrf.mxu1 }
 0xc11   :  { %v1803_v43 = vadd.f32 %v1785_v61, %v4827_v21 }
 0xc13   :  { %v1817_v60 = vsel %vm1180_vm15, %v1803_v43, -inf }
 0xc14   :  { %1818 = vmax.xlane.f32.xlu0 %v1817_v60 }
 0xc18   :  { %v1788_v34 = vpop.f32.mrf.mxu1 }
 0xc19   :  { %v1804_v58 = vadd.f32 %v1788_v34, %v4831_v7 }
 0xc1b   :  { %v1820_v63 = vsel %vm1180_vm15, %v1804_v58, -inf }
 0xc1c   :  { %1821 = vmax.xlane.f32.xlu1 %v1820_v63 }
 0xc20   :  { %v1791_v32 = vpop.f32.mrf.mxu1 }
 0xc21   :  { %v1805_v12 = vadd.f32 %v1791_v32, %v4835_v18 }
 0xc23   :  { %v1823_v8 = vsel %vm1180_vm15, %v1805_v12, -inf }
 0xc24   :  { %1824 = vmax.xlane.f32.xlu2 %v1823_v8 }
 0xc28   :  { %v1794_v59 = vpop.f32.mrf.mxu1 }
 0xc29   :  { %v1806_v37 = vadd.f32 %v1794_v59, %v4839_v45 }
 0xc2b   :  { %v1826_v21 = vsel %vm1180_vm15, %v1806_v37, -inf }
 0xc2c   :  { %1827 = vmax.xlane.f32.xlu0 %v1826_v21 }
 0xc30   :  { %v1797_v22 = vpop.f32.mrf.mxu1 }
 0xc31   :  { %v1807_v23 = vadd.f32 %v1797_v22, %v4843_v41 }
 0xc33   :  { %v1829_v7 = vsel %vm1180_vm15, %v1807_v23, -inf }
 0xc34   :  { %1830 = vmax.xlane.f32.xlu2 %v1829_v7 }
 0xc6f   :  { %v1810_v13 = vpop.xlane.xlu0 %1809 }
 0xc70   :  { %v1832_v9 = vsub.f32 %v1800_v29, %v1810_v13 }
 0xc72   :  { %v1840_v11 = vmul.f32 1.442695, %v1832_v9 }
 0xc74   :  { %3673 = vpow2.f32 %v1840_v11 }
 0xc77   :  { %v1813_v18 = vpop.xlane.xlu1 %1812 }
 0xc78   :  { %v1833_v46 = vsub.f32 %v1801_v53, %v1813_v18 }
 0xc7a   :  { %v3674_v14 = vpop.eup %3673  ;;  %v1842_v47 = vmul.f32 1.442695, %v1833_v46 }
 0xc7b   :  { %v1856_v50 = vsel %vm1180_vm15, %v3674_v14, 0.0 }
 0xc7c   :  { %3675 = vpow2.f32 %v1842_v47  ;;  %1857 = vadd.xlane.f32.xlu1 %v1856_v50 }
 0xc7f   :  { %v1816_v45 = vpop.xlane.xlu2 %1815 }
 0xc80   :  { %v1834_v0 = vsub.f32 %v1802_v56, %v1816_v45 }
 0xc82   :  { %v3676_v35 = vpop.eup %3675  ;;  %v1844_v28 = vmul.f32 1.442695, %v1834_v0 }
 0xc83   :  { %v1859_v41 = vsel %vm1180_vm15, %v3676_v35, 0.0 }
 0xc84   :  { %3677 = vpow2.f32 %v1844_v28  ;;  %1860 = vadd.xlane.f32.xlu0 %v1859_v41 }
 0xc87   :  { %v1819_v33 = vpop.xlane.xlu0 %1818 }
 0xc88   :  { %v1835_v54 = vsub.f32 %v1803_v43, %v1819_v33 }
 0xc8a   :  { %v3678_v3 = vpop.eup %3677  ;;  %v1846_v6 = vmul.f32 1.442695, %v1835_v54 }
 0xc8b   :  { %v1862_v40 = vsel %vm1180_vm15, %v3678_v3, 0.0 }
 0xc8c   :  { %3679 = vpow2.f32 %v1846_v6  ;;  %1863 = vadd.xlane.f32.xlu1 %v1862_v40 }
 0xc8f   :  { %v1822_v5 = vpop.xlane.xlu1 %1821 }
 0xc90   :  { %v1836_v1 = vsub.f32 %v1804_v58, %v1822_v5 }
 0xc92   :  { %v3680_v51 = vpop.eup %3679  ;;  %v1848_v29 = vmul.f32 1.442695, %v1836_v1 }
 0xc93   :  { %v1865_v39 = vsel %vm1180_vm15, %v3680_v51, 0.0 }
 0xc94   :  { %3681 = vpow2.f32 %v1848_v29  ;;  %1866 = vadd.xlane.f32.xlu2 %v1865_v39 }
 0xc97   :  { %v1825_v2 = vpop.xlane.xlu2 %1824 }
 0xc98   :  { %v1837_v53 = vsub.f32 %v1805_v12, %v1825_v2 }
 0xc9a   :  { %v3682_v57 = vpop.eup %3681  ;;  %v1850_v55 = vmul.f32 1.442695, %v1837_v53 }
 0xc9b   :  { %v1868_v56 = vsel %vm1180_vm15, %v3682_v57, 0.0 }
 0xc9c   :  { %3683 = vpow2.f32 %v1850_v55  ;;  %1869 = vadd.xlane.f32.xlu0 %v1868_v56 }
 0xc9f   :  { %v1828_v10 = vpop.xlane.xlu0 %1827 }
 0xca0   :  { %v1838_v61 = vsub.f32 %v1806_v37, %v1828_v10 }
 0xca2   :  { %v3684_v43 = vpop.eup %3683  ;;  %v1852_v60 = vmul.f32 1.442695, %v1838_v61 }
 0xca3   :  { %v1871_v34 = vsel %vm1180_vm15, %v3684_v43, 0.0 }
 0xca4   :  { %3685 = vpow2.f32 %v1852_v60  ;;  %1872 = vadd.xlane.f32.xlu1 %v1871_v34 }
 0xca7   :  { %v1831_v58 = vpop.xlane.xlu2 %1830 }
 0xca8   :  { %v1839_v63 = vsub.f32 %v1807_v23, %v1831_v58 }
 0xcaa   :  { %v3686_v32 = vpop.eup %3685  ;;  %v1854_v8 = vmul.f32 1.442695, %v1839_v63 }
 0xcab   :  { %v1874_v12 = vsel %vm1180_vm15, %v3686_v32, 0.0 }
 0xcac   :  { %3687 = vpow2.f32 %v1854_v8  ;;  %1875 = vadd.xlane.f32.xlu2 %v1874_v12  ;;  %v3766_v8 = vld [vmem:[%s5383_s8 + $0x30] sm:$0xff]  ;;  %v3767_v12 = vld [vmem:[%s5383_s8 + $0x28] sm:$0xff] }
 0xcb2   :  { %v3688_v59 = vpop.eup %3687 }
 0xcb3   :  { %v1877_v21 = vsel %vm1180_vm15, %v3688_v59, 0.0 }
 0xcb4   :  { %1878 = vadd.xlane.f32.xlu0 %v1877_v21  ;;  %v3769_v21 = vld [vmem:[%s5383_s8 + $0x18] sm:$0xff] }
 0xcef   :  { %v1858_v22 = vpop.xlane.xlu1 %1857 }
 0xcf0   :  { %3689 = vrcp.f32 %v1858_v22  ;;  %v3770_v22 = vld [vmem:[%s5383_s8 + $0x10] sm:$0xff] }
 0xcf6   :  { %v3690_v37 = vpop.eup %3689 }
 0xcf7   :  { %v1888_v7 = vmul.f32 %v3690_v37, %v3674_v14  ;;  %v1861_v13 = vpop.xlane.xlu0 %1860  ;;  %v3771_v37 = vld [vmem:[%s5382_s7] sm:$0xff] }
 0xcf8   :  { %3691 = vrcp.f32 %v1861_v13 }
 0xcf9   :  { %3441 = vmatmul.msk.f32.vlgmr.msra.gmra.mxu0 %vm1180_vm15, %v1888_v7 }
 0xcfe   :  { %v3692_v9 = vpop.eup %3691 }
 0xcff   :  { %v1864_v23 = vpop.xlane.xlu1 %1863  ;;  %v1889_v11 = vmul.f32 %v3692_v9, %v3676_v35 }
 0xd00   :  { %3693 = vrcp.f32 %v1864_v23 }
 0xd01   :  { %3442 = vmatmul.msk.f32.gmra.mxu0 %vm1180_vm15, %v1889_v11 }
 0xd06   :  { %v3694_v18 = vpop.eup %3693 }
 0xd07   :  { %v1867_v46 = vpop.xlane.xlu2 %1866  ;;  %v1890_v47 = vmul.f32 %v3694_v18, %v3678_v3 }
 0xd08   :  { %3695 = vrcp.f32 %v1867_v46  ;;  %v3590_v46 = vld [vmem:[%s5386_s4 + $0x30] sm:$0xff] }
 0xd09   :  { %3443 = vmatmul.msk.f32.gmra.mxu0 %vm1180_vm15, %v1890_v47  ;;  %v3589_v47 = vld [vmem:[%s5386_s4 + $0x28] sm:$0xff] }
 0xd0e   :  { %v3696_v50 = vpop.eup %3695 }
 0xd0f   :  { %v1870_v45 = vpop.xlane.xlu0 %1869  ;;  %v1891_v0 = vmul.f32 %v3696_v50, %v3680_v51 }
 0xd10   :  { %3697 = vrcp.f32 %v1870_v45 }
 0xd11   :  { %3444 = vmatmul.msk.f32.gmra.mxu0 %vm1180_vm15, %v1891_v0 }
 0xd16   :  { %v3698_v14 = vpop.eup %3697 }
 0xd17   :  { %v1873_v28 = vpop.xlane.xlu1 %1872  ;;  %v1892_v41 = vmul.f32 %v3698_v14, %v3682_v57 }
 0xd18   :  { %3699 = vrcp.f32 %v1873_v28 }
 0xd19   :  { %3445 = vmatmul.msk.f32.gmra.mxu0 %vm1180_vm15, %v1892_v41 }
 0xd1e   :  { %v3700_v35 = vpop.eup %3699 }
 0xd1f   :  { %v1876_v33 = vpop.xlane.xlu2 %1875  ;;  %v1893_v54 = vmul.f32 %v3700_v35, %v3684_v43 }
 0xd20   :  { %3701 = vrcp.f32 %v1876_v33 }
 0xd21   :  { %3446 = vmatmul.msk.f32.gmra.mxu0 %vm1180_vm15, %v1893_v54 }
 0xd26   :  { %v3702_v3 = vpop.eup %3701 }
 0xd27   :  { %v1879_v6 = vpop.xlane.xlu0 %1878  ;;  %v1894_v40 = vmul.f32 %v3702_v3, %v3686_v32  ;;  %v3765_v32 = vld [vmem:[%s5383_s8 + $0x38] sm:$0xff] }
 0xd28   :  { %3703 = vrcp.f32 %v1879_v6  ;;  %v3587_v6 = vld [vmem:[%s5386_s4 + $0x18] sm:$0xff] }
 0xd29   :  { %3447 = vmatmul.msk.f32.gmra.mxu0 %vm1180_vm15, %v1894_v40 }
 0xd2e   :  { %v3704_v5 = vpop.eup %3703 }
 0xd2f   :  { %v1895_v1 = vmul.f32 %v3704_v5, %v3688_v59  ;;  %v3768_v59 = vld [vmem:[%s5383_s8 + $0x20] sm:$0xff] }
 0xd31   :  { %3448 = vmatmul.msk.f32.gmra.mxu0 %vm1180_vm15, %v1895_v1 }
 0xd76   :  { %v1937_v51 = vpop.f32.mrf.mxu0 }
 0xd7e   :  { %v1940_v29 = vpop.f32.mrf.mxu0 }
 0xd7f   :  { %v1962_v63 = vmul.f32 %v1940_v29, %v4679_v49  ;;  %v3762_v49 = vld [vmem:[%s5383_s8 + $0x50] sm:$0xff] }
 0xd86   :  { %v1943_v39 = vpop.f32.mrf.mxu0 }
 0xd87   :  { %v1963_v58 = vmul.f32 %v1943_v39, %v4667_v16  ;;  %v3761_v16 = vld [vmem:[%s5383_s8 + $0x58] sm:$0xff] }
 0xd8e   :  { %v1946_v2 = vpop.f32.mrf.mxu0 }
 0xd8f   :  { %v1964_v34 = vmul.f32 %v1946_v2, %v4654_v48  ;;  %v3760_v48 = vld [vmem:[%s5383_s8 + $0x60] sm:$0xff] }
 0xd96   :  { %v1949_v53 = vpop.f32.mrf.mxu0 }
 0xd97   :  { %v1965_v60 = vmul.f32 %v1949_v53, %v4642_v31  ;;  %v3759_v31 = vld [vmem:[%s5383_s8 + $0x68] sm:$0xff] }
 0xd9e   :  { %v1952_v57 = vpop.f32.mrf.mxu0 }
 0xd9f   :  { %v1966_v43 = vmul.f32 %v1952_v57, %v4628_v38  ;;  %v3758_v38 = vld [vmem:[%s5383_s8 + $0x70] sm:$0xff] }
 0xda6   :  { %v1955_v55 = vpop.f32.mrf.mxu0 }
 0xda7   :  { %v1967_v61 = vmul.f32 %v1955_v55, %v4616_v42  ;;  %v3757_v42 = vld [vmem:[%s5383_s8 + $0x78] sm:$0xff] }
 0xdae   :  { %v1958_v56 = vpop.f32.mrf.mxu0 }
 0xdaf   :  { %v1968_v10 = vmul.f32 %v1958_v56, %v4606_v4  ;;  %v1961_v4 = vmul.f32 %v1937_v51, %v4686_v26  ;;  %v3763_v26 = vld [vmem:[%s5383_s8 + $0x48] sm:$0xff]  ;;  %v5019_v56 = vld [vmem:[%s5387_s16] sm:$0xff] }
 0xdb1   :  { %1977 = vmatpush.msra.mxu2 %v1968_v10  ;;  %v5027_v10 = vld [vmem:[%s5387_s16 + $0x8] sm:$0xff] }
 0xdb3   :  { %1978 = vmatpush.msra.mxu2 %v1967_v61  ;;  %v3586_v61 = vld [vmem:[%s5386_s4 + $0x10] sm:$0xff] }
 0xdb5   :  { %1979 = vmatpush.msra.mxu2 %v1966_v43  ;;  %v3585_v43 = vld [vmem:[%s5386_s4 + $0x8] sm:$0xff] }
 0xdb7   :  { %1980 = vmatpush.msra.mxu2 %v1965_v60 }
 0xdb9   :  { %1981 = vmatpush.msra.mxu2 %v1964_v34  ;;  %v3584_v34 = vld [vmem:[%s5386_s4] sm:$0xff] }
 0xdbb   :  { %1982 = vmatpush.msra.mxu2 %v1963_v58  ;;  %v5043_v58 = vld [vmem:[%s5388_s10] sm:$0xf] }
 0xdbc   :  { %3486 = vmatpush.msk.msrb.mxu0 %vm2197_vm6, %v5043_v58 }
 0xdbd   :  { %1983 = vmatpush.msra.mxu2 %v1962_v63 }
 0xdbe   :  { %3491 = vmatpush.msk.msra.mxu0 %vm2197_vm6, %v5043_v58 }
 0xdbf   :  { %1984 = vmatpush.msra.mxu2 %v1961_v4 }
 0xdc0   :  { %3449 = vmatmul.msk.f32.vlgmr.msra.gmra.mxu2 %vm1237_vm4, %v4697_v36  ;;  %v3764_v36 = vld [vmem:[%s5383_s8 + $0x40] sm:$0xff] }
 0xdc1   :  { %1990 = vmatpush.msrb.mxu2 %v3757_v42  ;;  %v2096_v42 = vld [vmem:[%s5389_s9] sm:$0xff] }
 0xdc3   :  { %1991 = vmatpush.msrb.mxu2 %v3758_v38  ;;  %v2097_v38 = vld [vmem:[%s5389_s9 + $0x8] sm:$0xff] }
 0xdc5   :  { %1992 = vmatpush.msrb.mxu2 %v3759_v31 }
 0xdc7   :  { %1993 = vmatpush.msrb.mxu2 %v3760_v48 }
 0xdc9   :  { %1994 = vmatpush.msrb.mxu2 %v3761_v16 }
 0xdcb   :  { %1995 = vmatpush.msrb.mxu2 %v3762_v49 }
 0xdcd   :  { %1996 = vmatpush.msrb.mxu2 %v3763_v26  ;;  %v5060_v26 = vld [vmem:[%s5390_s11 + $0x38] sm:$0xff] }
 0xdce   :  { %2367 = vmatpush.msrb.mxu1 %v5060_v26 }
 0xdcf   :  { %1997 = vmatpush.msrb.mxu2 %v3764_v36  ;;  %v5065_v36 = vld [vmem:[%s5390_s11 + $0x30] sm:$0xff] }
 0xdd0   :  { %2368 = vmatpush.msrb.mxu1 %v5065_v36 }
 0xdd1   :  { %1998 = vmatpush.msrb.mxu2 %v3765_v32  ;;  %v5072_v32 = vld [vmem:[%s5390_s11 + $0x28] sm:$0xff] }
 0xdd2   :  { %2369 = vmatpush.msrb.mxu1 %v5072_v32 }
 0xdd3   :  { %1999 = vmatpush.msrb.mxu2 %v3766_v8  ;;  %v5079_v8 = vld [vmem:[%s5390_s11 + $0x20] sm:$0xff] }
 0xdd4   :  { %2370 = vmatpush.msrb.mxu1 %v5079_v8 }
 0xdd5   :  { %2000 = vmatpush.msrb.mxu2 %v3767_v12  ;;  %v5086_v12 = vld [vmem:[%s5390_s11 + $0x18] sm:$0xff] }
 0xdd6   :  { %2371 = vmatpush.msrb.mxu1 %v5086_v12 }
 0xdd7   :  { %2001 = vmatpush.msrb.mxu2 %v3768_v59  ;;  %v5093_v59 = vld [vmem:[%s5390_s11 + $0x10] sm:$0xff] }
 0xdd8   :  { %2372 = vmatpush.msrb.mxu1 %v5093_v59 }
 0xdd9   :  { %2002 = vmatpush.msrb.mxu2 %v3769_v21 }
 0xddb   :  { %2003 = vmatpush.msrb.mxu2 %v3770_v22 }
 0xddd   :  { %2004 = vmatpush.msrb.mxu2 %v4704_v27  ;;  %v3591_v27 = vld [vmem:[%s5386_s4 + $0x38] sm:$0xff] }
 0xdde   :  { %2165 = vmatpush.bf16.msrb.mxu3 %v3591_v27 }
 0xddf   :  { %2005 = vmatpush.msrb.mxu2 %v4709_v17  ;;  %v2190_v17 = vsel %vm2189_vm9, 1.0, %v3778_v24  ;;  %v3588_v24 = vld [vmem:[%s5386_s4 + $0x20] sm:$0xff]  ;;  %s3779_s4 = smov 64  }
 0xde0   :  { %2191 = vadd.xlane.f32.xlu1 %v2190_v17 }
 0xde1   :  { %2028 = vmatpush.msra.mxu2 %v3771_v37 }
 0xde2   :  { %2166 = vmatpush.bf16.msrb.mxu3 %v3590_v46 }
 0xde6   :  { %2167 = vmatpush.bf16.msrb.mxu3 %v3589_v47 }
 0xdea   :  { %2168 = vmatpush.bf16.msrb.mxu3 %v3588_v24 }
 0xdee   :  { %2169 = vmatpush.bf16.msrb.mxu3 %v3587_v6 }
 0xdf2   :  { %2170 = vmatpush.bf16.msrb.mxu3 %v3586_v61 }
 0xdf6   :  { %2171 = vmatpush.bf16.msrb.mxu3 %v3585_v43 }
 0xdfa   :  { %2172 = vmatpush.bf16.msrb.mxu3 %v3584_v34 }
 0xdfe   :  { %2261 = vmatpush.msra.mxu3 %v5060_v26 }
 0xe00   :  { %2262 = vmatpush.msra.mxu3 %v5065_v36 }
 0xe02   :  { %2263 = vmatpush.msra.mxu3 %v5072_v32 }
 0xe04   :  { %2264 = vmatpush.msra.mxu3 %v5079_v8 }
 0xe06   :  { %2265 = vmatpush.msra.mxu3 %v5086_v12 }
 0xe08   :  { %2266 = vmatpush.msra.mxu3 %v5093_v59 }
 0xe43   :  { %v1986_v7 = vpop.f32.mrf.mxu2 }
 0xe44   :  { %v1989_v13 = vmul.f32 %v1986_v7, %v1986_v7 }
 0xe46   :  { %2006 = vmatmul.f32.vlgmr.msrb.gmra.mxu2 %v1989_v13 }
 0xe53   :  { %v2192_v60 = vpop.xlane.xlu1 %2191 }
 0xec9   :  { %v2007_v9 = vpop.f32.mrf.mxu2 }
 0xeca   :  { %3450 = vmatmul.msk.f32.vlgmr.msra.gmra.mxu2 %vm1180_vm15, %v2007_v9 }
 0xf4d   :  { %v2030_v23 = vpop.f32.mrf.mxu2 }
 0xf4e   :  { %v2034_v11 = vadd.f32 1e-07, %v2030_v23  ;;  %v2046_v18 = vadd.f32 1.0, %v2030_v23  ;;  %v2033_v51 = vmul.f32 %v2030_v23, %v1986_v7  ;;  %v5108_v23 = vld [vmem:[%s5391_s15] sm:$0x3]  ;;  %s3781_s15 = smov 5  }
 0xf50   :  { %3705 = vrsqrt.f32 %v2034_v11  ;;  %v2058_v3 = vand.u32 2147483648, %v2046_v18  ;;  %vm2052_vm11 = vweird.f32 %v2046_v18  ;;  %v2056_v5 = vand.u32 2147483647, %v2046_v18 }
 0xf51   :  { %3707 = vrcp.f32 %v2046_v18  ;;  %vm2041_vm14 = vweird.f32 %v2034_v11 }
 0xf52   :  { %v2059_v2 = vor.u32 1.1754944e-38, %v2058_v3  ;;  %vm2057_vm5 = vcmp.eq.f32.partialorder %v2056_v5, 8.507059e+37  ;;  %3709 = vrcp.f32 %v2192_v60 }
 0xf56   :  { %v3706_v50 = vpop.eup %3705 }
 0xf57   :  { %v3708_v45 = vpop.eup %3707  ;;  %v2036_v0 = vmul.f32 %v3706_v50, %v2034_v11  ;;  %vm2042_vm10 = vweird.f32 %v3706_v50  ;;  %v5115_v11 = vld [vmem:[%s5390_s11 + $0x8] sm:$0xff] }
 0xf58   :  { %v2048_v14 = vmul.f32 %v3708_v45, %v2046_v18  ;;  %vm2053_vm15 = vweird.f32 %v3708_v45  ;;  %vm2043_vm3 = vmor %vm2041_vm14, %vm2042_vm10  ;;  %v3710_v63 = vpop.eup %3709  ;;  %v5120_v18 = vld [vmem:[%s5390_s11] sm:$0xff]  ;;  %2267 = vmatpush.msra.mxu3 %v5115_v11  ;;  %2373 = vmatpush.msrb.mxu1 %v5115_v11 }
 0xf59   :  { %v2037_v28 = vmul.f32 %v3706_v50, %v2036_v0  ;;  %vm2054_vm2 = vmor %vm2052_vm11, %vm2053_vm15  ;;  %3487 = vmatmul.msk.f32.vlgmr.msrb.gmra.mxu0 %vm2189_vm9, %v3710_v63 }
 0xf5a   :  { %v2049_v41 = vsub.f32 1.0, %v2048_v14  ;;  %2268 = vmatpush.msra.mxu3 %v5120_v18  ;;  %2374 = vmatpush.msrb.mxu1 %v5120_v18 }
 0xf5b   :  { %v2038_v35 = vmul.f32 0.5, %v2037_v28 }
 0xf5c   :  { %v2050_v33 = vmul.f32 %v3708_v45, %v2049_v41 }
 0xf5d   :  { %v2039_v54 = vsub.f32 1.5, %v2038_v35 }
 0xf5e   :  { %v2051_v40 = vadd.f32 %v3708_v45, %v2050_v33 }
 0xf5f   :  { %v2040_v1 = vmul.f32 %v3706_v50, %v2039_v54 }
 0xf60   :  { %v2055_v29 = vsel %vm2054_vm2, %v3708_v45, %v2051_v40 }
 0xf61   :  { %v2044_v39 = vsel %vm2043_vm3, %v3706_v50, %v2040_v1  ;;  %v2060_v57 = vsel %vm2057_vm5, %v2059_v2, %v2055_v29  ;;  %3488 = vmatmul.msk.f32.gmra.mxu0 %vm2189_vm9, %v3710_v63 }
 0xf62   :  { %v2045_v53 = vmul.f32 %v2044_v39, %v2033_v51 }
 0xf64   :  { %v2061_v55 = vmul.f32 %v2060_v57, %v2045_v53 }
 0xf66   :  { %3451 = vmatpush.msk.msrb.mxu2 %vm1359_vm12, %v2061_v55 }
 0xf67   :  { %3452 = vmatmul.msk.f32.vlgmr.msrb.gmra.mxu2 %vm1334_vm13, %v5019_v56 }
 0xf6f   :  { %3453 = vmatmul.msk.f32.gmra.mxu2 %vm1334_vm13, %v5027_v10 }
 0xfd6   :  { %v2218_v21 = vpop.f32.mrf.mxu0 }
 0xfde   :  { %v2221_v7 = vpop.f32.mrf.mxu0 }
 0xfea   :  { %v2090_v4 = vpop.f32.mrf.mxu2 }
 0xfeb   :  { %v2098_v48 = vmul.f32 %v2096_v42, %v2090_v4 }
 0xff2   :  { %v2093_v31 = vpop.f32.mrf.mxu2 }
 0xff3   :  { %v2099_v16 = vmul.f32 %v2097_v38, %v2093_v31 }
 0xff5   :  { %v2100_v49 = vpack.c.bf16 %v2099_v16, %v2098_v48 }
 0xff7   :  { %2173 = vmatmul.bf16.vlgmr.msrb.gmra.mxu3 %v2100_v49 }
 0xff8   :  { %3498 = vmatpush.msk.msrb.mxu3 %vm2197_vm6, %v5043_v58 }
0x107a   :  { %v5099_v22 = vpop.f32.mrf.mxu3 }
0x107b   :  { %v2224_v9 = vmul.f32 %v2218_v21, %v5099_v22 }
0x1082   :  { %v5101_v37 = vpop.f32.mrf.mxu3 }
0x1083   :  { %v2225_v13 = vmul.f32 %v2221_v7, %v5101_v37 }
0x1085   :  { %2243 = vmatpush.msra.mxu2 %v2225_v13 }
0x1087   :  { %2244 = vmatpush.msra.mxu2 %v2224_v9 }
0x1088   :  { %3489 = vmatmul.msk.f32.vlgmr.msra.gmra.mxu2 %vm73_vm0, %v5108_v23 }
0x110b   :  { %v2246_v27 = vpop.f32.mrf.mxu2 }
0x110c   :  { %v2249_v17 = vmul.f32 %v2246_v27, %v2246_v27 }
0x110e   :  { %3490 = vmatmul.msk.f32.vlgmr.msra.gmra.mxu3 %vm1237_vm4, %v2249_v17 }
0x110f   :  { %2573 = vmatpush.msra.mxu3 %v5060_v26 }
0x1111   :  { %2574 = vmatpush.msra.mxu3 %v5065_v36 }
0x1113   :  { %2575 = vmatpush.msra.mxu3 %v5072_v32 }
0x1115   :  { %2576 = vmatpush.msra.mxu3 %v5079_v8 }
0x1117   :  { %2577 = vmatpush.msra.mxu3 %v5086_v12 }
0x1119   :  { %2578 = vmatpush.msra.mxu3 %v5093_v59 }
0x111b   :  { %2579 = vmatpush.msra.mxu3 %v5115_v11 }
0x111d   :  { %2580 = vmatpush.msra.mxu3 %v5120_v18 }
0x1191   :  { %v2270_v46 = vpop.f32.mrf.mxu3 }
0x1192   :  { %3492 = vmatmul.msk.f32.vlgmr.msra.gmra.mxu0 %vm2189_vm9, %v2270_v46 }
0x120f   :  { %v2293_v47 = vpop.f32.mrf.mxu0 }
0x1210   :  { %v2297_v50 = vadd.f32 1e-07, %v2293_v47  ;;  %v2309_v45 = vadd.f32 1.0, %v2293_v47  ;;  %v2296_v51 = vmul.f32 %v2293_v47, %v2246_v27 }
0x1212   :  { %3711 = vrsqrt.f32 %v2297_v50  ;;  %v2321_v6 = vand.u32 2147483648, %v2309_v45  ;;  %vm2315_vm15 = vweird.f32 %v2309_v45  ;;  %v2319_v5 = vand.u32 2147483647, %v2309_v45 }
0x1213   :  { %3713 = vrcp.f32 %v2309_v45  ;;  %vm2304_vm10 = vweird.f32 %v2297_v50 }
0x1214   :  { %v2322_v2 = vor.u32 1.1754944e-38, %v2321_v6  ;;  %vm2320_vm2 = vcmp.eq.f32.partialorder %v2319_v5, 8.507059e+37 }
0x1218   :  { %v3712_v0 = vpop.eup %3711 }
0x1219   :  { %v3714_v14 = vpop.eup %3713  ;;  %v2299_v28 = vmul.f32 %v3712_v0, %v2297_v50  ;;  %vm2305_vm8 = vweird.f32 %v3712_v0 }
0x121a   :  { %v2311_v24 = vmul.f32 %v3714_v14, %v2309_v45  ;;  %vm2316_vm7 = vweird.f32 %v3714_v14  ;;  %vm2306_vm14 = vmor %vm2304_vm10, %vm2305_vm8 }
0x121b   :  { %v2300_v41 = vmul.f32 %v3712_v0, %v2299_v28  ;;  %vm2317_vm11 = vmor %vm2315_vm15, %vm2316_vm7 }
0x121c   :  { %v2312_v35 = vsub.f32 1.0, %v2311_v24 }
0x121d   :  { %v2301_v33 = vmul.f32 0.5, %v2300_v41 }
0x121e   :  { %v2313_v54 = vmul.f32 %v3714_v14, %v2312_v35 }
0x121f   :  { %v2302_v3 = vsub.f32 1.5, %v2301_v33 }
0x1220   :  { %v2314_v40 = vadd.f32 %v3714_v14, %v2313_v54 }
0x1221   :  { %v2303_v1 = vmul.f32 %v3712_v0, %v2302_v3 }
0x1222   :  { %v2318_v29 = vsel %vm2317_vm11, %v3714_v14, %v2314_v40 }
0x1223   :  { %v2307_v39 = vsel %vm2306_vm14, %v3712_v0, %v2303_v1  ;;  %v2323_v57 = vsel %vm2320_vm2, %v2322_v2, %v2318_v29 }
0x1224   :  { %v2308_v53 = vmul.f32 %v2307_v39, %v2296_v51 }
0x1226   :  { %v2324_v55 = vmul.f32 %v2323_v57, %v2308_v53 }
0x1228   :  { %3493 = vmatpush.msk.msrb.mxu2 %vm1359_vm12, %v2324_v55 }
0x1229   :  { %3494 = vmatmul.msk.f32.vlgmr.msrb.gmra.mxu2 %vm1334_vm13, %v5019_v56 }
0x122a   :  { %2467 = vmatpush.msra.mxu2 %v5060_v26 }
0x122c   :  { %2468 = vmatpush.msra.mxu2 %v5065_v36 }
0x122e   :  { %2469 = vmatpush.msra.mxu2 %v5072_v32 }
0x1230   :  { %2470 = vmatpush.msra.mxu2 %v5079_v8 }
0x1231   :  { %3495 = vmatmul.msk.f32.gmra.mxu2 %vm1334_vm13, %v5027_v10 }
0x1232   :  { %2471 = vmatpush.msra.mxu2 %v5086_v12 }
0x1234   :  { %2472 = vmatpush.msra.mxu2 %v5093_v59 }
0x1236   :  { %2473 = vmatpush.msra.mxu2 %v5115_v11 }
0x1238   :  { %2474 = vmatpush.msra.mxu2 %v5120_v18 }
0x12ac   :  { %v2345_v61 = vpop.f32.mrf.mxu2 }
0x12ad   :  { %v2351_v43 = vmul.f32 %v2345_v61, %v5099_v22 }
0x12af   :  { %3496 = vmatmul.msk.f32.vlgmr.msrb.gmra.mxu1 %vm1237_vm4, %v2351_v43 }
0x12b4   :  { %v2348_v60 = vpop.f32.mrf.mxu2 }
0x12b5   :  { %v2352_v34 = vmul.f32 %v2348_v60, %v5101_v37 }
0x12b7   :  { %3497 = vmatmul.msk.f32.gmra.mxu1 %vm1237_vm4, %v2352_v34 }
0x132c   :  { %v5155_v63 = vpop.f32.mrf.mxu1 }
0x132d   :  { %v2382_v4 = vsel %vm2189_vm9, %v5155_v63, -inf }
0x132e   :  { %2383 = vmax.xlane.f32.xlu2 %v2382_v4 }
0x1334   :  { %v5159_v42 = vpop.f32.mrf.mxu1 }
0x1335   :  { %v2385_v38 = vsel %vm2189_vm9, %v5159_v42, -inf }
0x1336   :  { %2386 = vmax.xlane.f32.xlu0 %v2385_v38 }
0x13a1   :  { %v2384_v31 = vpop.xlane.xlu2 %2383 }
0x13a2   :  { %v2388_v48 = vsub.f32 %v5155_v63, %v2384_v31 }
0x13a4   :  { %v2390_v16 = vmul.f32 1.442695, %v2388_v48 }
0x13a6   :  { %3715 = vpow2.f32 %v2390_v16 }
0x13a9   :  { %v2387_v49 = vpop.xlane.xlu0 %2386 }
0x13aa   :  { %v2389_v21 = vsub.f32 %v5159_v42, %v2387_v49 }
0x13ac   :  { %v3716_v7 = vpop.eup %3715  ;;  %v2392_v13 = vmul.f32 1.442695, %v2389_v21 }
0x13ad   :  { %v2394_v9 = vsel %vm2189_vm9, %v3716_v7, 0.0 }
0x13ae   :  { %3717 = vpow2.f32 %v2392_v13  ;;  %2395 = vadd.xlane.f32.xlu1 %v2394_v9 }
0x13b4   :  { %v3718_v27 = vpop.eup %3717 }
0x13b5   :  { %v2397_v17 = vsel %vm2189_vm9, %v3718_v27, 0.0 }
0x13b6   :  { %2398 = vadd.xlane.f32.xlu2 %v2397_v17 }
0x1421   :  { %v2396_v46 = vpop.xlane.xlu1 %2395 }
0x1422   :  { %3719 = vrcp.f32 %v2396_v46 }
0x1428   :  { %v3720_v47 = vpop.eup %3719 }
0x1429   :  { %v2402_v50 = vmul.f32 %v3720_v47, %v3716_v7  ;;  %v2399_v45 = vpop.xlane.xlu2 %2398 }
0x142a   :  { %3721 = vrcp.f32 %v2399_v45 }
0x142b   :  { %3499 = vmatmul.msk.f32.vlgmr.msrb.gmra.mxu3 %vm2189_vm9, %v2402_v50 }
0x142c   :  { %2751 = vmatpush.msrb.mxu3 %v5060_v26 }
0x142e   :  { %2752 = vmatpush.msrb.mxu3 %v5065_v36 }
0x1430   :  { %v3722_v0 = vpop.eup %3721  ;;  %2753 = vmatpush.msrb.mxu3 %v5072_v32 }
0x1431   :  { %v2403_v14 = vmul.f32 %v3722_v0, %v3718_v27 }
0x1432   :  { %2754 = vmatpush.msrb.mxu3 %v5079_v8 }
0x1433   :  { %3500 = vmatmul.msk.f32.gmra.mxu3 %vm2189_vm9, %v2403_v14 }
0x1434   :  { %2755 = vmatpush.msrb.mxu3 %v5086_v12 }
0x1436   :  { %2756 = vmatpush.msrb.mxu3 %v5093_v59 }
0x1438   :  { %2757 = vmatpush.msrb.mxu3 %v5115_v11 }
0x143a   :  { %2758 = vmatpush.msrb.mxu3 %v5120_v18 }
0x14ae   :  { %v2427_v28 = vpop.f32.mrf.mxu3 }
0x14af   :  { %v2433_v35 = vmul.f32 %v2427_v28, %v5099_v22 }
0x14b6   :  { %v2430_v24 = vpop.f32.mrf.mxu3 }
0x14b7   :  { %v2434_v41 = vmul.f32 %v2430_v24, %v5101_v37 }
0x14b9   :  { %2449 = vmatpush.msrb.mxu0 %v2434_v41 }
0x14bb   :  { %2450 = vmatpush.msrb.mxu0 %v2433_v35 }
0x14bc   :  { %3501 = vmatmul.msk.f32.vlgmr.msrb.gmra.mxu0 %vm73_vm0, %v5108_v23 }
0x14bd   :  { %3503 = vmatpush.msk.msra.mxu0 %vm2197_vm6, %v5043_v58 }
0x14bf   :  { %3510 = vmatpush.msk.msrb.mxu0 %vm2197_vm6, %v5043_v58 }
0x1539   :  { %v2452_v33 = vpop.f32.mrf.mxu0 }
0x153a   :  { %v2455_v54 = vmul.f32 %v2452_v33, %v2452_v33 }
0x153c   :  { %3502 = vmatmul.msk.f32.vlgmr.msra.gmra.mxu2 %vm1237_vm4, %v2455_v54 }
0x15bf   :  { %v2476_v3 = vpop.f32.mrf.mxu2 }
0x15c0   :  { %3504 = vmatmul.msk.f32.vlgmr.msra.gmra.mxu0 %vm2189_vm9, %v2476_v3 }
0x163d   :  { %v2499_v6 = vpop.f32.mrf.mxu0 }
0x163e   :  { %v2503_v40 = vadd.f32 1e-07, %v2499_v6  ;;  %v2515_v5 = vadd.f32 1.0, %v2499_v6  ;;  %v2502_v38 = vmul.f32 %v2499_v6, %v2452_v33 }
0x1640   :  { %3723 = vrsqrt.f32 %v2503_v40  ;;  %v2527_v43 = vand.u32 2147483648, %v2515_v5  ;;  %vm2521_vm7 = vweird.f32 %v2515_v5  ;;  %v2525_v34 = vand.u32 2147483647, %v2515_v5 }
0x1641   :  { %3725 = vrcp.f32 %v2515_v5  ;;  %vm2510_vm8 = vweird.f32 %v2503_v40 }
0x1642   :  { %v2528_v16 = vor.u32 1.1754944e-38, %v2527_v43  ;;  %vm2526_vm11 = vcmp.eq.f32.partialorder %v2525_v34, 8.507059e+37 }
0x1646   :  { %v3724_v1 = vpop.eup %3723 }
0x1647   :  { %v3726_v51 = vpop.eup %3725  ;;  %v2505_v29 = vmul.f32 %v3724_v1, %v2503_v40  ;;  %vm2511_vm5 = vweird.f32 %v3724_v1 }
0x1648   :  { %v2517_v39 = vmul.f32 %v3726_v51, %v2515_v5  ;;  %vm2522_vm3 = vweird.f32 %v3726_v51  ;;  %vm2512_vm10 = vmor %vm2510_vm8, %vm2511_vm5 }
0x1649   :  { %v2506_v2 = vmul.f32 %v3724_v1, %v2505_v29  ;;  %vm2523_vm15 = vmor %vm2521_vm7, %vm2522_vm3  ;;  %v2790_v29 = vld [vmem:[%s5392_s12 + $0x18] sm:$0xff] }
0x164a   :  { %v2518_v53 = vsub.f32 1.0, %v2517_v39  ;;  %v2789_v39 = vld [vmem:[%s5392_s12 + $0x10] sm:$0xff] }
0x164b   :  { %v2507_v57 = vmul.f32 0.5, %v2506_v2  ;;  %v2788_v2 = vld [vmem:[%s5392_s12 + $0x8] sm:$0xff] }
0x164c   :  { %v2519_v55 = vmul.f32 %v3726_v51, %v2518_v53  ;;  %v2787_v53 = vld [vmem:[%s5392_s12] sm:$0xff] }
0x164d   :  { %v2508_v61 = vsub.f32 1.5, %v2507_v57  ;;  %v2776_v57 = vld [vmem:[%s5393_s5 + $0x8] sm:$0xff] }
0x164e   :  { %v2520_v60 = vadd.f32 %v3726_v51, %v2519_v55  ;;  %v2775_v55 = vld [vmem:[%s5393_s5] sm:$0xff] }
0x164f   :  { %v2509_v4 = vmul.f32 %v3724_v1, %v2508_v61 }
0x1650   :  { %v2524_v31 = vsel %vm2523_vm15, %v3726_v51, %v2520_v60  ;;  %v2791_v51 = vld [vmem:[%s5392_s12 + $0x20] sm:$0xff] }
0x1651   :  { %v2513_v48 = vsel %vm2512_vm10, %v3724_v1, %v2509_v4  ;;  %v2529_v21 = vsel %vm2526_vm11, %v2528_v16, %v2524_v31  ;;  %v3772_v1 = vld [vmem:[%s5406_s23] sm:$0xff] }
0x1652   :  { %v2514_v49 = vmul.f32 %v2513_v48, %v2502_v38 }
0x1654   :  { %v2530_v7 = vmul.f32 %v2529_v21, %v2514_v49 }
0x1656   :  { %3505 = vmatpush.msk.msra.mxu1 %vm1359_vm12, %v2530_v7 }
0x1657   :  { %3506 = vmatmul.msk.f32.vlgmr.msra.gmra.mxu1 %vm1334_vm13, %v5019_v56 }
0x1658   :  { %2675 = vmatpush.msrb.mxu1 %v5060_v26 }
0x165a   :  { %2676 = vmatpush.msrb.mxu1 %v5065_v36 }
0x165c   :  { %2677 = vmatpush.msrb.mxu1 %v5072_v32 }
0x165e   :  { %2678 = vmatpush.msrb.mxu1 %v5079_v8 }
0x165f   :  { %3507 = vmatmul.msk.f32.gmra.mxu1 %vm1334_vm13, %v5027_v10 }
0x1660   :  { %2679 = vmatpush.msrb.mxu1 %v5086_v12 }
0x1662   :  { %2680 = vmatpush.msrb.mxu1 %v5093_v59 }
0x1664   :  { %2681 = vmatpush.msrb.mxu1 %v5115_v11 }
0x1666   :  { %2682 = vmatpush.msrb.mxu1 %v5120_v18 }
0x16d4   :  { %v2551_v56 = vpop.f32.mrf.mxu1 }
0x16d5   :  { %v2557_v26 = vmul.f32 %v2551_v56, %v5099_v22 }
0x16d7   :  { %3508 = vmatmul.msk.f32.vlgmr.msra.gmra.mxu3 %vm1237_vm4, %v2557_v26 }
0x16d8   :  { %2903 = vmatpush.msra.mxu3 %v2776_v57 }
0x16da   :  { %2904 = vmatpush.msra.mxu3 %v2775_v55 }
0x16dc   :  { %v2554_v36 = vpop.f32.mrf.mxu1 }
0x16dd   :  { %v2558_v32 = vmul.f32 %v2554_v36, %v5101_v37 }
0x16df   :  { %3509 = vmatmul.msk.f32.gmra.mxu3 %vm1237_vm4, %v2558_v32 }
0x175a   :  { %v2582_v8 = vpop.f32.mrf.mxu3 }
0x175b   :  { %v2588_v10 = vadd.f32 %v2582_v8, %v5155_v63 }
0x175d   :  { %v2590_v12 = vsel %vm2189_vm9, %v2588_v10, -inf }
0x175e   :  { %2591 = vmax.xlane.f32.xlu0 %v2590_v12 }
0x1762   :  { %v2585_v59 = vpop.f32.mrf.mxu3 }
0x1763   :  { %v2589_v11 = vadd.f32 %v2585_v59, %v5159_v42 }
0x1765   :  { %v2593_v18 = vsel %vm2189_vm9, %v2589_v11, -inf }
0x1766   :  { %2594 = vmax.xlane.f32.xlu1 %v2593_v18 }
0x177f   :  { %2783 = vrot.lane.b32.xlu1 %v3772_v1, %s3779_s4 }
0x17d1   :  { %v2592_v13 = vpop.xlane.xlu0 %2591 }
0x17d2   :  { %v2596_v9 = vsub.f32 %v2588_v10, %v2592_v13 }
0x17d4   :  { %v2598_v27 = vmul.f32 1.442695, %v2596_v9 }
0x17d6   :  { %3727 = vpow2.f32 %v2598_v27 }
0x17d9   :  { %v2595_v17 = vpop.xlane.xlu1 %2594 }
0x17da   :  { %v2597_v46 = vsub.f32 %v2589_v11, %v2595_v17 }
0x17dc   :  { %v3728_v47 = vpop.eup %3727  ;;  %v2600_v50 = vmul.f32 1.442695, %v2597_v46  ;;  %v2778_v46 = vld [vmem:[%s5393_s5 + $0x18] sm:$0xff] }
0x17dd   :  { %v2602_v45 = vsel %vm2189_vm9, %v3728_v47, 0.0 }
0x17de   :  { %3729 = vpow2.f32 %v2600_v50  ;;  %2603 = vadd.xlane.f32.xlu2 %v2602_v45 }
0x17e4   :  { %v3730_v63 = vpop.eup %3729 }
0x17e5   :  { %v2605_v0 = vsel %vm2189_vm9, %v3730_v63, 0.0 }
0x17e6   :  { %2606 = vadd.xlane.f32.xlu0 %v2605_v0  ;;  %v2780_v0 = vld [vmem:[%s5393_s5 + $0x28] sm:$0xff] }
0x17f1   :  { %v2784_v13 = vpop.permute.xlu1 %2783 }
0x1851   :  { %v2604_v42 = vpop.xlane.xlu2 %2603 }
0x1852   :  { %3731 = vrcp.f32 %v2604_v42  ;;  %v2779_v42 = vld [vmem:[%s5393_s5 + $0x20] sm:$0xff] }
0x1858   :  { %v3732_v14 = vpop.eup %3731 }
0x1859   :  { %v2610_v28 = vmul.f32 %v3732_v14, %v3728_v47  ;;  %v2607_v24 = vpop.xlane.xlu0 %2606  ;;  %v2777_v47 = vld [vmem:[%s5393_s5 + $0x10] sm:$0xff] }
0x185a   :  { %3733 = vrcp.f32 %v2607_v24  ;;  %v2781_v24 = vld [vmem:[%s5393_s5 + $0x30] sm:$0xff] }
0x185b   :  { %3511 = vmatmul.msk.f32.vlgmr.msrb.gmra.mxu0 %vm2189_vm9, %v2610_v28 }
0x1860   :  { %v3734_v41 = vpop.eup %3733 }
0x1861   :  { %v2611_v35 = vmul.f32 %v3734_v41, %v3730_v63  ;;  %v2844_v63 = vld [vmem:[%s5394_s17 + $0x18] sm:$0xff]  ;;  %v2918_v41 = vperm.slane %v2781_v24, 0 }
0x1863   :  { %3512 = vmatmul.msk.f32.gmra.mxu0 %vm2189_vm9, %v2611_v35 }
0x18d8   :  { %v2635_v33 = vpop.f32.mrf.mxu0 }
0x18d9   :  { %v2641_v6 = vmul.f32 %v2635_v33, %v5099_v22  ;;  %v2794_v22 = vld [vmem:[%s5392_s12 + $0x38] sm:$0xff] }
0x18da   :  { %2806 = vmatpush.msra.mxu0 %v2794_v22 }
0x18e0   :  { %v2638_v54 = vpop.f32.mrf.mxu0 }
0x18e1   :  { %v2642_v3 = vmul.f32 %v2638_v54, %v5101_v37 }
0x18e3   :  { %2657 = vmatpush.msrb.mxu2 %v2642_v3 }
0x18e5   :  { %2658 = vmatpush.msrb.mxu2 %v2641_v6 }
0x18e6   :  { %3513 = vmatmul.msk.f32.vlgmr.msrb.gmra.mxu2 %vm73_vm0, %v5108_v23  ;;  %v2792_v23 = vld [vmem:[%s5392_s12 + $0x28] sm:$0xff] }
0x18e7   :  { %3515 = vmatpush.msk.msra.mxu2 %vm2197_vm6, %v5043_v58  ;;  %v2793_v58 = vld [vmem:[%s5392_s12 + $0x30] sm:$0xff] }
0x18e8   :  { %2807 = vmatpush.msra.mxu0 %v2793_v58 }
0x18e9   :  { %2835 = vmatpush.msrb.mxu2 %v2778_v46 }
0x18ea   :  { %2808 = vmatpush.msra.mxu0 %v2792_v23 }
0x18eb   :  { %2836 = vmatpush.msrb.mxu2 %v2777_v47 }
0x18ec   :  { %2809 = vmatpush.msra.mxu0 %v2791_v51 }
0x18ee   :  { %2810 = vmatpush.msra.mxu0 %v2790_v29 }
0x18f0   :  { %2811 = vmatpush.msra.mxu0 %v2789_v39 }
0x18f2   :  { %2812 = vmatpush.msra.mxu0 %v2788_v2 }
0x18f4   :  { %2813 = vmatpush.msra.mxu0 %v2787_v53  ;;  %v66_v53 = vld [vmem:[%s5406_s23 + $0x20] sm:$0xff] }
0x18f6   :  { %2954 = vmatpush.msrb.mxu0 %v2780_v0 }
0x18f8   :  { %2955 = vmatpush.msrb.mxu0 %v2779_v42 }
0x1969   :  { %v2660_v40 = vpop.f32.mrf.mxu2 }
0x196a   :  { %v2663_v5 = vmul.f32 %v2660_v40, %v2660_v40 }
0x196c   :  { %3514 = vmatmul.msk.f32.vlgmr.msrb.gmra.mxu1 %vm1237_vm4, %v2663_v5 }
0x19e9   :  { %v2684_v37 = vpop.f32.mrf.mxu1 }
0x19ea   :  { %3516 = vmatmul.msk.f32.vlgmr.msra.gmra.mxu2 %vm2189_vm9, %v2684_v37 }
0x1a6d   :  { %v2707_v61 = vpop.f32.mrf.mxu2 }
0x1a6e   :  { %v2711_v43 = vadd.f32 1e-07, %v2707_v61  ;;  %v2723_v60 = vadd.f32 1.0, %v2707_v61  ;;  %v2710_v8 = vmul.f32 %v2707_v61, %v2660_v40  ;;  %v3119_v61 = vperm.slane %v66_v53, 0 }
0x1a70   :  { %3735 = vrsqrt.f32 %v2711_v43  ;;  %v2735_v56 = vand.u32 2147483648, %v2723_v60  ;;  %vm2729_vm2 = vweird.f32 %v2723_v60  ;;  %v2733_v36 = vand.u32 2147483647, %v2723_v60 }
0x1a71   :  { %3737 = vrcp.f32 %v2723_v60  ;;  %vm2718_vm3 = vweird.f32 %v2711_v43 }
0x1a72   :  { %v2736_v59 = vor.u32 1.1754944e-38, %v2735_v56  ;;  %vm2734_vm8 = vcmp.eq.f32.partialorder %v2733_v36, 8.507059e+37 }
0x1a76   :  { %v3736_v34 = vpop.eup %3735 }
0x1a77   :  { %v3738_v4 = vpop.eup %3737  ;;  %v2713_v38 = vmul.f32 %v3736_v34, %v2711_v43  ;;  %vm2719_vm14 = vweird.f32 %v3736_v34 }
0x1a78   :  { %v2725_v31 = vmul.f32 %v3738_v4, %v2723_v60  ;;  %vm2730_vm6 = vweird.f32 %v3738_v4  ;;  %vm2720_vm7 = vmor %vm2718_vm3, %vm2719_vm14  ;;  %v3120_v60 = vmul.f32 %v3119_v61, %v3932_v15 }
0x1a79   :  { %v2714_v48 = vmul.f32 %v3736_v34, %v2713_v38  ;;  %vm2731_vm5 = vmor %vm2729_vm2, %vm2730_vm6 }
0x1a7a   :  { %v2726_v16 = vsub.f32 1.0, %v2725_v31  ;;  %v3122_v31 = vmul.f32 %v3119_v61, %v3948_v25 }
0x1a7b   :  { %v2715_v49 = vmul.f32 0.5, %v2714_v48 }
0x1a7c   :  { %v2727_v21 = vmul.f32 %v3738_v4, %v2726_v16 }
0x1a7d   :  { %v2716_v7 = vsub.f32 1.5, %v2715_v49 }
0x1a7e   :  { %v2728_v26 = vadd.f32 %v3738_v4, %v2727_v21  ;;  %v3123_v21 = vmul.f32 %v3119_v61, %v3956_v30  ;;  %v2782_v30 = vld [vmem:[%s5393_s5 + $0x38] sm:$0xff] }
0x1a7f   :  { %v2717_v32 = vmul.f32 %v3736_v34, %v2716_v7 }
0x1a80   :  { %v2732_v10 = vsel %vm2731_vm5, %v3738_v4, %v2728_v26  ;;  %v3121_v26 = vmul.f32 %v3119_v61, %v3940_v20 }
0x1a81   :  { %v2721_v12 = vsel %vm2720_vm7, %v3736_v34, %v2717_v32  ;;  %v2737_v18 = vsel %vm2734_vm8, %v2736_v59, %v2732_v10 }
0x1a82   :  { %v2722_v11 = vmul.f32 %v2721_v12, %v2710_v8  ;;  %v2927_v12 = vperm.slane %v2782_v30, 0 }
0x1a84   :  { %v2738_v9 = vmul.f32 %v2737_v18, %v2722_v11 }
0x1a86   :  { %v2739_v27 = vmul.f32 %v2738_v9, %v2738_v9  ;;  %v2786_v17 = vmul.f32 %v2784_v13, %v2738_v9 }
0x1a88   :  { %3517 = vmatmul.msk.f32.vlgmr.msrb.gmra.mxu3 %vm1237_vm4, %v2739_v27  ;;  %3518 = vmatmul.msk.f32.vlgmr.msra.gmra.mxu0 %vm1237_vm4, %v2786_v17 }
0x1a90   :  { %3525 = vmatmul.msk.f32.vlgmr.msra.gmra.mxu3 %vm73_vm0, %v4277_v52  ;;  %v2841_v52 = vld [vmem:[%s5394_s17] sm:$0xff] }
0x1a98   :  { %3526 = vmatmul.msk.f32.gmra.mxu3 %vm73_vm0, %v4338_v19  ;;  %v5276_v19 = vld [vmem:[%s5395_s18] sm:$0x3] }
0x1aa0   :  { %3527 = vmatmul.msk.f32.gmra.mxu3 %vm73_vm0, %v4376_v44  ;;  %v2842_v44 = vld [vmem:[%s5394_s17 + $0x8] sm:$0xff] }
0x1aa8   :  { %3528 = vmatmul.msk.f32.gmra.mxu3 %vm73_vm0, %v4392_v62  ;;  %v2843_v62 = vld [vmem:[%s5394_s17 + $0x10] sm:$0xff] }
0x1b05   :  { %v2815_v50 = vpop.f32.mrf.mxu0 }
0x1b06   :  { %3519 = vmatmul.msk.f32.vlgmr.msrb.gmra.mxu2 %vm73_vm0, %v2815_v50 }
0x1b0b   :  { %v5304_v14 = vpop.f32.mrf.mxu3 }
0x1b13   :  { %v2906_v28 = vpop.f32.mrf.mxu3 }
0x1b1b   :  { %v2909_v3 = vpop.f32.mrf.mxu3 }
0x1b23   :  { %v2912_v22 = vpop.f32.mrf.mxu3 }
0x1b2b   :  { %v2915_v39 = vpop.f32.mrf.mxu3 }
0x1b89   :  { %v2838_v45 = vpop.f32.mrf.mxu2 }
0x1b8a   :  { %3520 = vmatpush.msk.msra.mxu1 %vm1359_vm12, %v2838_v45 }
0x1b8b   :  { %3521 = vmatmul.msk.f32.vlgmr.msra.gmra.mxu1 %vm1334_vm13, %v2841_v52 }
0x1b8c   :  { %3545 = vmatpush.msk.msrb.mxu1 %vm1359_vm12, %v5276_v19 }
0x1b93   :  { %3522 = vmatmul.msk.f32.gmra.mxu1 %vm1334_vm13, %v2842_v44 }
0x1b9b   :  { %3523 = vmatmul.msk.f32.gmra.mxu1 %vm1334_vm13, %v2843_v62 }
0x1ba3   :  { %3524 = vmatmul.msk.f32.gmra.mxu1 %vm1334_vm13, %v2844_v63 }
0x1bab   :  { %3546 = vmatmul.msk.f32.vlgmr.msrb.gmra.mxu1 %vm1334_vm13, %v2841_v52 }
0x1bb3   :  { %3547 = vmatmul.msk.f32.gmra.mxu1 %vm1334_vm13, %v2842_v44 }
0x1bbb   :  { %3548 = vmatmul.msk.f32.gmra.mxu1 %vm1334_vm13, %v2843_v62 }
0x1bc3   :  { %3549 = vmatmul.msk.f32.gmra.mxu1 %vm1334_vm13, %v2844_v63 }
0x1c08   :  { %v2877_v35 = vpop.f32.mrf.mxu1 }
0x1c09   :  { %v2907_v33 = vadd.f32 %v2906_v28, %v2877_v35 }
0x1c0b   :  { %v2919_v54 = vadd.f32 %v2918_v41, %v2907_v33 }
0x1c0d   :  { %v2923_v6 = vmax.f32 %v2919_v54, 0.0 }
0x1c0f   :  { %3529 = vmatmul.msk.f32.vlgmr.msrb.gmra.mxu0 %vm73_vm0, %v2923_v6 }
0x1c10   :  { %v2880_v40 = vpop.f32.mrf.mxu1 }
0x1c11   :  { %v2910_v5 = vadd.f32 %v2909_v3, %v2880_v40 }
0x1c13   :  { %v2920_v1 = vadd.f32 %v2918_v41, %v2910_v5 }
0x1c15   :  { %v2924_v37 = vmax.f32 %v2920_v1, 0.0 }
0x1c17   :  { %3530 = vmatmul.msk.f32.gmra.mxu0 %vm73_vm0, %v2924_v37 }
0x1c18   :  { %v2883_v58 = vpop.f32.mrf.mxu1 }
0x1c19   :  { %v2913_v23 = vadd.f32 %v2912_v22, %v2883_v58 }
0x1c1b   :  { %v2921_v51 = vadd.f32 %v2918_v41, %v2913_v23 }
0x1c1d   :  { %v2925_v29 = vmax.f32 %v2921_v51, 0.0 }
0x1c1f   :  { %3531 = vmatmul.msk.f32.gmra.mxu0 %vm73_vm0, %v2925_v29 }
0x1c20   :  { %v2886_v2 = vpop.f32.mrf.mxu1 }
0x1c21   :  { %v2916_v57 = vadd.f32 %v2915_v39, %v2886_v2  ;;  %v3773_v39 = vld [vmem:[%s5407_s30] sm:$0xff] }
0x1c23   :  { %v2922_v55 = vadd.f32 %v2918_v41, %v2916_v57 }
0x1c25   :  { %v2926_v43 = vmax.f32 %v2922_v55, 0.0 }
0x1c27   :  { %3532 = vmatmul.msk.f32.gmra.mxu0 %vm73_vm0, %v2926_v43 }
0x1c28   :  { %v3107_v34 = vpop.f32.mrf.mxu1 }
0x1c29   :  { %v5317_v4 = vmul.f32 %v3120_v60, %v3107_v34 }
0x1c30   :  { %v3110_v38 = vpop.f32.mrf.mxu1 }
0x1c31   :  { %v5330_v36 = vmul.f32 %v3121_v26, %v3110_v38 }
0x1c33   :  { %v3177_v25 = vsel %vm115_vm1, %v5330_v36, 0.0 }
0x1c38   :  { %v3113_v48 = vpop.f32.mrf.mxu1 }
0x1c39   :  { %v5320_v16 = vmul.f32 %v3122_v31, %v3113_v48 }
0x1c3b   :  { %v3180_v49 = vsel %vm115_vm1, %v5320_v16, 0.0 }
0x1c3c   :  { %3181 = vadd.xlane.f32.xlu0 %v3180_v49 }
0x1c40   :  { %v3116_v7 = vpop.f32.mrf.mxu1 }
0x1c41   :  { %v5325_v56 = vmul.f32 %v3123_v21, %v3116_v7 }
0x1c43   :  { %v3183_v15 = vsel %vm115_vm1, %v5325_v56, 0.0 }
0x1c44   :  { %3184 = vadd.xlane.f32.xlu0 %v3183_v15 }
0x1c4c   :  { %3178 = vadd.xlane.f32.xlu0 %v3177_v25  ;;  %v3774_v25 = vld [vmem:[%s5407_s30 + $0x8] sm:$0xff] }
0x1c8c   :  { %v2957_v32 = vpop.f32.mrf.mxu0 }
0x1c8d   :  { %v2958_v9 = vadd.f32 %v2957_v32, %v2927_v12 }
0x1c94   :  { %v2960_v8 = vpop.f32.mrf.mxu0 }
0x1c95   :  { %v2961_v20 = vadd.f32 %v2960_v8, %v2927_v12 }
0x1c9c   :  { %v2963_v10 = vpop.f32.mrf.mxu0 }
0x1c9d   :  { %v2964_v18 = vadd.f32 %v2963_v10, %v2927_v12 }
0x1ca4   :  { %v2966_v59 = vpop.f32.mrf.mxu0 }
0x1ca5   :  { %v2967_v11 = vadd.f32 %v2966_v59, %v2927_v12 }
0x1ca7   :  { %3533 = vmatpush.xpose.msk.msra.mxu2 %vm73_vm0, %v2967_v11 }
0x1cab   :  { %3534 = vmatpush.xpose.msk.msra.mxu2 %vm73_vm0, %v2964_v18 }
0x1caf   :  { %v3182_v13 = vpop.xlane.xlu0 %3181  ;;  %3535 = vmatpush.xpose.msk.msra.mxu2 %vm73_vm0, %v2961_v20 }
0x1cb3   :  { %3536 = vmatpush.xpose.msk.msra.mxu2 %vm73_vm0, %v2958_v9 }
0x1cb6   :  { %3537 = vmatmul.msk.f32.vlgmr.msra.gmra.mxu2 %vm73_vm0, %v2958_v9 }
0x1cb7   :  { %v3185_v27 = vpop.xlane.xlu0 %3184 }
0x1cb8   :  { %3198 = vmatpush.msra.mxu0 %v3185_v27 }
0x1cba   :  { %3199 = vmatpush.msra.mxu0 %v3182_v13 }
0x1cbe   :  { %3538 = vmatmul.msk.f32.gmra.mxu2 %vm73_vm0, %v2961_v20 }
0x1cbf   :  { %v3179_v17 = vpop.xlane.xlu0 %3178 }
0x1cc0   :  { %3200 = vmatpush.msra.mxu0 %v3179_v17 }
0x1cc6   :  { %3539 = vmatmul.msk.f32.gmra.mxu2 %vm73_vm0, %v2964_v18 }
0x1cce   :  { %3540 = vmatmul.msk.f32.gmra.mxu2 %vm73_vm0, %v2967_v11 }
0x1d39   :  { %v2998_v46 = vpop.f32.mrf.mxu2 }
0x1d3a   :  { %v3541_v47 = vmul.f32 -1.442695, %v2998_v46 }
0x1d3c   :  { %3739 = vpow2.f32 %v3541_v47 }
0x1d41   :  { %v3001_v50 = vpop.f32.mrf.mxu2 }
0x1d42   :  { %v3740_v52 = vpop.eup %3739  ;;  %v3542_v45 = vmul.f32 -1.442695, %v3001_v50 }
0x1d43   :  { %v3022_v44 = vadd.f32 1.0, %v3740_v52 }
0x1d44   :  { %3741 = vpow2.f32 %v3542_v45 }
0x1d45   :  { %3743 = vrcp.f32 %v3022_v44  ;;  %v3037_v35 = vand.u32 2147483648, %v3022_v44  ;;  %v3035_v54 = vand.u32 2147483647, %v3022_v44  ;;  %vm3031_vm4 = vweird.f32 %v3022_v44 }
0x1d47   :  { %v3038_v22 = vor.u32 1.1754944e-38, %v3037_v35  ;;  %vm3036_vm15 = vcmp.eq.f32.partialorder %v3035_v54, 8.507059e+37 }
0x1d49   :  { %v3004_v62 = vpop.f32.mrf.mxu2 }
0x1d4a   :  { %v3742_v63 = vpop.eup %3741  ;;  %v3543_v0 = vmul.f32 -1.442695, %v3004_v62 }
0x1d4b   :  { %v3744_v42 = vpop.eup %3743  ;;  %v3023_v28 = vadd.f32 1.0, %v3742_v63 }
0x1d4c   :  { %v3027_v24 = vmul.f32 %v3744_v42, %v3022_v44  ;;  %3745 = vpow2.f32 %v3543_v0  ;;  %vm3032_vm0 = vweird.f32 %v3744_v42 }
0x1d4d   :  { %3747 = vrcp.f32 %v3023_v28  ;;  %vm3033_vm13 = vmor %vm3031_vm4, %vm3032_vm0  ;;  %v3052_v53 = vand.u32 2147483648, %v3023_v28  ;;  %v3050_v61 = vand.u32 2147483647, %v3023_v28  ;;  %vm3046_vm11 = vweird.f32 %v3023_v28 }
0x1d4e   :  { %v3028_v41 = vsub.f32 1.0, %v3027_v24 }
0x1d4f   :  { %v3053_v48 = vor.u32 1.1754944e-38, %v3052_v53  ;;  %vm3051_vm14 = vcmp.eq.f32.partialorder %v3050_v61, 8.507059e+37 }
0x1d50   :  { %v3029_v33 = vmul.f32 %v3744_v42, %v3028_v41  ;;  %v3776_v41 = vld [vmem:[%s5407_s30 + $0x18] sm:$0xff] }
0x1d51   :  { %v3007_v3 = vpop.f32.mrf.mxu2 }
0x1d52   :  { %v3746_v6 = vpop.eup %3745  ;;  %v3544_v40 = vmul.f32 -1.442695, %v3007_v3  ;;  %v3030_v5 = vadd.f32 %v3744_v42, %v3029_v33  ;;  %v3174_v3 = vsel %vm115_vm1, %v5317_v4, 0.0 }
0x1d53   :  { %v3748_v1 = vpop.eup %3747  ;;  %v3024_v37 = vadd.f32 1.0, %v3746_v6 }
0x1d54   :  { %v3042_v58 = vmul.f32 %v3748_v1, %v3023_v28  ;;  %3749 = vpow2.f32 %v3544_v40  ;;  %v3034_v23 = vsel %vm3033_vm13, %v3744_v42, %v3030_v5  ;;  %vm3047_vm10 = vweird.f32 %v3748_v1 }
0x1d55   :  { %3751 = vrcp.f32 %v3024_v37  ;;  %v3039_v51 = vsel %vm3036_vm15, %v3038_v22, %v3034_v23  ;;  %vm3048_vm6 = vmor %vm3046_vm11, %vm3047_vm10  ;;  %v3067_v8 = vand.u32 2147483648, %v3024_v37  ;;  %v3065_v12 = vand.u32 2147483647, %v3024_v37 }
0x1d56   :  { %v3043_v29 = vsub.f32 1.0, %v3042_v58  ;;  %v3128_v2 = vsub.f32 %v3039_v51, %v3773_v39  ;;  %vm3061_vm3 = vweird.f32 %v3024_v37  ;;  %v2761_v22 = vadd.f32 1e-07, %v5304_v14 }
0x1d57   :  { %v3068_v20 = vor.u32 1.1754944e-38, %v3067_v8  ;;  %vm3066_vm7 = vcmp.eq.f32.partialorder %v3065_v12, 8.507059e+37  ;;  %vm3215_vm10 = vcmask 39936   ;;  %vm3217_vm11 = vcmask 48128  }
0x1d58   :  { %v3132_v57 = vmul.f32 %v3128_v2, %v5317_v4  ;;  %v3044_v55 = vmul.f32 %v3748_v1, %v3043_v29  ;;  %vm2770_vm15 = vcmp.eq.f32.partialorder %v2761_v22, inf }
0x1d5a   :  { %v3750_v43 = vpop.eup %3749  ;;  %v3136_v60 = vmul.f32 %v3132_v57, %v3128_v2  ;;  %v3045_v34 = vadd.f32 %v3748_v1, %v3044_v55  ;;  %v2773_v55 = vand.u32 2147483648, %v2761_v22 }
0x1d5b   :  { %v3752_v38 = vpop.eup %3751  ;;  %v3025_v31 = vadd.f32 1.0, %v3750_v43 }
0x1d5c   :  { %v3057_v49 = vmul.f32 %v3752_v38, %v3024_v37  ;;  %v3140_v21 = vsel %vm115_vm1, %v3136_v60, 0.0  ;;  %v3049_v7 = vsel %vm3048_vm6, %v3748_v1, %v3045_v34  ;;  %vm3062_vm2 = vweird.f32 %v3752_v38 }
0x1d5d   :  { %3753 = vrcp.f32 %v3025_v31  ;;  %3141 = vadd.xlane.f32.xlu1 %v3140_v21  ;;  %v3054_v15 = vsel %vm3051_vm14, %v3053_v48, %v3049_v7  ;;  %vm3063_vm5 = vmor %vm3061_vm3, %vm3062_vm2  ;;  %v3082_v50 = vand.u32 2147483648, %v3025_v31  ;;  %v3080_v44 = vand.u32 2147483647, %v3025_v31 }
0x1d5e   :  { %v3058_v26 = vsub.f32 1.0, %v3057_v49  ;;  %v3129_v32 = vsub.f32 %v3054_v15, %v3774_v25  ;;  %vm3076_vm0 = vweird.f32 %v3025_v31  ;;  %3755 = vrsqrt.f32 %v2761_v22 }
0x1d5f   :  { %v3083_v0 = vor.u32 1.1754944e-38, %v3082_v50  ;;  %vm3081_vm13 = vcmp.eq.f32.partialorder %v3080_v44, 8.507059e+37 }
0x1d60   :  { %v3133_v10 = vmul.f32 %v3129_v32, %v5330_v36  ;;  %v3059_v30 = vmul.f32 %v3752_v38, %v3058_v26  ;;  %v3775_v36 = vld [vmem:[%s5407_s30 + $0x10] sm:$0xff]  ;;  %s3780_s30 = smov 4  }
0x1d62   :  { %v3137_v59 = vmul.f32 %v3133_v10, %v3129_v32  ;;  %v3060_v11 = vadd.f32 %v3752_v38, %v3059_v30 }
0x1d63   :  { %v3754_v18 = vpop.eup %3753 }
0x1d64   :  { %v3072_v13 = vmul.f32 %v3754_v18, %v3025_v31  ;;  %v3143_v9 = vsel %vm115_vm1, %v3137_v59, 0.0  ;;  %v3064_v27 = vsel %vm3063_vm5, %v3752_v38, %v3060_v11  ;;  %vm3077_vm8 = vweird.f32 %v3754_v18  ;;  %v3756_v58 = vpop.eup %3755 }
0x1d65   :  { %3144 = vadd.xlane.f32.xlu2 %v3143_v9  ;;  %v3069_v17 = vsel %vm3066_vm7, %v3068_v20, %v3064_v27  ;;  %vm3078_vm4 = vmor %vm3076_vm0, %vm3077_vm8  ;;  %v2764_v23 = vmul.f32 %v3756_v58, %v2761_v22 }
0x1d66   :  { %v3073_v46 = vsub.f32 1.0, %v3072_v13  ;;  %v3130_v47 = vsub.f32 %v3069_v17, %v3775_v36 }
0x1d67   :  { %v2765_v51 = vmul.f32 %v3756_v58, %v2764_v23 }
0x1d68   :  { %v3134_v52 = vmul.f32 %v3130_v47, %v5320_v16  ;;  %v3074_v45 = vmul.f32 %v3754_v18, %v3073_v46 }
0x1d69   :  { %v2766_v29 = vmul.f32 0.5, %v2765_v51 }
0x1d6a   :  { %v3138_v62 = vmul.f32 %v3134_v52, %v3130_v47  ;;  %v3075_v63 = vadd.f32 %v3754_v18, %v3074_v45 }
0x1d6b   :  { %v2767_v39 = vsub.f32 1.5, %v2766_v29 }
0x1d6c   :  { %v3146_v42 = vsel %vm115_vm1, %v3138_v62, 0.0  ;;  %v3079_v28 = vsel %vm3078_vm4, %v3754_v18, %v3075_v63 }
0x1d6d   :  { %3147 = vadd.xlane.f32.xlu2 %v3146_v42  ;;  %v3084_v24 = vsel %vm3081_vm13, %v3083_v0, %v3079_v28  ;;  %v2768_v2 = vmul.f32 %v3756_v58, %v2767_v39 }
0x1d6e   :  { %v3131_v35 = vsub.f32 %v3084_v24, %v3776_v41 }
0x1d6f   :  { %v2769_v53 = vmul.f32 %v2768_v2, %v2761_v22 }
0x1d70   :  { %v3135_v16 = vmul.f32 %v3131_v35, %v5325_v56 }
0x1d71   :  { %v2771_v57 = vsel %vm2770_vm15, %v2761_v22, %v2769_v53 }
0x1d72   :  { %v3139_v33 = vmul.f32 %v3135_v16, %v3131_v35 }
0x1d74   :  { %v3149_v54 = vsel %vm115_vm1, %v3139_v33, 0.0 }
0x1d75   :  { %3150 = vadd.xlane.f32.xlu2 %v3149_v54 }
0x1d7d   :  { %3175 = vadd.xlane.f32.xlu2 %v3174_v3 }
0x1dd0   :  { %v3142_v1 = vpop.xlane.xlu1 %3141 }
0x1dd8   :  { %v3145_v6 = vpop.xlane.xlu2 %3144 }
0x1de0   :  { %v3148_v40 = vpop.xlane.xlu2 %3147 }
0x1de8   :  { %v3151_v5 = vpop.xlane.xlu2 %3150 }
0x1de9   :  { %3166 = vmatpush.msra.mxu1 %v3151_v5 }
0x1deb   :  { %3167 = vmatpush.msra.mxu1 %v3148_v40 }
0x1ded   :  { %3168 = vmatpush.msra.mxu1 %v3145_v6 }
0x1def   :  { %3169 = vmatpush.msra.mxu1 %v3142_v1 }
0x1df0   :  { %3550 = vmatmul.msk.f32.vlgmr.msra.gmra.mxu1 %vm115_vm1, %v5276_v19  ;;  %v3176_v56 = vpop.xlane.xlu2 %3175 }
0x1df1   :  { %3201 = vmatpush.msra.mxu0 %v3176_v56 }
0x1df2   :  { %3551 = vmatmul.msk.f32.vlgmr.msra.gmra.mxu0 %vm115_vm1, %v5276_v19  ;;  %vm2772_vm1 = vcmp.eq.f32.partialorder %v2761_v22, 0.0 }
0x1df3   :  { %v2774_v61 = vsel %vm2772_vm1, %v2773_v55, %v2771_v57 }
0x1e6d   :  { %v3171_v37 = vpop.f32.mrf.mxu1 }
0x1e6e   :  { %3207 = vrot.lane.b32.xlu0 %v3171_v37, %s3780_s30 }
0x1e6f   :  { %v3203_v4 = vpop.f32.mrf.mxu0 }
0x1e70   :  { %3211 = vrot.lane.b32.xlu2 %v3203_v4, %s3781_s15 }
0x1eca   :  { %v3212_v19 = vpop.permute.xlu2 %3211 }
0x1ee0   :  { %v3208_v43 = vpop.permute.xlu0 %3207 }
0x1ee1   :  { %v3214_v60 = vsel %vm2189_vm9, %v2774_v61, %v3208_v43 }
0x1ee2   :  { %v3216_v14 = vsel %vm3215_vm10, %v3214_v60, %v3212_v19 }
0x1ee3   :  { %v3218_v34 = vsel %vm3217_vm11, %v3216_v14, 0.0 }
0x1ee4   :  { %v3219_v38 = vsel %vm1359_vm12, %v3218_v34, 0.0 }
0x1ee5   :  { %3220 = vst [vmem:[%s5396_s19] sm:$0xff] %v3219_v38 }

</bundles_post_ra>
